<compile_context>
chip_gen: v5e
topology: v5e:2x2
jax: 0.10.0
libtpu: 0.0.40
codegen_flags: <defaults>
</compile_context>

<pallas_src>
import functools

import jax
import jax.numpy as jnp
from jax.experimental import pallas as pl
from jax.experimental.pallas import tpu as pltpu

K_CHEB = 5
FIN_PAD = 128   # both ChebConv levels run with a 128-wide (lane-dense) input


# ----------------------------------------------------------------------------
# Fused per-graph kernel: 2x bidirectional ChebConv + mean pool + fc + block
# log-softmax.  One grid step == one graph.
# ----------------------------------------------------------------------------
def hbnet_graph_kernel(twoL_f_ref, twoL_r_ref, x_ref, poolw_ref,
                       w1f_ref, w1r_ref, b1_ref,
                       w2f_ref, w2r_ref, b2_ref,
                       fcw_ref, fcb_ref, segt_ref,
                       o_ref, tstack_ref, *, num_segments, mxu_dtype):
    """Refs (per grid step g):

    twoL_f_ref/twoL_r_ref : (Nmax, Nmax)  2*L_hat blocks, already mxu_dtype
    x_ref                 : (Nmax, 128)   node features zero-padded, f32
    poolw_ref             : (Nmax, 1)     1/n_g on valid rows, 0 on padding
    w1*_ref               : (K*128, 64)   level-1 Cheb weights, mxu_dtype
    b1_ref                : (1, 128)      level-1 bias (fwd||rev), f32
    w2*_ref               : (K*128, 256)  level-2 Cheb weights, mxu_dtype
    b2_ref                : (1, 512)      level-2 bias (fwd||rev), f32
    fcw_ref               : (512, C)      mxu_dtype;  fcb_ref: (1, C) f32
    segt_ref              : (S, C)        one-hot segment rows, f32
    o_ref                 : (1, C)        this graph's block log-softmax row
    tstack_ref            : (Nmax, K*128) VMEM scratch for the Chebyshev stack
    """

    def cast(a):
        return a.astype(mxu_dtype)

    twoL_f = twoL_f_ref[...]
    twoL_r = twoL_r_ref[...]

    def cheb_stack(twoL):
        """Fill tstack_ref with cast(T_k), k=0..K-1, from the f32 carry pair.

        T_0 = x, T_1 = L x = 0.5 * (2L) x, T_k = (2L) T_{k-1} - T_{k-2}.
        Only t_prev/t_cur stay live in f32; stores land at 128-lane-aligned
        offsets (unmasked vst).
        """
        def fill(twoL, feat_f32):
            t_prev = feat_f32
            tstack_ref[:, 0:FIN_PAD] = cast(t_prev)
            t_cur = 0.5 * jnp.dot(twoL, cast(feat_f32),
                                  preferred_element_type=jnp.float32)
            tstack_ref[:, FIN_PAD:2 * FIN_PAD] = cast(t_cur)
            for k in range(2, K_CHEB):
                t_next = jnp.dot(twoL, cast(t_cur),
                                 preferred_element_type=jnp.float32) - t_prev
                tstack_ref[:, k * FIN_PAD:(k + 1) * FIN_PAD] = cast(t_next)
                t_prev, t_cur = t_cur, t_next
        return fill(twoL, _feat)

    def dual_cheb(feat, wf_ref, wr_ref, b_ref):
        # fwd branch
        nonlocal _feat
        _feat = feat
        cheb_stack(twoL_f)
        zf = jnp.dot(tstack_ref[...], wf_ref[...],
                     preferred_element_type=jnp.float32)
        # rev branch (scratch fully overwritten; fwd result already consumed)
        cheb_stack(twoL_r)
        zr = jnp.dot(tstack_ref[...], wr_ref[...],
                     preferred_element_type=jnp.float32)
        z = jnp.concatenate([zf, zr], axis=1) + b_ref[...]
        return jnp.maximum(z, 0.0)

    _feat = None
    h = dual_cheb(x_ref[...], w1f_ref, w1r_ref, b1_ref)        # (Nmax, 128)
    h = dual_cheb(h, w2f_ref, w2r_ref, b2_ref)                 # (Nmax, 512)

    # Per-graph mean pool: weighted row-sum (weights already carry 1/n_g and
    # zero out padding rows, whose relu(bias) values must not contribute).
    pooled = jnp.sum(h * poolw_ref[...], axis=0, keepdims=True)  # (1, 512) f32

    logits = jnp.dot(cast(pooled), fcw_ref[...],
                     preferred_element_type=jnp.float32) + fcb_ref[...]  # (1,C)

    # Hierarchical block log-softmax, numerically stable (per-segment max
    # shift) via masked selects.
    segt = segt_ref[...]                                          # (S, C)
    norm = jnp.zeros_like(logits)
    for s in range(num_segments):                                 # static, small
        mask = segt[s:s + 1, :] > 0.5                             # (1, C)
        z_m = jnp.where(mask, logits, jnp.float32(-1e30))
        m = jnp.max(z_m, axis=-1, keepdims=True)
        ssum = jnp.sum(jnp.exp(z_m - m), axis=-1, keepdims=True)
        norm = jnp.where(mask, m + jnp.log(ssum), norm)
    o_ref[...] = logits - norm


def _vmem_cap_bytes():
    """Physical VMEM minus headroom; falls back to a v7x-safe 56 MiB."""
    try:
        return int(pltpu.get_tpu_info().vmem_capacity_bytes) - 8 * 2**20
    except Exception:
        return 56 * 2**20


def hbnet_fused(twoL_f, twoL_r, x_pad, poolw, w1f, w1r, b1, w2f, w2r, b2,
                fcw, fcb, segt, *, num_segments, mxu_dtype):
    bsz, nmax, _ = twoL_f.shape
    c = fcw.shape[-1]
    mxu_sz = jnp.dtype(mxu_dtype).itemsize

    # VMEM sizing from the actual live set: double-buffered per-graph blocks,
    # (effectively resident) weights, the T-stack scratch, and in-kernel f32
    # temporaries (h, z, carries).  Capped below physical VMEM.
    per_graph = 2 * nmax * nmax * mxu_sz + 2 * nmax * FIN_PAD * 4
    weights = (2 * K_CHEB * FIN_PAD * 64 + 2 * K_CHEB * FIN_PAD * 256
               + 512 * max(c, 128)) * mxu_sz + (128 + 512 + 2 * 128 + 512) * 4
    scratch = nmax * K_CHEB * FIN_PAD * mxu_sz
    temps = 8 * nmax * 512 * 4
    live = 2 * (per_graph + weights) + scratch + temps
    vmem_limit = int(min(_vmem_cap_bytes(), max(32 * 2**20, 2 * live)))

    kernel = functools.partial(hbnet_graph_kernel,
                               num_segments=num_segments, mxu_dtype=mxu_dtype)

    grid_spec = pltpu.PrefetchScalarGridSpec(
        num_scalar_prefetch=0,
        grid=(bsz,),
        in_specs=[
            pl.BlockSpec((None, nmax, nmax), lambda g: (g, 0, 0)),   # 2L fwd
            pl.BlockSpec((None, nmax, nmax), lambda g: (g, 0, 0)),   # 2L rev
            pl.BlockSpec((None, nmax, FIN_PAD), lambda g: (g, 0, 0)),  # x
            pl.BlockSpec((None, nmax, 1), lambda g: (g, 0, 0)),      # pool w
            pl.BlockSpec((K_CHEB * FIN_PAD, 64), lambda g: (0, 0)),  # w1 fwd
            pl.BlockSpec((K_CHEB * FIN_PAD, 64), lambda g: (0, 0)),  # w1 rev
            pl.BlockSpec((1, 128), lambda g: (0, 0)),                # b1
            pl.BlockSpec((K_CHEB * FIN_PAD, 256), lambda g: (0, 0)),  # w2 fwd
            pl.BlockSpec((K_CHEB * FIN_PAD, 256), lambda g: (0, 0)),  # w2 rev
            pl.BlockSpec((1, 512), lambda g: (0, 0)),                # b2
            pl.BlockSpec((512, c), lambda g: (0, 0)),                # fc w
            pl.BlockSpec((1, c), lambda g: (0, 0)),                  # fc b
            pl.BlockSpec((num_segments, c), lambda g: (0, 0)),       # segments
        ],
        out_specs=pl.BlockSpec((None, 1, c), lambda g: (g, 0, 0)),
        scratch_shapes=[pltpu.VMEM((nmax, K_CHEB * FIN_PAD), mxu_dtype)],
    )

    out = pl.pallas_call(
        kernel,
        out_shape=jax.ShapeDtypeStruct((bsz, 1, c), jnp.float32),
        grid_spec=grid_spec,
        compiler_params=pltpu.CompilerParams(
            dimension_semantics=("parallel",),       # v7x: 2 TCs split graphs
            vmem_limit_bytes=vmem_limit),
    )(twoL_f, twoL_r, x_pad, poolw, w1f, w1r, b1, w2f, w2r, b2, fcw, fcb, segt)
    return out.reshape(bsz, c)


# ----------------------------------------------------------------------------
# Glue (plain JAX / XLA): per-graph operator construction, padding, params
# ----------------------------------------------------------------------------
def scaled_laplacian(edge_index, num_nodes):
    """Dense global L_hat = -D^{-1/2} A D^{-1/2} (reference only)."""
    row, col = edge_index[0], edge_index[1]
    ew = jnp.ones(row.shape[0], jnp.float32)
    deg = jnp.zeros((num_nodes,), jnp.float32).at[row].add(ew)
    dis = jnp.where(deg > 0, jax.lax.rsqrt(jnp.maximum(deg, 1e-12)), 0.0)
    w = dis[row] * ew * dis[col]
    return jnp.zeros((num_nodes, num_nodes), jnp.float32).at[col, row].add(-w)


def per_graph_scaled_laplacian(edge_index, batch, local, num_graphs, nmax):
    """Block-diagonal L_hat split into per-graph (nmax, nmax) dense blocks."""
    row, col = edge_index[0], edge_index[1]
    n = batch.shape[0]
    ew = jnp.ones(row.shape[0], jnp.float32)
    deg = jnp.zeros((n,), jnp.float32).at[row].add(ew)
    dis = jnp.where(deg > 0, jax.lax.rsqrt(jnp.maximum(deg, 1e-12)), 0.0)
    w = dis[row] * ew * dis[col]
    g = batch[row]                     # edges never cross graphs
    return jnp.zeros((num_graphs, nmax, nmax), jnp.float32).at[
        g, local[col], local[row]].add(-w)


def make_params(key, num_features, num_outputs):
    ks = jax.random.split(key, 10)

    def cheb_w(k, fin, fout):
        scale = 1.0 / jnp.sqrt(jnp.float32(fin * K_CHEB))
        return jax.random.normal(k, (K_CHEB, fin, fout), jnp.float32) * scale

    return {
        "conv11_w": cheb_w(ks[0], num_features, 64),
        "conv11_b": jnp.zeros((1, 64), jnp.float32),
        "conv12_w": cheb_w(ks[1], num_features, 64),
        "conv12_b": jnp.zeros((1, 64), jnp.float32),
        "conv21_w": cheb_w(ks[2], 128, 256),
        "conv21_b": jnp.zeros((1, 256), jnp.float32),
        "conv22_w": cheb_w(ks[3], 128, 256),
        "conv22_b": jnp.zeros((1, 256), jnp.float32),
        "fc_w": jax.random.normal(ks[4], (512, num_outputs), jnp.float32)
                * (1.0 / jnp.sqrt(512.0)),
        "fc_b": jax.random.normal(ks[5], (1, num_outputs), jnp.float32) * 0.01,
    }


@functools.partial(
    jax.jit,
    static_argnames=("num_graphs", "nmax", "num_segments", "mxu_dtype"))
def hbnet_forward(params, x, edge_index, batch, class_mask, *,
                  num_graphs, nmax, num_segments, mxu_dtype=jnp.bfloat16):
    # PyG-style batching assumed: nodes of each graph are contiguous / sorted.
    n = x.shape[0]
    counts = jnp.zeros((num_graphs,), jnp.int32).at[batch].add(1)
    offsets = jnp.concatenate(
        [jnp.zeros((1,), jnp.int32), jnp.cumsum(counts)[:-1]])
    local = jnp.arange(n, dtype=jnp.int32) - offsets[batch]

    # Per-graph 2*L_hat blocks, pre-cast to the MXU dtype in the wrapper so
    # only one (nmax,nmax) operand per direction ever sits in VMEM.
    l_fwd = per_graph_scaled_laplacian(edge_index, batch, local, num_graphs, nmax)
    l_rev = per_graph_scaled_laplacian(edge_index[::-1], batch, local,
                                       num_graphs, nmax)
    twoL_f = (l_fwd + l_fwd).astype(mxu_dtype)
    twoL_r = (l_rev + l_rev).astype(mxu_dtype)

    # Node features: scatter into per-graph rows, zero-pad features to 128.
    f_in = x.shape[1]
    x_padded = jnp.pad(x, ((0, 0), (0, FIN_PAD - f_in)))
    x_pad = jnp.zeros((num_graphs, nmax, FIN_PAD), jnp.float32
                      ).at[batch, local].set(x_padded)

    # Mean-pool weights: 1/n_g on valid rows, 0 on padding rows.
    inv_cnt = 1.0 / jnp.maximum(counts.astype(jnp.float32), 1.0)
    poolw = jnp.zeros((num_graphs, nmax, 1), jnp.float32
                      ).at[batch, local, 0].set(inv_cnt[batch])

    # Chebyshev weights: zero-pad Fin to 128 (level 1), flatten to (K*128, F),
    # pre-cast to the MXU dtype (stacked 640-deep contraction in-kernel).
    def flat_pad(w):
        k, fin, fout = w.shape
        if fin < FIN_PAD:
            w = jnp.pad(w, ((0, 0), (0, FIN_PAD - fin), (0, 0)))
        return w.reshape(k * FIN_PAD, fout).astype(mxu_dtype)

    w1f, w1r = flat_pad(params["conv11_w"]), flat_pad(params["conv12_w"])
    w2f, w2r = flat_pad(params["conv21_w"]), flat_pad(params["conv22_w"])
    b1 = jnp.concatenate([params["conv11_b"], params["conv12_b"]], axis=1)
    b2 = jnp.concatenate([params["conv21_b"], params["conv22_b"]], axis=1)
    fcw = params["fc_w"].astype(mxu_dtype)
    fcb = params["fc_b"]

    # Segment one-hot rows (S, C) for the hierarchical block softmax.
    segt = (jnp.arange(num_segments)[:, None] == class_mask[None, :]
            ).astype(jnp.float32)

    return hbnet_fused(twoL_f, twoL_r, x_pad, poolw, w1f, w1r, b1, w2f, w2r,
                       b2, fcw, fcb, segt,
                       num_segments=num_segments, mxu_dtype=mxu_dtype)


# pure-JAX reference for a numerical sanity check
def hbnet_reference(params, x, edge_index, batch, class_mask,
                    num_graphs, num_segments):
    def cheb_ref(L, x, W, b):
        t0 = x
        out = t0 @ W[0]
        t1 = L @ t0
        out = out + t1 @ W[1]
        for k in range(2, K_CHEB):
            t2 = 2.0 * (L @ t1) - t0
            out = out + t2 @ W[k]
            t0, t1 = t1, t2
        return jnp.maximum(out + b, 0.0)

    n = x.shape[0]
    l_fwd = scaled_laplacian(edge_index, n)
    l_rev = scaled_laplacian(edge_index[::-1], n)
    h = jnp.concatenate(
        [cheb_ref(l_fwd, x, params["conv11_w"], params["conv11_b"]),
         cheb_ref(l_rev, x, params["conv12_w"], params["conv12_b"])], axis=1)
    h = jnp.concatenate(
        [cheb_ref(l_fwd, h, params["conv21_w"], params["conv21_b"]),
         cheb_ref(l_rev, h, params["conv22_w"], params["conv22_b"])], axis=1)
    counts = jnp.zeros((num_graphs,), jnp.float32).at[batch].add(1.0)
    pooled = jnp.zeros((num_graphs, h.shape[1]), jnp.float32
                       ).at[batch].add(h) / counts[:, None]
    z = pooled @ params["fc_w"] + params["fc_b"]
    norm_sparse = jnp.log(
        jnp.zeros((num_graphs, num_segments), jnp.float32
                  ).at[:, class_mask].add(jnp.exp(z)))
    return z - norm_sparse[:, class_mask]


if __name__ == "__main__":
    key = jax.random.PRNGKey(0)

    # small synthetic problem: 2 graphs of 10 nodes each, 16 input features,
    # hierarchical class mask with 3 softmax blocks over 7 outputs.
    num_features = 16
    nodes_per_graph = 10
    num_graphs = 2
    n_nodes = nodes_per_graph * num_graphs

    class_mask = jnp.asarray([0, 0, 1, 1, 1, 2, 2], dtype=jnp.int32)
    num_outputs = int(class_mask.shape[0])
    num_segments = 3

    k_x, k_p = jax.random.split(key)
    x = jax.random.normal(k_x, (n_nodes, num_features), jnp.float32)

    # directed path within each graph (0->1->...->9, 10->11->...->19)
    src, dst = [], []
    for g in range(num_graphs):
        base = g * nodes_per_graph
        for i in range(nodes_per_graph - 1):
            src.append(base + i)
            dst.append(base + i + 1)
    edge_index = jnp.asarray([src, dst], dtype=jnp.int32)  # (2, E)
    batch = jnp.repeat(jnp.arange(num_graphs, dtype=jnp.int32),
                       nodes_per_graph)
    nmax = max(8, ((nodes_per_graph + 7) // 8) * 8)   # sublane-aligned pad

    params = make_params(k_p, num_features, num_outputs)
    ref = hbnet_reference(params, x, edge_index, batch, class_mask,
                          num_graphs, num_segments)

    # exact-arithmetic path (f32 MXU operands): tight check vs reference
    out_f32 = hbnet_forward(params, x, edge_index, batch, class_mask,
                            num_graphs=num_graphs, nmax=nmax,
                            num_segments=num_segments, mxu_dtype=jnp.float32)
    out_f32 = jax.block_until_ready(out_f32)
    assert out_f32.shape == (num_graphs, num_outputs)
    assert bool(jnp.allclose(out_f32, ref, atol=1e-3, rtol=1e-3)), \
        "f32 mismatch vs reference"

    # fast path (bf16 MXU operands, f32 accumulation) -- the v6e/v7x default
    out_bf16 = hbnet_forward(params, x, edge_index, batch, class_mask,
                             num_graphs=num_graphs, nmax=nmax,
                             num_segments=num_segments,
                             mxu_dtype=jnp.bfloat16)
    out_bf16 = jax.block_until_ready(out_bf16)
    assert out_bf16.shape == (num_graphs, num_outputs)
    assert bool(jnp.allclose(out_bf16, ref, atol=2e-1, rtol=2e-1)), \
        "bf16 path diverged"

    print("KERNEL_OK")
</pallas_src>

<mosaic_0001>
module attributes {stable_mosaic.version = 11 : i64} {
  func.func @hbnet_graph_kernel(%arg0: i32, %arg1: memref<1x16x16xf32, #tpu.memory_space<vmem>>, %arg2: memref<1x16x16xf32, #tpu.memory_space<vmem>>, %arg3: memref<1x16x128xf32, #tpu.memory_space<vmem>>, %arg4: memref<1x16x1xf32, #tpu.memory_space<vmem>>, %arg5: memref<640x64xf32, #tpu.memory_space<vmem>>, %arg6: memref<640x64xf32, #tpu.memory_space<vmem>>, %arg7: memref<1x128xf32, #tpu.memory_space<vmem>>, %arg8: memref<640x256xf32, #tpu.memory_space<vmem>>, %arg9: memref<640x256xf32, #tpu.memory_space<vmem>>, %arg10: memref<1x512xf32, #tpu.memory_space<vmem>>, %arg11: memref<512x7xf32, #tpu.memory_space<vmem>>, %arg12: memref<1x7xf32, #tpu.memory_space<vmem>>, %arg13: memref<3x7xf32, #tpu.memory_space<vmem>>, %arg14: memref<1x1x7xf32, #tpu.memory_space<vmem>>, %arg15: memref<16x640xf32, #tpu.memory_space<vmem>>) attributes {dimension_semantics = [#tpu.dimension_semantics<parallel>], iteration_bounds = array<i64: 2>, scalar_prefetch = 0 : i64, scratch_operands = 1 : i64, tpu.core_type = #tpu.core_type<tc>, window_params = [{transform_indices = @transform_0, window_bounds = array<i64: 1, 16, 16>}, {transform_indices = @transform_1, window_bounds = array<i64: 1, 16, 16>}, {transform_indices = @transform_2, window_bounds = array<i64: 1, 16, 128>}, {transform_indices = @transform_3, window_bounds = array<i64: 1, 16, 1>}, {pipeline_mode = #tpu.pipeline_mode<synchronous>, transform_indices = @transform_4, window_bounds = array<i64: 640, 64>}, {pipeline_mode = #tpu.pipeline_mode<synchronous>, transform_indices = @transform_5, window_bounds = array<i64: 640, 64>}, {pipeline_mode = #tpu.pipeline_mode<synchronous>, transform_indices = @transform_6, window_bounds = array<i64: 1, 128>}, {pipeline_mode = #tpu.pipeline_mode<synchronous>, transform_indices = @transform_7, window_bounds = array<i64: 640, 256>}, {pipeline_mode = #tpu.pipeline_mode<synchronous>, transform_indices = @transform_8, window_bounds = array<i64: 640, 256>}, {pipeline_mode = #tpu.pipeline_mode<synchronous>, transform_indices = @transform_9, window_bounds = array<i64: 1, 512>}, {pipeline_mode = #tpu.pipeline_mode<synchronous>, transform_indices = @transform_10, window_bounds = array<i64: 512, 7>}, {pipeline_mode = #tpu.pipeline_mode<synchronous>, transform_indices = @transform_11, window_bounds = array<i64: 1, 7>}, {pipeline_mode = #tpu.pipeline_mode<synchronous>, transform_indices = @transform_12, window_bounds = array<i64: 3, 7>}, {transform_indices = @transform_13, window_bounds = array<i64: 1, 1, 7>}]} {
    %c0 = arith.constant 0 : index
    %c0_0 = arith.constant 0 : index
    %c0_1 = arith.constant 0 : index
    %0 = vector.load %arg1[%c0, %c0_0, %c0_1] : memref<1x16x16xf32, #tpu.memory_space<vmem>>, vector<1x16x16xf32>
    %1 = vector.shape_cast %0 : vector<1x16x16xf32> to vector<16x16xf32>
    %c0_2 = arith.constant 0 : index
    %c0_3 = arith.constant 0 : index
    %c0_4 = arith.constant 0 : index
    %2 = vector.load %arg2[%c0_2, %c0_3, %c0_4] : memref<1x16x16xf32, #tpu.memory_space<vmem>>, vector<1x16x16xf32>
    %3 = vector.shape_cast %2 : vector<1x16x16xf32> to vector<16x16xf32>
    %c0_5 = arith.constant 0 : index
    %c0_6 = arith.constant 0 : index
    %c0_7 = arith.constant 0 : index
    %4 = vector.load %arg3[%c0_5, %c0_6, %c0_7] : memref<1x16x128xf32, #tpu.memory_space<vmem>>, vector<1x16x128xf32>
    %5 = vector.shape_cast %4 : vector<1x16x128xf32> to vector<16x128xf32>
    %c0_8 = arith.constant 0 : index
    %c0_9 = arith.constant 0 : index
    %6 = vector.load %arg15[%c0_8, %c0_9] : memref<16x640xf32, #tpu.memory_space<vmem>>, vector<16x128xf32>
    tpu.vector_store %arg15[%c0_8, %c0_9], %5 {strides = array<i32>} : memref<16x640xf32, #tpu.memory_space<vmem>>, vector<16x128xf32>,
    %cst = arith.constant dense<0.000000e+00> : vector<16x128xf32>
    %7 = tpu.matmul %1, %5, %cst {dimension_numbers = #tpu.dot_dimension_numbers<[1], [0], [0], [1], [0, 0, 1, 1], [], []>} : vector<16x16xf32>, vector<16x128xf32>, vector<16x128xf32> -> vector<16x128xf32>
    %cst_10 = arith.constant 5.000000e-01 : f32
    %8 = vector.broadcast %cst_10 : f32 to vector<16x128xf32>
    %9 = arith.mulf %8, %7 : vector<16x128xf32>
    %c0_11 = arith.constant 0 : index
    %c128 = arith.constant 128 : index
    %10 = vector.load %arg15[%c0_11, %c128] : memref<16x640xf32, #tpu.memory_space<vmem>>, vector<16x128xf32>
    tpu.vector_store %arg15[%c0_11, %c128], %9 {strides = array<i32>} : memref<16x640xf32, #tpu.memory_space<vmem>>, vector<16x128xf32>,
    %cst_12 = arith.constant dense<0.000000e+00> : vector<16x128xf32>
    %11 = tpu.matmul %1, %9, %cst_12 {dimension_numbers = #tpu.dot_dimension_numbers<[1], [0], [0], [1], [0, 0, 1, 1], [], []>} : vector<16x16xf32>, vector<16x128xf32>, vector<16x128xf32> -> vector<16x128xf32>
    %12 = arith.subf %11, %5 : vector<16x128xf32>
    %c0_13 = arith.constant 0 : index
    %c256 = arith.constant 256 : index
    %13 = vector.load %arg15[%c0_13, %c256] : memref<16x640xf32, #tpu.memory_space<vmem>>, vector<16x128xf32>
    tpu.vector_store %arg15[%c0_13, %c256], %12 {strides = array<i32>} : memref<16x640xf32, #tpu.memory_space<vmem>>, vector<16x128xf32>,
    %cst_14 = arith.constant dense<0.000000e+00> : vector<16x128xf32>
    %14 = tpu.matmul %1, %12, %cst_14 {dimension_numbers = #tpu.dot_dimension_numbers<[1], [0], [0], [1], [0, 0, 1, 1], [], []>} : vector<16x16xf32>, vector<16x128xf32>, vector<16x128xf32> -> vector<16x128xf32>
    %15 = arith.subf %14, %9 : vector<16x128xf32>
    %c0_15 = arith.constant 0 : index
    %c384 = arith.constant 384 : index
    %16 = vector.load %arg15[%c0_15, %c384] : memref<16x640xf32, #tpu.memory_space<vmem>>, vector<16x128xf32>
    tpu.vector_store %arg15[%c0_15, %c384], %15 {strides = array<i32>} : memref<16x640xf32, #tpu.memory_space<vmem>>, vector<16x128xf32>,
    %cst_16 = arith.constant dense<0.000000e+00> : vector<16x128xf32>
    %17 = tpu.matmul %1, %15, %cst_16 {dimension_numbers = #tpu.dot_dimension_numbers<[1], [0], [0], [1], [0, 0, 1, 1], [], []>} : vector<16x16xf32>, vector<16x128xf32>, vector<16x128xf32> -> vector<16x128xf32>
    %18 = arith.subf %17, %12 : vector<16x128xf32>
    %c0_17 = arith.constant 0 : index
    %c512 = arith.constant 512 : index
    %19 = vector.load %arg15[%c0_17, %c512] : memref<16x640xf32, #tpu.memory_space<vmem>>, vector<16x128xf32>
    tpu.vector_store %arg15[%c0_17, %c512], %18 {strides = array<i32>} : memref<16x640xf32, #tpu.memory_space<vmem>>, vector<16x128xf32>,
    %c0_18 = arith.constant 0 : index
    %c0_19 = arith.constant 0 : index
    %20 = vector.load %arg15[%c0_18, %c0_19] : memref<16x640xf32, #tpu.memory_space<vmem>>, vector<16x640xf32>
    %c0_20 = arith.constant 0 : index
    %c0_21 = arith.constant 0 : index
    %21 = vector.load %arg5[%c0_20, %c0_21] : memref<640x64xf32, #tpu.memory_space<vmem>>, vector<640x64xf32>
    %cst_22 = arith.constant dense<0.000000e+00> : vector<16x64xf32>
    %22 = tpu.matmul %20, %21, %cst_22 {dimension_numbers = #tpu.dot_dimension_numbers<[1], [0], [0], [1], [0, 0, 1, 1], [], []>} : vector<16x640xf32>, vector<640x64xf32>, vector<16x64xf32> -> vector<16x64xf32>
    %c0_23 = arith.constant 0 : index
    %c0_24 = arith.constant 0 : index
    %23 = vector.load %arg15[%c0_23, %c0_24] : memref<16x640xf32, #tpu.memory_space<vmem>>, vector<16x128xf32>
    tpu.vector_store %arg15[%c0_23, %c0_24], %5 {strides = array<i32>} : memref<16x640xf32, #tpu.memory_space<vmem>>, vector<16x128xf32>,
    %cst_25 = arith.constant dense<0.000000e+00> : vector<16x128xf32>
    %24 = tpu.matmul %3, %5, %cst_25 {dimension_numbers = #tpu.dot_dimension_numbers<[1], [0], [0], [1], [0, 0, 1, 1], [], []>} : vector<16x16xf32>, vector<16x128xf32>, vector<16x128xf32> -> vector<16x128xf32>
    %cst_26 = arith.constant 5.000000e-01 : f32
    %25 = vector.broadcast %cst_26 : f32 to vector<16x128xf32>
    %26 = arith.mulf %25, %24 : vector<16x128xf32>
    %c0_27 = arith.constant 0 : index
    %c128_28 = arith.constant 128 : index
    %27 = vector.load %arg15[%c0_27, %c128_28] : memref<16x640xf32, #tpu.memory_space<vmem>>, vector<16x128xf32>
    tpu.vector_store %arg15[%c0_27, %c128_28], %26 {strides = array<i32>} : memref<16x640xf32, #tpu.memory_space<vmem>>, vector<16x128xf32>,
    %cst_29 = arith.constant dense<0.000000e+00> : vector<16x128xf32>
    %28 = tpu.matmul %3, %26, %cst_29 {dimension_numbers = #tpu.dot_dimension_numbers<[1], [0], [0], [1], [0, 0, 1, 1], [], []>} : vector<16x16xf32>, vector<16x128xf32>, vector<16x128xf32> -> vector<16x128xf32>
    %29 = arith.subf %28, %5 : vector<16x128xf32>
    %c0_30 = arith.constant 0 : index
    %c256_31 = arith.constant 256 : index
    %30 = vector.load %arg15[%c0_30, %c256_31] : memref<16x640xf32, #tpu.memory_space<vmem>>, vector<16x128xf32>
    tpu.vector_store %arg15[%c0_30, %c256_31], %29 {strides = array<i32>} : memref<16x640xf32, #tpu.memory_space<vmem>>, vector<16x128xf32>,
    %cst_32 = arith.constant dense<0.000000e+00> : vector<16x128xf32>
    %31 = tpu.matmul %3, %29, %cst_32 {dimension_numbers = #tpu.dot_dimension_numbers<[1], [0], [0], [1], [0, 0, 1, 1], [], []>} : vector<16x16xf32>, vector<16x128xf32>, vector<16x128xf32> -> vector<16x128xf32>
    %32 = arith.subf %31, %26 : vector<16x128xf32>
    %c0_33 = arith.constant 0 : index
    %c384_34 = arith.constant 384 : index
    %33 = vector.load %arg15[%c0_33, %c384_34] : memref<16x640xf32, #tpu.memory_space<vmem>>, vector<16x128xf32>
    tpu.vector_store %arg15[%c0_33, %c384_34], %32 {strides = array<i32>} : memref<16x640xf32, #tpu.memory_space<vmem>>, vector<16x128xf32>,
    %cst_35 = arith.constant dense<0.000000e+00> : vector<16x128xf32>
    %34 = tpu.matmul %3, %32, %cst_35 {dimension_numbers = #tpu.dot_dimension_numbers<[1], [0], [0], [1], [0, 0, 1, 1], [], []>} : vector<16x16xf32>, vector<16x128xf32>, vector<16x128xf32> -> vector<16x128xf32>
    %35 = arith.subf %34, %29 : vector<16x128xf32>
    %c0_36 = arith.constant 0 : index
    %c512_37 = arith.constant 512 : index
    %36 = vector.load %arg15[%c0_36, %c512_37] : memref<16x640xf32, #tpu.memory_space<vmem>>, vector<16x128xf32>
    tpu.vector_store %arg15[%c0_36, %c512_37], %35 {strides = array<i32>} : memref<16x640xf32, #tpu.memory_space<vmem>>, vector<16x128xf32>,
    %c0_38 = arith.constant 0 : index
    %c0_39 = arith.constant 0 : index
    %37 = vector.load %arg15[%c0_38, %c0_39] : memref<16x640xf32, #tpu.memory_space<vmem>>, vector<16x640xf32>
    %c0_40 = arith.constant 0 : index
    %c0_41 = arith.constant 0 : index
    %38 = vector.load %arg6[%c0_40, %c0_41] : memref<640x64xf32, #tpu.memory_space<vmem>>, vector<640x64xf32>
    %cst_42 = arith.constant dense<0.000000e+00> : vector<16x64xf32>
    %39 = tpu.matmul %37, %38, %cst_42 {dimension_numbers = #tpu.dot_dimension_numbers<[1], [0], [0], [1], [0, 0, 1, 1], [], []>} : vector<16x640xf32>, vector<640x64xf32>, vector<16x64xf32> -> vector<16x64xf32>
    %40 = tpu.concatenate %22, %39 in 1 : vector<16x64xf32>, vector<16x64xf32> -> vector<16x128xf32>
    %c0_43 = arith.constant 0 : index
    %c0_44 = arith.constant 0 : index
    %41 = vector.load %arg7[%c0_43, %c0_44] : memref<1x128xf32, #tpu.memory_space<vmem>>, vector<1x128xf32>
    %42 = vector.broadcast %41 : vector<1x128xf32> to vector<16x128xf32>
    %43 = arith.addf %40, %42 : vector<16x128xf32>
    %cst_45 = arith.constant 0.000000e+00 : f32
    %44 = vector.broadcast %cst_45 : f32 to vector<16x128xf32>
    %45 = arith.maximumf %43, %44 : vector<16x128xf32>
    %c0_46 = arith.constant 0 : index
    %c0_47 = arith.constant 0 : index
    %46 = vector.load %arg15[%c0_46, %c0_47] : memref<16x640xf32, #tpu.memory_space<vmem>>, vector<16x128xf32>
    tpu.vector_store %arg15[%c0_46, %c0_47], %45 {strides = array<i32>} : memref<16x640xf32, #tpu.memory_space<vmem>>, vector<16x128xf32>,
    %cst_48 = arith.constant dense<0.000000e+00> : vector<16x128xf32>
    %47 = tpu.matmul %1, %45, %cst_48 {dimension_numbers = #tpu.dot_dimension_numbers<[1], [0], [0], [1], [0, 0, 1, 1], [], []>} : vector<16x16xf32>, vector<16x128xf32>, vector<16x128xf32> -> vector<16x128xf32>
    %cst_49 = arith.constant 5.000000e-01 : f32
    %48 = vector.broadcast %cst_49 : f32 to vector<16x128xf32>
    %49 = arith.mulf %48, %47 : vector<16x128xf32>
    %c0_50 = arith.constant 0 : index
    %c128_51 = arith.constant 128 : index
    %50 = vector.load %arg15[%c0_50, %c128_51] : memref<16x640xf32, #tpu.memory_space<vmem>>, vector<16x128xf32>
    tpu.vector_store %arg15[%c0_50, %c128_51], %49 {strides = array<i32>} : memref<16x640xf32, #tpu.memory_space<vmem>>, vector<16x128xf32>,
    %cst_52 = arith.constant dense<0.000000e+00> : vector<16x128xf32>
    %51 = tpu.matmul %1, %49, %cst_52 {dimension_numbers = #tpu.dot_dimension_numbers<[1], [0], [0], [1], [0, 0, 1, 1], [], []>} : vector<16x16xf32>, vector<16x128xf32>, vector<16x128xf32> -> vector<16x128xf32>
    %52 = arith.subf %51, %45 : vector<16x128xf32>
    %c0_53 = arith.constant 0 : index
    %c256_54 = arith.constant 256 : index
    %53 = vector.load %arg15[%c0_53, %c256_54] : memref<16x640xf32, #tpu.memory_space<vmem>>, vector<16x128xf32>
    tpu.vector_store %arg15[%c0_53, %c256_54], %52 {strides = array<i32>} : memref<16x640xf32, #tpu.memory_space<vmem>>, vector<16x128xf32>,
    %cst_55 = arith.constant dense<0.000000e+00> : vector<16x128xf32>
    %54 = tpu.matmul %1, %52, %cst_55 {dimension_numbers = #tpu.dot_dimension_numbers<[1], [0], [0], [1], [0, 0, 1, 1], [], []>} : vector<16x16xf32>, vector<16x128xf32>, vector<16x128xf32> -> vector<16x128xf32>
    %55 = arith.subf %54, %49 : vector<16x128xf32>
    %c0_56 = arith.constant 0 : index
    %c384_57 = arith.constant 384 : index
    %56 = vector.load %arg15[%c0_56, %c384_57] : memref<16x640xf32, #tpu.memory_space<vmem>>, vector<16x128xf32>
    tpu.vector_store %arg15[%c0_56, %c384_57], %55 {strides = array<i32>} : memref<16x640xf32, #tpu.memory_space<vmem>>, vector<16x128xf32>,
    %cst_58 = arith.constant dense<0.000000e+00> : vector<16x128xf32>
    %57 = tpu.matmul %1, %55, %cst_58 {dimension_numbers = #tpu.dot_dimension_numbers<[1], [0], [0], [1], [0, 0, 1, 1], [], []>} : vector<16x16xf32>, vector<16x128xf32>, vector<16x128xf32> -> vector<16x128xf32>
    %58 = arith.subf %57, %52 : vector<16x128xf32>
    %c0_59 = arith.constant 0 : index
    %c512_60 = arith.constant 512 : index
    %59 = vector.load %arg15[%c0_59, %c512_60] : memref<16x640xf32, #tpu.memory_space<vmem>>, vector<16x128xf32>
    tpu.vector_store %arg15[%c0_59, %c512_60], %58 {strides = array<i32>} : memref<16x640xf32, #tpu.memory_space<vmem>>, vector<16x128xf32>,
    %c0_61 = arith.constant 0 : index
    %c0_62 = arith.constant 0 : index
    %60 = vector.load %arg15[%c0_61, %c0_62] : memref<16x640xf32, #tpu.memory_space<vmem>>, vector<16x640xf32>
    %c0_63 = arith.constant 0 : index
    %c0_64 = arith.constant 0 : index
    %61 = vector.load %arg8[%c0_63, %c0_64] : memref<640x256xf32, #tpu.memory_space<vmem>>, vector<640x256xf32>
    %cst_65 = arith.constant dense<0.000000e+00> : vector<16x256xf32>
    %62 = tpu.matmul %60, %61, %cst_65 {dimension_numbers = #tpu.dot_dimension_numbers<[1], [0], [0], [1], [0, 0, 1, 1], [], []>} : vector<16x640xf32>, vector<640x256xf32>, vector<16x256xf32> -> vector<16x256xf32>
    %c0_66 = arith.constant 0 : index
    %c0_67 = arith.constant 0 : index
    %63 = vector.load %arg15[%c0_66, %c0_67] : memref<16x640xf32, #tpu.memory_space<vmem>>, vector<16x128xf32>
    tpu.vector_store %arg15[%c0_66, %c0_67], %45 {strides = array<i32>} : memref<16x640xf32, #tpu.memory_space<vmem>>, vector<16x128xf32>,
    %cst_68 = arith.constant dense<0.000000e+00> : vector<16x128xf32>
    %64 = tpu.matmul %3, %45, %cst_68 {dimension_numbers = #tpu.dot_dimension_numbers<[1], [0], [0], [1], [0, 0, 1, 1], [], []>} : vector<16x16xf32>, vector<16x128xf32>, vector<16x128xf32> -> vector<16x128xf32>
    %cst_69 = arith.constant 5.000000e-01 : f32
    %65 = vector.broadcast %cst_69 : f32 to vector<16x128xf32>
    %66 = arith.mulf %65, %64 : vector<16x128xf32>
    %c0_70 = arith.constant 0 : index
    %c128_71 = arith.constant 128 : index
    %67 = vector.load %arg15[%c0_70, %c128_71] : memref<16x640xf32, #tpu.memory_space<vmem>>, vector<16x128xf32>
    tpu.vector_store %arg15[%c0_70, %c128_71], %66 {strides = array<i32>} : memref<16x640xf32, #tpu.memory_space<vmem>>, vector<16x128xf32>,
    %cst_72 = arith.constant dense<0.000000e+00> : vector<16x128xf32>
    %68 = tpu.matmul %3, %66, %cst_72 {dimension_numbers = #tpu.dot_dimension_numbers<[1], [0], [0], [1], [0, 0, 1, 1], [], []>} : vector<16x16xf32>, vector<16x128xf32>, vector<16x128xf32> -> vector<16x128xf32>
    %69 = arith.subf %68, %45 : vector<16x128xf32>
    %c0_73 = arith.constant 0 : index
    %c256_74 = arith.constant 256 : index
    %70 = vector.load %arg15[%c0_73, %c256_74] : memref<16x640xf32, #tpu.memory_space<vmem>>, vector<16x128xf32>
    tpu.vector_store %arg15[%c0_73, %c256_74], %69 {strides = array<i32>} : memref<16x640xf32, #tpu.memory_space<vmem>>, vector<16x128xf32>,
    %cst_75 = arith.constant dense<0.000000e+00> : vector<16x128xf32>
    %71 = tpu.matmul %3, %69, %cst_75 {dimension_numbers = #tpu.dot_dimension_numbers<[1], [0], [0], [1], [0, 0, 1, 1], [], []>} : vector<16x16xf32>, vector<16x128xf32>, vector<16x128xf32> -> vector<16x128xf32>
    %72 = arith.subf %71, %66 : vector<16x128xf32>
    %c0_76 = arith.constant 0 : index
    %c384_77 = arith.constant 384 : index
    %73 = vector.load %arg15[%c0_76, %c384_77] : memref<16x640xf32, #tpu.memory_space<vmem>>, vector<16x128xf32>
    tpu.vector_store %arg15[%c0_76, %c384_77], %72 {strides = array<i32>} : memref<16x640xf32, #tpu.memory_space<vmem>>, vector<16x128xf32>,
    %cst_78 = arith.constant dense<0.000000e+00> : vector<16x128xf32>
    %74 = tpu.matmul %3, %72, %cst_78 {dimension_numbers = #tpu.dot_dimension_numbers<[1], [0], [0], [1], [0, 0, 1, 1], [], []>} : vector<16x16xf32>, vector<16x128xf32>, vector<16x128xf32> -> vector<16x128xf32>
    %75 = arith.subf %74, %69 : vector<16x128xf32>
    %c0_79 = arith.constant 0 : index
    %c512_80 = arith.constant 512 : index
    %76 = vector.load %arg15[%c0_79, %c512_80] : memref<16x640xf32, #tpu.memory_space<vmem>>, vector<16x128xf32>
    tpu.vector_store %arg15[%c0_79, %c512_80], %75 {strides = array<i32>} : memref<16x640xf32, #tpu.memory_space<vmem>>, vector<16x128xf32>,
    %c0_81 = arith.constant 0 : index
    %c0_82 = arith.constant 0 : index
    %77 = vector.load %arg15[%c0_81, %c0_82] : memref<16x640xf32, #tpu.memory_space<vmem>>, vector<16x640xf32>
    %c0_83 = arith.constant 0 : index
    %c0_84 = arith.constant 0 : index
    %78 = vector.load %arg9[%c0_83, %c0_84] : memref<640x256xf32, #tpu.memory_space<vmem>>, vector<640x256xf32>
    %cst_85 = arith.constant dense<0.000000e+00> : vector<16x256xf32>
    %79 = tpu.matmul %77, %78, %cst_85 {dimension_numbers = #tpu.dot_dimension_numbers<[1], [0], [0], [1], [0, 0, 1, 1], [], []>} : vector<16x640xf32>, vector<640x256xf32>, vector<16x256xf32> -> vector<16x256xf32>
    %80 = tpu.concatenate %62, %79 in 1 : vector<16x256xf32>, vector<16x256xf32> -> vector<16x512xf32>
    %c0_86 = arith.constant 0 : index
    %c0_87 = arith.constant 0 : index
    %81 = vector.load %arg10[%c0_86, %c0_87] : memref<1x512xf32, #tpu.memory_space<vmem>>, vector<1x512xf32>
    %82 = vector.broadcast %81 : vector<1x512xf32> to vector<16x512xf32>
    %83 = arith.addf %80, %82 : vector<16x512xf32>
    %cst_88 = arith.constant 0.000000e+00 : f32
    %84 = vector.broadcast %cst_88 : f32 to vector<16x512xf32>
    %85 = arith.maximumf %83, %84 : vector<16x512xf32>
    %c0_89 = arith.constant 0 : index
    %c0_90 = arith.constant 0 : index
    %c0_91 = arith.constant 0 : index
    %86 = vector.load %arg4[%c0_89, %c0_90, %c0_91] : memref<1x16x1xf32, #tpu.memory_space<vmem>>, vector<1x16x1xf32>
    %87 = vector.shape_cast %86 : vector<1x16x1xf32> to vector<16x1xf32>
    %88 = vector.broadcast %87 : vector<16x1xf32> to vector<16x512xf32>
    %89 = arith.mulf %85, %88 : vector<16x512xf32>
    %cst_92 = arith.constant dense<0.000000e+00> : vector<512xf32>
    %90 = vector.multi_reduction <add>, %89, %cst_92 [0] : vector<16x512xf32> to vector<512xf32>
    %91 = vector.shape_cast %90 : vector<512xf32> to vector<1x512xf32>
    %c0_93 = arith.constant 0 : index
    %c0_94 = arith.constant 0 : index
    %92 = vector.load %arg11[%c0_93, %c0_94] : memref<512x7xf32, #tpu.memory_space<vmem>>, vector<512x7xf32>
    %cst_95 = arith.constant dense<0.000000e+00> : vector<1x7xf32>
    %93 = tpu.matmul %91, %92, %cst_95 {dimension_numbers = #tpu.dot_dimension_numbers<[1], [0], [0], [1], [0, 0, 1, 1], [], []>} : vector<1x512xf32>, vector<512x7xf32>, vector<1x7xf32> -> vector<1x7xf32>
    %c0_96 = arith.constant 0 : index
    %c0_97 = arith.constant 0 : index
    %94 = vector.load %arg12[%c0_96, %c0_97] : memref<1x7xf32, #tpu.memory_space<vmem>>, vector<1x7xf32>
    %95 = arith.addf %93, %94 : vector<1x7xf32>
    %c0_98 = arith.constant 0 : index
    %c0_99 = arith.constant 0 : index
    %96 = vector.load %arg13[%c0_98, %c0_99] : memref<3x7xf32, #tpu.memory_space<vmem>>, vector<3x7xf32>
    %cst_100 = arith.constant 0.000000e+00 : f32
    %97 = vector.broadcast %cst_100 : f32 to vector<1x7xf32>
    %98 = vector.extract_strided_slice %96 {offsets = [0, 0], sizes = [1, 7], strides = [1, 1]} : vector<3x7xf32> to vector<1x7xf32>
    %cst_101 = arith.constant 5.000000e-01 : f32
    %99 = vector.broadcast %cst_101 : f32 to vector<1x7xf32>
    %100 = arith.cmpf ogt, %98, %99 : vector<1x7xf32>
    %cst_102 = arith.constant -1.000000e+30 : f32
    %101 = vector.broadcast %cst_102 : f32 to vector<1x7xf32>
    %102 = arith.select %100, %95, %101 : vector<1x7xi1>, vector<1x7xf32>
    %cst_103 = arith.constant dense<0xFF800000> : vector<1xf32>
    %103 = vector.multi_reduction <maximumf>, %102, %cst_103 [1] : vector<1x7xf32> to vector<1xf32>
    %104 = vector.shape_cast %103 : vector<1xf32> to vector<1x1xf32>
    %105 = vector.broadcast %104 : vector<1x1xf32> to vector<1x7xf32>
    %106 = arith.subf %102, %105 : vector<1x7xf32>
    %107 = math.exp %106 : vector<1x7xf32>
    %cst_104 = arith.constant dense<0.000000e+00> : vector<1xf32>
    %108 = vector.multi_reduction <add>, %107, %cst_104 [1] : vector<1x7xf32> to vector<1xf32>
    %109 = vector.shape_cast %108 : vector<1xf32> to vector<1x1xf32>
    %110 = math.log %109 : vector<1x1xf32>
    %111 = arith.addf %104, %110 : vector<1x1xf32>
    %112 = vector.shape_cast %111 : vector<1x1xf32> to vector<1x1xf32>
    %113 = vector.broadcast %112 : vector<1x1xf32> to vector<1x7xf32>
    %114 = arith.select %100, %113, %97 : vector<1x7xi1>, vector<1x7xf32>
    %115 = vector.extract_strided_slice %96 {offsets = [1, 0], sizes = [1, 7], strides = [1, 1]} : vector<3x7xf32> to vector<1x7xf32>
    %cst_105 = arith.constant 5.000000e-01 : f32
    %116 = vector.broadcast %cst_105 : f32 to vector<1x7xf32>
    %117 = arith.cmpf ogt, %115, %116 : vector<1x7xf32>
    %cst_106 = arith.constant -1.000000e+30 : f32
    %118 = vector.broadcast %cst_106 : f32 to vector<1x7xf32>
    %119 = arith.select %117, %95, %118 : vector<1x7xi1>, vector<1x7xf32>
    %cst_107 = arith.constant dense<0xFF800000> : vector<1xf32>
    %120 = vector.multi_reduction <maximumf>, %119, %cst_107 [1] : vector<1x7xf32> to vector<1xf32>
    %121 = vector.shape_cast %120 : vector<1xf32> to vector<1x1xf32>
    %122 = vector.broadcast %121 : vector<1x1xf32> to vector<1x7xf32>
    %123 = arith.subf %119, %122 : vector<1x7xf32>
    %124 = math.exp %123 : vector<1x7xf32>
    %cst_108 = arith.constant dense<0.000000e+00> : vector<1xf32>
    %125 = vector.multi_reduction <add>, %124, %cst_108 [1] : vector<1x7xf32> to vector<1xf32>
    %126 = vector.shape_cast %125 : vector<1xf32> to vector<1x1xf32>
    %127 = math.log %126 : vector<1x1xf32>
    %128 = arith.addf %121, %127 : vector<1x1xf32>
    %129 = vector.shape_cast %128 : vector<1x1xf32> to vector<1x1xf32>
    %130 = vector.broadcast %129 : vector<1x1xf32> to vector<1x7xf32>
    %131 = arith.select %117, %130, %114 : vector<1x7xi1>, vector<1x7xf32>
    %132 = vector.extract_strided_slice %96 {offsets = [2, 0], sizes = [1, 7], strides = [1, 1]} : vector<3x7xf32> to vector<1x7xf32>
    %cst_109 = arith.constant 5.000000e-01 : f32
    %133 = vector.broadcast %cst_109 : f32 to vector<1x7xf32>
    %134 = arith.cmpf ogt, %132, %133 : vector<1x7xf32>
    %cst_110 = arith.constant -1.000000e+30 : f32
    %135 = vector.broadcast %cst_110 : f32 to vector<1x7xf32>
    %136 = arith.select %134, %95, %135 : vector<1x7xi1>, vector<1x7xf32>
    %cst_111 = arith.constant dense<0xFF800000> : vector<1xf32>
    %137 = vector.multi_reduction <maximumf>, %136, %cst_111 [1] : vector<1x7xf32> to vector<1xf32>
    %138 = vector.shape_cast %137 : vector<1xf32> to vector<1x1xf32>
    %139 = vector.broadcast %138 : vector<1x1xf32> to vector<1x7xf32>
    %140 = arith.subf %136, %139 : vector<1x7xf32>
    %141 = math.exp %140 : vector<1x7xf32>
    %cst_112 = arith.constant dense<0.000000e+00> : vector<1xf32>
    %142 = vector.multi_reduction <add>, %141, %cst_112 [1] : vector<1x7xf32> to vector<1xf32>
    %143 = vector.shape_cast %142 : vector<1xf32> to vector<1x1xf32>
    %144 = math.log %143 : vector<1x1xf32>
    %145 = arith.addf %138, %144 : vector<1x1xf32>
    %146 = vector.shape_cast %145 : vector<1x1xf32> to vector<1x1xf32>
    %147 = vector.broadcast %146 : vector<1x1xf32> to vector<1x7xf32>
    %148 = arith.select %134, %147, %131 : vector<1x7xi1>, vector<1x7xf32>
    %149 = arith.subf %95, %148 : vector<1x7xf32>
    %c0_113 = arith.constant 0 : index
    %c0_114 = arith.constant 0 : index
    %c0_115 = arith.constant 0 : index
    %150 = vector.load %arg14[%c0_113, %c0_114, %c0_115] : memref<1x1x7xf32, #tpu.memory_space<vmem>>, vector<1x1x7xf32>
    %151 = vector.shape_cast %150 : vector<1x1x7xf32> to vector<1x7xf32>
    %152 = vector.shape_cast %149 : vector<1x7xf32> to vector<1x1x7xf32>
    tpu.vector_store %arg14[%c0_113, %c0_114, %c0_115], %152 {strides = array<i32>} : memref<1x1x7xf32, #tpu.memory_space<vmem>>, vector<1x1x7xf32>,
    return
  }
  func.func @transform_0(%arg0: i32) -> (i32, i32, i32) {
    %c0_i32 = arith.constant 0 : i32
    %c0_i32_0 = arith.constant 0 : i32
    %c0_i32_1 = arith.constant 0 : i32
    return %arg0, %c0_i32, %c0_i32_0 : i32, i32, i32
  }
  func.func @transform_1(%arg0: i32) -> (i32, i32, i32) {
    %c0_i32 = arith.constant 0 : i32
    %c0_i32_0 = arith.constant 0 : i32
    %c0_i32_1 = arith.constant 0 : i32
    return %arg0, %c0_i32, %c0_i32_0 : i32, i32, i32
  }
  func.func @transform_2(%arg0: i32) -> (i32, i32, i32) {
    %c0_i32 = arith.constant 0 : i32
    %c0_i32_0 = arith.constant 0 : i32
    %c0_i32_1 = arith.constant 0 : i32
    return %arg0, %c0_i32, %c0_i32_0 : i32, i32, i32
  }
  func.func @transform_3(%arg0: i32) -> (i32, i32, i32) {
    %c0_i32 = arith.constant 0 : i32
    %c0_i32_0 = arith.constant 0 : i32
    %c0_i32_1 = arith.constant 0 : i32
    return %arg0, %c0_i32, %c0_i32_0 : i32, i32, i32
  }
  func.func @transform_4(%arg0: i32) -> (i32, i32) {
    %c0_i32 = arith.constant 0 : i32
    %c0_i32_0 = arith.constant 0 : i32
    %c0_i32_1 = arith.constant 0 : i32
    return %c0_i32, %c0_i32_0 : i32, i32
  }
  func.func @transform_5(%arg0: i32) -> (i32, i32) {
    %c0_i32 = arith.constant 0 : i32
    %c0_i32_0 = arith.constant 0 : i32
    %c0_i32_1 = arith.constant 0 : i32
    return %c0_i32, %c0_i32_0 : i32, i32
  }
  func.func @transform_6(%arg0: i32) -> (i32, i32) {
    %c0_i32 = arith.constant 0 : i32
    %c0_i32_0 = arith.constant 0 : i32
    %c0_i32_1 = arith.constant 0 : i32
    return %c0_i32, %c0_i32_0 : i32, i32
  }
  func.func @transform_7(%arg0: i32) -> (i32, i32) {
    %c0_i32 = arith.constant 0 : i32
    %c0_i32_0 = arith.constant 0 : i32
    %c0_i32_1 = arith.constant 0 : i32
    return %c0_i32, %c0_i32_0 : i32, i32
  }
  func.func @transform_8(%arg0: i32) -> (i32, i32) {
    %c0_i32 = arith.constant 0 : i32
    %c0_i32_0 = arith.constant 0 : i32
    %c0_i32_1 = arith.constant 0 : i32
    return %c0_i32, %c0_i32_0 : i32, i32
  }
  func.func @transform_9(%arg0: i32) -> (i32, i32) {
    %c0_i32 = arith.constant 0 : i32
    %c0_i32_0 = arith.constant 0 : i32
    %c0_i32_1 = arith.constant 0 : i32
    return %c0_i32, %c0_i32_0 : i32, i32
  }
  func.func @transform_10(%arg0: i32) -> (i32, i32) {
    %c0_i32 = arith.constant 0 : i32
    %c0_i32_0 = arith.constant 0 : i32
    %c0_i32_1 = arith.constant 0 : i32
    return %c0_i32, %c0_i32_0 : i32, i32
  }
  func.func @transform_11(%arg0: i32) -> (i32, i32) {
    %c0_i32 = arith.constant 0 : i32
    %c0_i32_0 = arith.constant 0 : i32
    %c0_i32_1 = arith.constant 0 : i32
    return %c0_i32, %c0_i32_0 : i32, i32
  }
  func.func @transform_12(%arg0: i32) -> (i32, i32) {
    %c0_i32 = arith.constant 0 : i32
    %c0_i32_0 = arith.constant 0 : i32
    %c0_i32_1 = arith.constant 0 : i32
    return %c0_i32, %c0_i32_0 : i32, i32
  }
  func.func @transform_13(%arg0: i32) -> (i32, i32, i32) {
    %c0_i32 = arith.constant 0 : i32
    %c0_i32_0 = arith.constant 0 : i32
    %c0_i32_1 = arith.constant 0 : i32
    return %arg0, %c0_i32, %c0_i32_0 : i32, i32, i32
  }
}

</mosaic_0001>

<bundles_post_ra>
// kernel: hbnet_forward.1
= control target key start
LH: loop header
LB: loop body
LE: loop exit
PB: predicated region body
PF: predicated region fallthrough
CT: control target
= control target key end

     0   :  { %s4885_s0 = inlined_call_operand.vmem [shape: f32[2,16,16], index: 0, kind: input, shape index: {}]   ;;  %s4886_s1 = inlined_call_operand.vmem [shape: f32[2,16,16], index: 1, kind: input, shape index: {}]   ;;  %s4887_s2 = inlined_call_operand.vmem [shape: f32[2,16,128], index: 2, kind: input, shape index: {}]   ;;  %s4888_s3 = inlined_call_operand.vmem [shape: f32[2,16,1], index: 3, kind: input, shape index: {}]   ;;  %s4889_s4 = inlined_call_operand.vmem [shape: f32[640,64], index: 4, kind: input, shape index: {}]   ;;  %s4890_s5 = inlined_call_operand.vmem [shape: f32[640,64], index: 5, kind: input, shape index: {}]   ;;  %s4891_s6 = inlined_call_operand.vmem [shape: f32[1,128], index: 6, kind: input, shape index: {}]   ;;  %s4892_s7 = inlined_call_operand.vmem [shape: f32[640,256], index: 7, kind: input, shape index: {}]   ;;  %s4893_s8 = inlined_call_operand.vmem [shape: f32[640,256], index: 8, kind: input, shape index: {}]   ;;  %s4894_s9 = inlined_call_operand.vmem [shape: f32[1,512], index: 9, kind: input, shape index: {}]   ;;  %s4895_s10 = inlined_call_operand.vmem [shape: f32[512,7], index: 10, kind: input, shape index: {}]   ;;  %s4896_s11 = inlined_call_operand.vmem [shape: f32[1,7], index: 11, kind: input, shape index: {}]   ;;  %s4897_s12 = inlined_call_operand.vmem [shape: f32[3,7], index: 12, kind: input, shape index: {}]   ;;  %s4898_s13 = inlined_call_operand.hbm [shape: f32[2,1,7], index: 13, kind: output, shape index: {}]  }
   0x1   :  { %4900 = sst [smem:[#allocation8_spill]] %s4885_s0 }
   0x2   :  { %4901 = sst [smem:[#allocation9_spill]] %s4886_s1 }
   0x3   :  { %4902 = sst [smem:[#allocation10_spill]] %s4887_s2 }
   0x4   :  { %18 = vsyncpa [#allocation4], 0 }
   0x5   :  { %20 = vsyncpa [#allocation4 + $0x1], 0  ;;  %s2818_s25 = smov 0   ;;  %s2820_s26 = smov 0  }
   0x6   :  { %s2822_s27 = smov 0   ;;  %s2824_s28 = smov 0  }
   0x7 LB: > { %4903 = sst [smem:[#allocation6_spill]] %s2740_s27  ;;  %s2839_s29 = sadd.s32 4294967295, %s2744_s28   ;;  %s2744_s28 = sphi %s2824_s28, %s4914_s28   ;;  %s2740_s27 = sphi %s2822_s27, %s4911_s27   ;;  %s2736_s26 = sphi %s2820_s26, %s4913_s26   ;;  %s2732_s25 = sphi %s2818_s25, %s4912_s25  }
   0x8   : > { %s2572_s30 = sadd.s32 4294967294, %s2744_s28   ;;  %s2843_s14 = sadd.s32 1, %s2744_s28  }
   0x9   : > { %s326_s15 = sadd.s32 1, %s2740_s27  ;;  %s323_s16 = ssub.s32 %s2744_s28, %s2843_s14 }
   0xa   : > { %p336_p0 = scmp.ne.s32.totalorder %s2740_s27, %s2736_s26  ;;  %p324_p1 = scmp.eq.s32.totalorder %s323_s16, 0 }
   0xb   : > { %p337_p2 = scmp.eq.s32.totalorder %s2839_s29, 1  ;;  %p342_p3 = scmp.ne.s32.totalorder %s2736_s26, %s2732_s25 }
   0xc   : > { %p343_p4 = scmp.eq.s32.totalorder %s2572_s30, 1  ;;  %p2575_p7 = scmp.ge.s32.totalorder %s2744_s28, 1 }
   0xd   : > { %s2854_s17 = scalar_select %p324_p1, %s2740_s27, %s326_s15  }
   0xe   : > { %p2856_p5 = por %p337_p2, %p336_p0  ;;  %p2860_p6 = por %p343_p4, %p342_p3 }
   0xf   : > { %4904 = sst [smem:[#allocation7_spill]] %s2854_s17  ;;  %p420_p8 = scmp.lt.s32.totalorder %s2744_s28, 3 }
  0x11   : > { %p421_p9 = pnand %p2575_p7, %p420_p8 }
  0x12   : > { %p478_p10 = scmp.lt.s32.totalorder (!%p421_p9), %s2839_s29, 1  ;;  %s4907_s2 = sld [smem:[#allocation10_spill]] (!%p421_p9) }
  0x13   : > { %424 = sbr.rel (%p421_p9) target bundleno = 2853 (0xb25), region = 72  ;;  %s4908_s0 = sld [smem:[#allocation8_spill]] (!%p421_p9) }
  0x14   : > { %s4909_s1 = sld [smem:[#allocation9_spill]] (!%p421_p9)  ;;  %s476_s23 = sand.u32 (!%p421_p9), 1, %s2736_s26  }
  0x15   : > { %s2477_s30 = scalar_lea.hbm (!%p421_p9), %s4898_s13, %s2839_s29 }
  0x18   : > { %s479_s20 = scalar_select %p478_p10, %s2839_s29, 1  ;;  %vm506_vm0 = vcmask 130048   ;;  %v646_v4 = vld [vmem:[%s4889_s4 + $0x78] sm:$0xff]  ;;  %v645_v5 = vld [vmem:[%s4889_s4 + $0x70] sm:$0xff]  ;;  %v644_v6 = vld [vmem:[%s4889_s4 + $0x68] sm:$0xff]  ;;  %vm1155_vm1 = vcmask 523264  }
  0x19   : > { %v643_v7 = vld [vmem:[%s4889_s4 + $0x60] sm:$0xff]  ;;  %v642_v8 = vld [vmem:[%s4889_s4 + $0x58] sm:$0xff]  ;;  %v641_v9 = vld [vmem:[%s4889_s4 + $0x50] sm:$0xff]  ;;  %vm2408_vm3 = vcmask 49152   ;;  %vm2446_vm4 = vcmask 51202   ;;  %vm2426_vm5 = vcmask 50177  }
  0x1a   : > { %s2868_s21 = sshll.u32 %s479_s20, 4  ;;  %v640_v10 = vld [vmem:[%s4889_s4 + $0x48] sm:$0xff]  ;;  %v639_v11 = vld [vmem:[%s4889_s4 + $0x40] sm:$0xff]  ;;  %v638_v12 = vld [vmem:[%s4889_s4 + $0x38] sm:$0xff] }
  0x1b   : > { %s492_s24 = scalar_lea.vmem %s4907_s2, %s2868_s21  ;;  %s2878_s16 = scalar_lea.vmem %s4908_s0, %s2868_s21  ;;  %v637_v13 = vld [vmem:[%s4889_s4 + $0x30] sm:$0xff]  ;;  %v636_v15 = vld [vmem:[%s4889_s4 + $0x28] sm:$0xff]  ;;  %v635_v16 = vld [vmem:[%s4889_s4 + $0x20] sm:$0xff] }
  0x1c   : > { %v2880_v0 = vld [vmem:[%s492_s24 + $0x8] sm:$0xff]  ;;  %v2882_v1 = vld [vmem:[%s492_s24] sm:$0xff]  ;;  %v634_v17 = vld [vmem:[%s4889_s4 + $0x18] sm:$0xff]  ;;  %s3160_s20 = scalar_lea.vmem %s4909_s1, %s2868_s21  ;;  %s2746_s1 = smov 64  }
  0x1d   : > { %527 = vmatpush.msra.mxu0 %v2880_v0  ;;  %v2886_v2 = vld [vmem:[%s2878_s16] sm:$0xff]  ;;  %v2892_v3 = vld [vmem:[%s2878_s16 + $0x8] sm:$0xff]  ;;  %v633_v18 = vld [vmem:[%s4889_s4 + $0x10] sm:$0xff]  ;;  %s497_s0 = scalar_lea.vmem %s4888_s3, %s2868_s21  ;;  %s2469_s2 = scalar_lea.sflag [#allocation4], %s476_s23 }
  0x1e   : > { %v632_v21 = vld [vmem:[%s4889_s4 + $0x8] sm:$0xff]  ;;  %v631_v23 = vld [vmem:[%s4889_s4] sm:$0xff]  ;;  %v662_v24 = vld [vmem:[%s4889_s4 + $0xf8] sm:$0xff]  ;;  %s2702_s21 = scalar_lea.hbm %s4898_s13, 2 }
  0x1f   : > { %528 = vmatpush.msra.mxu0 %v2882_v1  ;;  %v661_v25 = vld [vmem:[%s4889_s4 + $0xf0] sm:$0xff]  ;;  %v660_v26 = vld [vmem:[%s4889_s4 + $0xe8] sm:$0xff]  ;;  %v659_v27 = vld [vmem:[%s4889_s4 + $0xe0] sm:$0xff] }
  0x20   : > { %2584 = vmatmul.msk.f32.vlgmr.msra.gmra.mxu0 %vm506_vm0, %v2886_v2  ;;  %v658_v28 = vld [vmem:[%s4889_s4 + $0xd8] sm:$0xff]  ;;  %v657_v29 = vld [vmem:[%s4889_s4 + $0xd0] sm:$0xff]  ;;  %v656_v30 = vld [vmem:[%s4889_s4 + $0xc8] sm:$0xff] }
  0x21   : > { %711 = vmatpush.msrb.mxu0 %v646_v4  ;;  %v655_v31 = vld [vmem:[%s4889_s4 + $0xc0] sm:$0xff]  ;;  %v654_v32 = vld [vmem:[%s4889_s4 + $0xb8] sm:$0xff]  ;;  %v653_v33 = vld [vmem:[%s4889_s4 + $0xb0] sm:$0xff] }
  0x22   : > { %v652_v34 = vld [vmem:[%s4889_s4 + $0xa8] sm:$0xff]  ;;  %v651_v35 = vld [vmem:[%s4889_s4 + $0xa0] sm:$0xff]  ;;  %v650_v36 = vld [vmem:[%s4889_s4 + $0x98] sm:$0xff] }
  0x23   : > { %712 = vmatpush.msrb.mxu0 %v645_v5  ;;  %v649_v37 = vld [vmem:[%s4889_s4 + $0x90] sm:$0xff]  ;;  %v648_v38 = vld [vmem:[%s4889_s4 + $0x88] sm:$0xff]  ;;  %v647_v39 = vld [vmem:[%s4889_s4 + $0x80] sm:$0xff] }
  0x24   : > { %v678_v44 = vld [vmem:[%s4889_s4 + $0x178] sm:$0xff]  ;;  %v677_v45 = vld [vmem:[%s4889_s4 + $0x170] sm:$0xff]  ;;  %v676_v46 = vld [vmem:[%s4889_s4 + $0x168] sm:$0xff] }
  0x25   : > { %713 = vmatpush.msrb.mxu0 %v644_v6  ;;  %v675_v47 = vld [vmem:[%s4889_s4 + $0x160] sm:$0xff]  ;;  %v674_v48 = vld [vmem:[%s4889_s4 + $0x158] sm:$0xff]  ;;  %v673_v49 = vld [vmem:[%s4889_s4 + $0x150] sm:$0xff] }
  0x26   : > { %v672_v50 = vld [vmem:[%s4889_s4 + $0x148] sm:$0xff]  ;;  %v671_v51 = vld [vmem:[%s4889_s4 + $0x140] sm:$0xff]  ;;  %v670_v52 = vld [vmem:[%s4889_s4 + $0x138] sm:$0xff] }
  0x27   : > { %714 = vmatpush.msrb.mxu0 %v643_v7  ;;  %v669_v54 = vld [vmem:[%s4889_s4 + $0x130] sm:$0xff]  ;;  %v668_v56 = vld [vmem:[%s4889_s4 + $0x128] sm:$0xff]  ;;  %v667_v58 = vld [vmem:[%s4889_s4 + $0x120] sm:$0xff] }
  0x28   : > { %2585 = vmatmul.msk.f32.gmra.mxu0 %vm506_vm0, %v2892_v3  ;;  %v666_v59 = vld [vmem:[%s4889_s4 + $0x118] sm:$0xff]  ;;  %v665_v60 = vld [vmem:[%s4889_s4 + $0x110] sm:$0xff]  ;;  %v664_v61 = vld [vmem:[%s4889_s4 + $0x108] sm:$0xff] }
  0x29   : > { %715 = vmatpush.msrb.mxu0 %v642_v8  ;;  %v663_v62 = vld [vmem:[%s4889_s4 + $0x100] sm:$0xff]  ;;  %v694_v7 = vld [vmem:[%s4889_s4 + $0x1f8] sm:$0xff]  ;;  %v693_v8 = vld [vmem:[%s4889_s4 + $0x1f0] sm:$0xff] }
  0x2b   : > { %716 = vmatpush.msrb.mxu0 %v641_v9  ;;  %v692_v9 = vld [vmem:[%s4889_s4 + $0x1e8] sm:$0xff] }
  0x2d   : > { %717 = vmatpush.msrb.mxu0 %v640_v10  ;;  %v691_v10 = vld [vmem:[%s4889_s4 + $0x1e0] sm:$0xff] }
  0x2f   : > { %718 = vmatpush.msrb.mxu0 %v639_v11  ;;  %v690_v11 = vld [vmem:[%s4889_s4 + $0x1d8] sm:$0xff] }
  0x31   : > { %719 = vmatpush.msrb.mxu0 %v638_v12  ;;  %v689_v12 = vld [vmem:[%s4889_s4 + $0x1d0] sm:$0xff] }
  0x33   : > { %720 = vmatpush.msrb.mxu0 %v637_v13  ;;  %v688_v13 = vld [vmem:[%s4889_s4 + $0x1c8] sm:$0xff] }
  0x35   : > { %721 = vmatpush.msrb.mxu0 %v636_v15  ;;  %v686_v15 = vld [vmem:[%s4889_s4 + $0x1b8] sm:$0xff] }
  0x37   : > { %722 = vmatpush.msrb.mxu0 %v635_v16  ;;  %v685_v16 = vld [vmem:[%s4889_s4 + $0x1b0] sm:$0xff] }
  0x39   : > { %723 = vmatpush.msrb.mxu0 %v634_v17 }
  0x3b   : > { %724 = vmatpush.msrb.mxu0 %v633_v18  ;;  %v684_v18 = vld [vmem:[%s4889_s4 + $0x1a8] sm:$0xff] }
  0x3d   : > { %725 = vmatpush.msrb.mxu0 %v632_v21  ;;  %v682_v21 = vld [vmem:[%s4889_s4 + $0x198] sm:$0xff] }
  0x3f   : > { %726 = vmatpush.msrb.mxu0 %v631_v23  ;;  %v710_v23 = vld [vmem:[%s4889_s4 + $0x278] sm:$0xff] }
  0x40   : > { %727 = vmatmul.f32.vlgmr.msrb.gmra.mxu0 %v2882_v1 }
  0x41   : > { %803 = vmatpush.msra.mxu0 %v710_v23  ;;  %v958_v23 = vld [vmem:[%s4890_s5 + $0x30] sm:$0xff] }
  0x48   : > { %730 = vmatmul.f32.gmra.mxu0 %v2880_v0 }
  0x9d   : > { %v530_v14 = vpop.f32.mrf.mxu0 }
  0x9e   : > { %v2943_v22 = vmul.f32 0.5, %v530_v14  ;;  %v687_v14 = vld [vmem:[%s4889_s4 + $0x1c0] sm:$0xff] }
  0xa5   : > { %v533_v19 = vpop.f32.mrf.mxu0 }
  0xa6   : > { %v2938_v20 = vmul.f32 0.5, %v533_v19 }
  0xa8   : > { %554 = vmatpush.msra.mxu1 %v2938_v20 }
  0xaa   : > { %555 = vmatpush.msra.mxu1 %v2943_v22 }
  0xab   : > { %2586 = vmatmul.msk.f32.vlgmr.msra.gmra.mxu1 %vm506_vm0, %v2886_v2 }
  0xac   : > { %734 = vmatpush.msrb.mxu1 %v662_v24  ;;  %v709_v24 = vld [vmem:[%s4889_s4 + $0x270] sm:$0xff] }
  0xad   : > { %804 = vmatpush.msra.mxu0 %v709_v24 }
  0xae   : > { %735 = vmatpush.msrb.mxu1 %v661_v25  ;;  %v680_v25 = vld [vmem:[%s4889_s4 + $0x188] sm:$0xff] }
  0xb0   : > { %736 = vmatpush.msrb.mxu1 %v660_v26  ;;  %v708_v26 = vld [vmem:[%s4889_s4 + $0x268] sm:$0xff] }
  0xb1   : > { %805 = vmatpush.msra.mxu0 %v708_v26  ;;  %v957_v26 = vld [vmem:[%s4890_s5 + $0x28] sm:$0xff] }
  0xb2   : > { %737 = vmatpush.msrb.mxu1 %v659_v27  ;;  %v679_v27 = vld [vmem:[%s4889_s4 + $0x180] sm:$0xff] }
  0xb3   : > { %2587 = vmatmul.msk.f32.gmra.mxu1 %vm506_vm0, %v2892_v3 }
  0xb4   : > { %738 = vmatpush.msrb.mxu1 %v658_v28  ;;  %v707_v28 = vld [vmem:[%s4889_s4 + $0x260] sm:$0xff] }
  0xb5   : > { %806 = vmatpush.msra.mxu0 %v707_v28  ;;  %v955_v28 = vld [vmem:[%s4890_s5 + $0x18] sm:$0xff] }
  0xb6   : > { %739 = vmatpush.msrb.mxu1 %v657_v29  ;;  %v706_v29 = vld [vmem:[%s4889_s4 + $0x258] sm:$0xff] }
  0xb7   : > { %807 = vmatpush.msra.mxu0 %v706_v29  ;;  %v954_v29 = vld [vmem:[%s4890_s5 + $0x10] sm:$0xff] }
  0xb8   : > { %740 = vmatpush.msrb.mxu1 %v656_v30  ;;  %v705_v30 = vld [vmem:[%s4889_s4 + $0x250] sm:$0xff] }
  0xb9   : > { %808 = vmatpush.msra.mxu0 %v705_v30 }
  0xba   : > { %741 = vmatpush.msrb.mxu1 %v655_v31  ;;  %v704_v31 = vld [vmem:[%s4889_s4 + $0x248] sm:$0xff] }
  0xbb   : > { %809 = vmatpush.msra.mxu0 %v704_v31 }
  0xbc   : > { %742 = vmatpush.msrb.mxu1 %v654_v32  ;;  %v703_v32 = vld [vmem:[%s4889_s4 + $0x240] sm:$0xff] }
  0xbd   : > { %v728_v53 = vpop.f32.mrf.mxu0  ;;  %810 = vmatpush.msra.mxu0 %v703_v32  ;;  %v953_v32 = vld [vmem:[%s4890_s5 + $0x8] sm:$0xff] }
  0xbe   : > { %743 = vmatpush.msrb.mxu1 %v653_v33  ;;  %v702_v33 = vld [vmem:[%s4889_s4 + $0x238] sm:$0xff] }
  0xbf   : > { %811 = vmatpush.msra.mxu0 %v702_v33  ;;  %v952_v33 = vld [vmem:[%s4890_s5] sm:$0xff] }
  0xc0   : > { %744 = vmatpush.msrb.mxu1 %v652_v34  ;;  %v701_v34 = vld [vmem:[%s4889_s4 + $0x230] sm:$0xff] }
  0xc1   : > { %812 = vmatpush.msra.mxu0 %v701_v34  ;;  %v983_v34 = vld [vmem:[%s4890_s5 + $0xf8] sm:$0xff] }
  0xc2   : > { %745 = vmatpush.msrb.mxu1 %v651_v35  ;;  %v700_v35 = vld [vmem:[%s4889_s4 + $0x228] sm:$0xff] }
  0xc3   : > { %813 = vmatpush.msra.mxu0 %v700_v35  ;;  %v982_v35 = vld [vmem:[%s4890_s5 + $0xf0] sm:$0xff] }
  0xc4   : > { %746 = vmatpush.msrb.mxu1 %v650_v36  ;;  %v699_v36 = vld [vmem:[%s4889_s4 + $0x220] sm:$0xff] }
  0xc5   : > { %814 = vmatpush.msra.mxu0 %v699_v36  ;;  %v981_v36 = vld [vmem:[%s4890_s5 + $0xe8] sm:$0xff] }
  0xc6   : > { %747 = vmatpush.msrb.mxu1 %v649_v37  ;;  %v3169_v37 = vld [vmem:[%s3160_s20] sm:$0xff] }
  0xc8   : > { %748 = vmatpush.msrb.mxu1 %v648_v38  ;;  %v698_v38 = vld [vmem:[%s4889_s4 + $0x218] sm:$0xff] }
  0xc9   : > { %815 = vmatpush.msra.mxu0 %v698_v38  ;;  %v980_v38 = vld [vmem:[%s4890_s5 + $0xe0] sm:$0xff] }
  0xca   : > { %749 = vmatpush.msrb.mxu1 %v647_v39  ;;  %v697_v39 = vld [vmem:[%s4889_s4 + $0x210] sm:$0xff] }
  0xcb   : > { %750 = vmatmul.f32.vlgmr.msrb.gmra.mxu1 %v2943_v22  ;;  %816 = vmatpush.msra.mxu0 %v697_v39  ;;  %v979_v39 = vld [vmem:[%s4890_s5 + $0xd8] sm:$0xff] }
  0xd3   : > { %753 = vmatmul.f32.gmra.mxu1 %v2938_v20 }
 0x128   : > { %v557_v40 = vpop.f32.mrf.mxu1 }
 0x129   : > { %v3010_v43 = vsub.f32 %v557_v40, %v2882_v1  ;;  %v3180_v40 = vld [vmem:[%s3160_s20 + $0x8] sm:$0xff] }
 0x130   : > { %v560_v41 = vpop.f32.mrf.mxu1 }
 0x131   : > { %v3007_v42 = vsub.f32 %v560_v41, %v2880_v0  ;;  %v696_v41 = vld [vmem:[%s4889_s4 + $0x208] sm:$0xff] }
 0x132   : > { %817 = vmatpush.msra.mxu0 %v696_v41  ;;  %v977_v41 = vld [vmem:[%s4890_s5 + $0xc8] sm:$0xff] }
 0x133   : > { %581 = vmatpush.msra.mxu2 %v3007_v42 }
 0x135   : > { %582 = vmatpush.msra.mxu2 %v3010_v43 }
 0x136   : > { %2588 = vmatmul.msk.f32.vlgmr.msra.gmra.mxu2 %vm506_vm0, %v2886_v2 }
 0x137   : > { %757 = vmatpush.msrb.mxu2 %v678_v44  ;;  %v695_v44 = vld [vmem:[%s4889_s4 + $0x200] sm:$0xff] }
 0x138   : > { %818 = vmatpush.msra.mxu0 %v695_v44  ;;  %v976_v44 = vld [vmem:[%s4890_s5 + $0xc0] sm:$0xff] }
 0x139   : > { %758 = vmatpush.msrb.mxu2 %v677_v45 }
 0x13b   : > { %759 = vmatpush.msrb.mxu2 %v676_v46 }
 0x13d   : > { %760 = vmatpush.msrb.mxu2 %v675_v47 }
 0x13e   : > { %2589 = vmatmul.msk.f32.gmra.mxu2 %vm506_vm0, %v2892_v3 }
 0x13f   : > { %761 = vmatpush.msrb.mxu2 %v674_v48 }
 0x141   : > { %762 = vmatpush.msrb.mxu2 %v673_v49 }
 0x143   : > { %763 = vmatpush.msrb.mxu2 %v672_v50 }
 0x145   : > { %764 = vmatpush.msrb.mxu2 %v671_v51 }
 0x147   : > { %765 = vmatpush.msrb.mxu2 %v670_v52 }
 0x148   : > { %v751_v55 = vpop.f32.mrf.mxu1 }
 0x149   : > { %v752_v57 = vadd.f32 %v751_v55, %v728_v53  ;;  %766 = vmatpush.msrb.mxu2 %v669_v54  ;;  %v997_v55 = vld [vmem:[%s4890_s5 + $0x168] sm:$0xff] }
 0x14b   : > { %767 = vmatpush.msrb.mxu2 %v668_v56  ;;  %v996_v56 = vld [vmem:[%s4890_s5 + $0x160] sm:$0xff] }
 0x14d   : > { %768 = vmatpush.msrb.mxu2 %v667_v58  ;;  %v994_v58 = vld [vmem:[%s4890_s5 + $0x150] sm:$0xff] }
 0x14f   : > { %769 = vmatpush.msrb.mxu2 %v666_v59  ;;  %v993_v59 = vld [vmem:[%s4890_s5 + $0x148] sm:$0xff] }
 0x151   : > { %770 = vmatpush.msrb.mxu2 %v665_v60  ;;  %v992_v60 = vld [vmem:[%s4890_s5 + $0x140] sm:$0xff] }
 0x153   : > { %771 = vmatpush.msrb.mxu2 %v664_v61  ;;  %v991_v61 = vld [vmem:[%s4890_s5 + $0x138] sm:$0xff] }
 0x155   : > { %772 = vmatpush.msrb.mxu2 %v663_v62  ;;  %v3231_v62 = vpop.f32.mrf.mxu0 }
 0x156   : > { %773 = vmatmul.f32.vlgmr.msrb.gmra.mxu2 %v3010_v43 }
 0x15e   : > { %776 = vmatmul.f32.gmra.mxu2 %v3007_v42 }
 0x1b9   : > { %v584_v63 = vpop.f32.mrf.mxu2 }
 0x1ba   : > { %v590_v6 = vsub.f32 %v584_v63, %v2943_v22  ;;  %v681_v22 = vld [vmem:[%s4889_s4 + $0x190] sm:$0xff] }
 0x1bb   : > { %v990_v63 = vld [vmem:[%s4890_s5 + $0x130] sm:$0xff] }
 0x1c1   : > { %v587_v4 = vpop.f32.mrf.mxu2 }
 0x1c2   : > { %v591_v5 = vsub.f32 %v587_v4, %v2938_v20  ;;  %v683_v20 = vld [vmem:[%s4889_s4 + $0x1a0] sm:$0xff]  ;;  %v989_v4 = vld [vmem:[%s4890_s5 + $0x128] sm:$0xff] }
 0x1c4   : > { %608 = vmatpush.msra.mxu3 %v591_v5 }
 0x1c6   : > { %609 = vmatpush.msra.mxu3 %v590_v6 }
 0x1c7   : > { %2590 = vmatmul.msk.f32.vlgmr.msra.gmra.mxu3 %vm506_vm0, %v2886_v2 }
 0x1c8   : > { %780 = vmatpush.msrb.mxu3 %v694_v7  ;;  %v987_v7 = vld [vmem:[%s4890_s5 + $0x118] sm:$0xff] }
 0x1ca   : > { %781 = vmatpush.msrb.mxu3 %v693_v8 }
 0x1cc   : > { %782 = vmatpush.msrb.mxu3 %v692_v9 }
 0x1ce   : > { %783 = vmatpush.msrb.mxu3 %v691_v10  ;;  %v986_v10 = vld [vmem:[%s4890_s5 + $0x110] sm:$0xff] }
 0x1cf   : > { %2591 = vmatmul.msk.f32.gmra.mxu3 %vm506_vm0, %v2892_v3 }
 0x1d0   : > { %784 = vmatpush.msrb.mxu3 %v690_v11  ;;  %v985_v11 = vld [vmem:[%s4890_s5 + $0x108] sm:$0xff] }
 0x1d2   : > { %785 = vmatpush.msrb.mxu3 %v689_v12  ;;  %v984_v12 = vld [vmem:[%s4890_s5 + $0x100] sm:$0xff] }
 0x1d4   : > { %786 = vmatpush.msrb.mxu3 %v688_v13  ;;  %v967_v13 = vld [vmem:[%s4890_s5 + $0x78] sm:$0xff] }
 0x1d6   : > { %787 = vmatpush.msrb.mxu3 %v687_v14  ;;  %v966_v14 = vld [vmem:[%s4890_s5 + $0x70] sm:$0xff] }
 0x1d8   : > { %788 = vmatpush.msrb.mxu3 %v686_v15  ;;  %v965_v15 = vld [vmem:[%s4890_s5 + $0x68] sm:$0xff] }
 0x1d9   : > { %v774_v17 = vpop.f32.mrf.mxu2 }
 0x1da   : > { %v3107_v19 = vadd.f32 %v774_v17, %v752_v57  ;;  %789 = vmatpush.msrb.mxu3 %v685_v16  ;;  %v995_v57 = vld [vmem:[%s4890_s5 + $0x158] sm:$0xff]  ;;  %v964_v16 = vld [vmem:[%s4890_s5 + $0x60] sm:$0xff] }
 0x1db   : > { %v963_v17 = vld [vmem:[%s4890_s5 + $0x58] sm:$0xff] }
 0x1dc   : > { %790 = vmatpush.msrb.mxu3 %v684_v18  ;;  %v962_v18 = vld [vmem:[%s4890_s5 + $0x50] sm:$0xff] }
 0x1de   : > { %791 = vmatpush.msrb.mxu3 %v683_v20  ;;  %v961_v20 = vld [vmem:[%s4890_s5 + $0x48] sm:$0xff] }
 0x1e0   : > { %792 = vmatpush.msrb.mxu3 %v682_v21  ;;  %v960_v21 = vld [vmem:[%s4890_s5 + $0x40] sm:$0xff] }
 0x1e2   : > { %793 = vmatpush.msrb.mxu3 %v681_v22  ;;  %v959_v22 = vld [vmem:[%s4890_s5 + $0x38] sm:$0xff] }
 0x1e4   : > { %794 = vmatpush.msrb.mxu3 %v680_v25 }
 0x1e6   : > { %795 = vmatpush.msrb.mxu3 %v679_v27  ;;  %v956_v27 = vld [vmem:[%s4890_s5 + $0x20] sm:$0xff] }
 0x1e7   : > { %796 = vmatmul.f32.vlgmr.msrb.gmra.mxu3 %v590_v6 }
 0x1e8   : > { %848 = vmatpush.msra.mxu3 %v2880_v0 }
 0x1ea   : > { %849 = vmatpush.msra.mxu3 %v2882_v1 }
 0x1ef   : > { %799 = vmatmul.f32.gmra.mxu3 %v591_v5  ;;  %v988_v5 = vld [vmem:[%s4890_s5 + $0x120] sm:$0xff] }
 0x1f7   : > { %2592 = vmatmul.msk.f32.vlgmr.msra.gmra.mxu3 %vm506_vm0, %v3169_v37 }
 0x1ff   : > { %2593 = vmatmul.msk.f32.gmra.mxu3 %vm506_vm0, %v3180_v40 }
 0x24a   : > { %v611_v45 = vpop.f32.mrf.mxu3 }
 0x24b   : > { %v617_v46 = vsub.f32 %v611_v45, %v3010_v43  ;;  %v998_v43 = vld [vmem:[%s4890_s5 + $0x170] sm:$0xff]  ;;  %v975_v45 = vld [vmem:[%s4890_s5 + $0xb8] sm:$0xff] }
 0x24d   : > { %819 = vmatmul.f32.vlgmr.msra.gmra.mxu0 %v617_v46  ;;  %v974_v46 = vld [vmem:[%s4890_s5 + $0xb0] sm:$0xff] }
 0x252   : > { %v614_v47 = vpop.f32.mrf.mxu3 }
 0x253   : > { %v618_v48 = vsub.f32 %v614_v47, %v3007_v42  ;;  %v999_v42 = vld [vmem:[%s4890_s5 + $0x178] sm:$0xff]  ;;  %v972_v47 = vld [vmem:[%s4890_s5 + $0xa0] sm:$0xff] }
 0x254   : > { %1078 = vmatpush.msrb.mxu0 %v999_v42 }
 0x255   : > { %822 = vmatmul.f32.gmra.mxu0 %v618_v48  ;;  %v971_v48 = vld [vmem:[%s4890_s5 + $0x98] sm:$0xff] }
 0x256   : > { %1079 = vmatpush.msrb.mxu0 %v998_v43 }
 0x258   : > { %1080 = vmatpush.msrb.mxu0 %v997_v55 }
 0x25a   : > { %1081 = vmatpush.msrb.mxu0 %v996_v56 }
 0x25c   : > { %1082 = vmatpush.msrb.mxu0 %v995_v57  ;;  %v1015_v57 = vld [vmem:[%s4890_s5 + $0x1f8] sm:$0xff] }
 0x25e   : > { %1083 = vmatpush.msrb.mxu0 %v994_v58  ;;  %v1014_v58 = vld [vmem:[%s4890_s5 + $0x1f0] sm:$0xff] }
 0x260   : > { %1084 = vmatpush.msrb.mxu0 %v993_v59  ;;  %v1011_v59 = vld [vmem:[%s4890_s5 + $0x1d8] sm:$0xff] }
 0x262   : > { %1085 = vmatpush.msrb.mxu0 %v992_v60  ;;  %v1010_v60 = vld [vmem:[%s4890_s5 + $0x1d0] sm:$0xff] }
 0x264   : > { %1086 = vmatpush.msrb.mxu0 %v991_v61  ;;  %v1031_v61 = vld [vmem:[%s4890_s5 + $0x278] sm:$0xff] }
 0x266   : > { %1087 = vmatpush.msrb.mxu0 %v990_v63  ;;  %v1030_v63 = vld [vmem:[%s4890_s5 + $0x270] sm:$0xff] }
 0x268   : > { %1088 = vmatpush.msrb.mxu0 %v989_v4  ;;  %v1009_v4 = vld [vmem:[%s4890_s5 + $0x1c8] sm:$0xff] }
 0x26a   : > { %v797_v49 = vpop.f32.mrf.mxu3  ;;  %1089 = vmatpush.msrb.mxu0 %v988_v5  ;;  %v1029_v5 = vld [vmem:[%s4890_s5 + $0x268] sm:$0xff] }
 0x26b   : > { %v798_v6 = vadd.f32 %v797_v49, %v3107_v19  ;;  %v3275_v19 = vpop.f32.mrf.mxu2  ;;  %v970_v49 = vld [vmem:[%s4890_s5 + $0x90] sm:$0xff] }
 0x26c   : > { %1090 = vmatpush.msrb.mxu0 %v987_v7  ;;  %v1028_v7 = vld [vmem:[%s4890_s5 + $0x260] sm:$0xff] }
 0x26e   : > { %1091 = vmatpush.msrb.mxu0 %v986_v10  ;;  %v1027_v10 = vld [vmem:[%s4890_s5 + $0x258] sm:$0xff] }
 0x270   : > { %1092 = vmatpush.msrb.mxu0 %v985_v11  ;;  %v1006_v11 = vld [vmem:[%s4890_s5 + $0x1b0] sm:$0xff] }
 0x272   : > { %v3192_v50 = vpop.f32.mrf.mxu3  ;;  %1093 = vmatpush.msrb.mxu0 %v984_v12  ;;  %v1026_v12 = vld [vmem:[%s4890_s5 + $0x250] sm:$0xff] }
 0x27a   : > { %v851_v51 = vpop.f32.mrf.mxu3 }
 0x27b   : > { %v3196_v54 = vmul.f32 0.5, %v851_v51  ;;  %v969_v51 = vld [vmem:[%s4890_s5 + $0x88] sm:$0xff] }
 0x282   : > { %v854_v52 = vpop.f32.mrf.mxu3 }
 0x283   : > { %v3194_v53 = vmul.f32 0.5, %v854_v52  ;;  %v968_v52 = vld [vmem:[%s4890_s5 + $0x80] sm:$0xff] }
 0x285   : > { %875 = vmatpush.msra.mxu2 %v3194_v53 }
 0x287   : > { %876 = vmatpush.msra.mxu2 %v3196_v54 }
 0x288   : > { %2594 = vmatmul.msk.f32.vlgmr.msra.gmra.mxu2 %vm506_vm0, %v3169_v37 }
 0x289   : > { %1032 = vmatpush.msrb.mxu2 %v967_v13  ;;  %v1005_v13 = vld [vmem:[%s4890_s5 + $0x1a8] sm:$0xff] }
 0x28b   : > { %1033 = vmatpush.msrb.mxu2 %v966_v14  ;;  %v1025_v14 = vld [vmem:[%s4890_s5 + $0x248] sm:$0xff] }
 0x28d   : > { %1034 = vmatpush.msrb.mxu2 %v965_v15  ;;  %v1004_v15 = vld [vmem:[%s4890_s5 + $0x1a0] sm:$0xff] }
 0x28f   : > { %1035 = vmatpush.msrb.mxu2 %v964_v16  ;;  %v1024_v16 = vld [vmem:[%s4890_s5 + $0x240] sm:$0xff] }
 0x290   : > { %2595 = vmatmul.msk.f32.gmra.mxu2 %vm506_vm0, %v3180_v40 }
 0x291   : > { %1036 = vmatpush.msrb.mxu2 %v963_v17  ;;  %v1003_v17 = vld [vmem:[%s4890_s5 + $0x198] sm:$0xff] }
 0x293   : > { %1037 = vmatpush.msrb.mxu2 %v962_v18  ;;  %v1023_v18 = vld [vmem:[%s4890_s5 + $0x238] sm:$0xff] }
 0x295   : > { %1038 = vmatpush.msrb.mxu2 %v961_v20  ;;  %v1002_v20 = vld [vmem:[%s4890_s5 + $0x190] sm:$0xff] }
 0x297   : > { %1039 = vmatpush.msrb.mxu2 %v960_v21  ;;  %v1022_v21 = vld [vmem:[%s4890_s5 + $0x230] sm:$0xff] }
 0x299   : > { %1040 = vmatpush.msrb.mxu2 %v959_v22  ;;  %v1001_v22 = vld [vmem:[%s4890_s5 + $0x188] sm:$0xff] }
 0x29b   : > { %1041 = vmatpush.msrb.mxu2 %v958_v23  ;;  %v1021_v23 = vld [vmem:[%s4890_s5 + $0x228] sm:$0xff] }
 0x29d   : > { %1042 = vmatpush.msrb.mxu2 %v957_v26  ;;  %v1020_v26 = vld [vmem:[%s4890_s5 + $0x220] sm:$0xff] }
 0x29f   : > { %1043 = vmatpush.msrb.mxu2 %v956_v27  ;;  %v1019_v27 = vld [vmem:[%s4890_s5 + $0x218] sm:$0xff] }
 0x2a1   : > { %1044 = vmatpush.msrb.mxu2 %v955_v28  ;;  %v1018_v28 = vld [vmem:[%s4890_s5 + $0x210] sm:$0xff] }
 0x2a3   : > { %1045 = vmatpush.msrb.mxu2 %v954_v29  ;;  %v1017_v29 = vld [vmem:[%s4890_s5 + $0x208] sm:$0xff] }
 0x2a5   : > { %1046 = vmatpush.msrb.mxu2 %v953_v32  ;;  %v754_v32 = vpop.f32.mrf.mxu1 }
 0x2a7   : > { %1047 = vmatpush.msrb.mxu2 %v952_v33 }
 0x2a8   : > { %1048 = vmatmul.f32.vlgmr.msrb.gmra.mxu2 %v2882_v1 }
 0x2a9   : > { %1124 = vmatpush.msra.mxu2 %v1031_v61 }
 0x2ab   : > { %1125 = vmatpush.msra.mxu2 %v1030_v63 }
 0x2ad   : > { %1126 = vmatpush.msra.mxu2 %v1029_v5  ;;  %v1298_v5 = vld [vmem:[%s4892_s7 + $0x60] sm:$0xff] }
 0x2af   : > { %1127 = vmatpush.msra.mxu2 %v1028_v7  ;;  %v1294_v7 = vld [vmem:[%s4892_s7 + $0x40] sm:$0xff] }
 0x2b0   : > { %1051 = vmatmul.f32.gmra.mxu2 %v2880_v0 }
 0x2b1   : > { %1128 = vmatpush.msra.mxu2 %v1027_v10  ;;  %v1290_v10 = vld [vmem:[%s4892_s7 + $0x20] sm:$0xff] }
 0x2b3   : > { %1129 = vmatpush.msra.mxu2 %v1026_v12  ;;  %v1286_v12 = vld [vmem:[%s4892_s7] sm:$0xff] }
 0x2b5   : > { %1130 = vmatpush.msra.mxu2 %v1025_v14 }
 0x2b7   : > { %1131 = vmatpush.msra.mxu2 %v1024_v16  ;;  %v2665_v16 = vld [vmem:[%s4891_s6] ss:$0 sm:$0xff] }
 0x2b9   : > { %1132 = vmatpush.msra.mxu2 %v1023_v18 }
 0x2bb   : > { %1133 = vmatpush.msra.mxu2 %v1022_v21 }
 0x2bd   : > { %1134 = vmatpush.msra.mxu2 %v1021_v23 }
 0x2bf   : > { %1135 = vmatpush.msra.mxu2 %v1020_v26 }
 0x2c1   : > { %1136 = vmatpush.msra.mxu2 %v1019_v27 }
 0x2c3   : > { %1137 = vmatpush.msra.mxu2 %v1018_v28  ;;  %v1380_v28 = vld [vmem:[%s4892_s7 + $0x2f0] sm:$0xff] }
 0x2c5   : > { %1138 = vmatpush.msra.mxu2 %v1017_v29  ;;  %v1378_v29 = vld [vmem:[%s4892_s7 + $0x2e0] sm:$0xff] }
 0x2ca   : > { %v820_v8 = vpop.f32.mrf.mxu0 }
 0x2cb   : > { %v3246_v9 = vadd.f32 %v820_v8, %v798_v6  ;;  %v1008_v6 = vld [vmem:[%s4890_s5 + $0x1c0] sm:$0xff]  ;;  %v1007_v8 = vld [vmem:[%s4890_s5 + $0x1b8] sm:$0xff] }
 0x30b   : > { %v878_v24 = vpop.f32.mrf.mxu2 }
 0x30c   : > { %v3290_v25 = vsub.f32 %v878_v24, %v2882_v1  ;;  %v978_v1 = vld [vmem:[%s4890_s5 + $0xd0] sm:$0xff]  ;;  %v1000_v24 = vld [vmem:[%s4890_s5 + $0x180] sm:$0xff] }
 0x30e   : > { %1094 = vmatmul.f32.vlgmr.msrb.gmra.mxu0 %v3290_v25 }
 0x313   : > { %v881_v30 = vpop.f32.mrf.mxu2 }
 0x314   : > { %v3306_v31 = vsub.f32 %v881_v30, %v2880_v0  ;;  %v973_v0 = vld [vmem:[%s4890_s5 + $0xa8] sm:$0xff]  ;;  %v1016_v30 = vld [vmem:[%s4890_s5 + $0x200] sm:$0xff] }
 0x315   : > { %1139 = vmatpush.msra.mxu2 %v1016_v30  ;;  %v1376_v30 = vld [vmem:[%s4892_s7 + $0x2d0] sm:$0xff] }
 0x316   : > { %902 = vmatpush.msrb.mxu3 %v3306_v31  ;;  %1097 = vmatmul.f32.gmra.mxu0 %v3306_v31 }
 0x318   : > { %903 = vmatpush.msrb.mxu3 %v3290_v25 }
 0x319   : > { %2596 = vmatmul.msk.f32.vlgmr.msrb.gmra.mxu3 %vm506_vm0, %v3169_v37 }
 0x31a   : > { %1055 = vmatpush.msra.mxu3 %v983_v34 }
 0x31c   : > { %1056 = vmatpush.msra.mxu3 %v982_v35 }
 0x31e   : > { %1057 = vmatpush.msra.mxu3 %v981_v36 }
 0x320   : > { %1058 = vmatpush.msra.mxu3 %v980_v38 }
 0x321   : > { %2597 = vmatmul.msk.f32.gmra.mxu3 %vm506_vm0, %v3180_v40 }
 0x322   : > { %1059 = vmatpush.msra.mxu3 %v979_v39  ;;  %v823_v39 = vpop.f32.mrf.mxu0 }
 0x324   : > { %1060 = vmatpush.msra.mxu3 %v978_v1  ;;  %v1316_v1 = vld [vmem:[%s4892_s7 + $0xf0] sm:$0xff] }
 0x325   : > { %1446 = vmatpush.msra.mxu0 %v1316_v1  ;;  %v1356_v1 = vld [vmem:[%s4892_s7 + $0x230] sm:$0xff] }
 0x326   : > { %1061 = vmatpush.msra.mxu3 %v977_v41  ;;  %v1314_v41 = vld [vmem:[%s4892_s7 + $0xe0] sm:$0xff] }
 0x327   : > { %1447 = vmatpush.msra.mxu0 %v1314_v41  ;;  %v1354_v41 = vld [vmem:[%s4892_s7 + $0x220] sm:$0xff] }
 0x328   : > { %1062 = vmatpush.msra.mxu3 %v976_v44 }
 0x32a   : > { %1063 = vmatpush.msra.mxu3 %v975_v45 }
 0x32b   : > { %v1049_v38 = vpop.f32.mrf.mxu2 }
 0x32c   : > { %1064 = vmatpush.msra.mxu3 %v974_v46  ;;  %v1308_v46 = vld [vmem:[%s4892_s7 + $0xb0] sm:$0xff] }
 0x32e   : > { %1065 = vmatpush.msra.mxu3 %v973_v0 }
 0x330   : > { %1066 = vmatpush.msra.mxu3 %v972_v47 }
 0x332   : > { %1067 = vmatpush.msra.mxu3 %v971_v48  ;;  %v1306_v48 = vld [vmem:[%s4892_s7 + $0xa0] sm:$0xff] }
 0x333   : > { %v1052_v45 = vpop.f32.mrf.mxu2 }
 0x334   : > { %1068 = vmatpush.msra.mxu3 %v970_v49  ;;  %v1304_v49 = vld [vmem:[%s4892_s7 + $0x90] sm:$0xff] }
 0x336   : > { %1069 = vmatpush.msra.mxu3 %v969_v51 }
 0x338   : > { %1070 = vmatpush.msra.mxu3 %v968_v52  ;;  %v1302_v52 = vld [vmem:[%s4892_s7 + $0x80] sm:$0xff] }
 0x339   : > { %1071 = vmatmul.f32.vlgmr.msra.gmra.mxu3 %v3196_v54 }
 0x341   : > { %1074 = vmatmul.f32.gmra.mxu3 %v3194_v53 }
 0x38b   : > { %v1095_v0 = vpop.f32.mrf.mxu0 }
 0x39c   : > { %v905_v42 = vpop.f32.mrf.mxu3 }
 0x39d   : > { %v911_v56 = vsub.f32 %v905_v42, %v3196_v54  ;;  %v1012_v54 = vld [vmem:[%s4890_s5 + $0x1e0] sm:$0xff] }
 0x3a4   : > { %v908_v43 = vpop.f32.mrf.mxu3 }
 0x3a5   : > { %v3374_v55 = vsub.f32 %v908_v43, %v3194_v53  ;;  %v1013_v53 = vld [vmem:[%s4890_s5 + $0x1e8] sm:$0xff] }
 0x3a7   : > { %929 = vmatpush.msra.mxu1 %v3374_v55 }
 0x3a9   : > { %930 = vmatpush.msra.mxu1 %v911_v56 }
 0x3aa   : > { %2598 = vmatmul.msk.f32.vlgmr.msra.gmra.mxu1 %vm506_vm0, %v3169_v37 }
 0x3ab   : > { %1101 = vmatpush.msrb.mxu1 %v1015_v57 }
 0x3ad   : > { %1102 = vmatpush.msrb.mxu1 %v1014_v58 }
 0x3af   : > { %1103 = vmatpush.msrb.mxu1 %v1013_v53 }
 0x3b1   : > { %1104 = vmatpush.msrb.mxu1 %v1012_v54 }
 0x3b2   : > { %2599 = vmatmul.msk.f32.gmra.mxu1 %vm506_vm0, %v3180_v40 }
 0x3b3   : > { %1105 = vmatpush.msrb.mxu1 %v1011_v59 }
 0x3b5   : > { %1106 = vmatpush.msrb.mxu1 %v1010_v60 }
 0x3b7   : > { %1107 = vmatpush.msrb.mxu1 %v1009_v4 }
 0x3b9   : > { %1108 = vmatpush.msrb.mxu1 %v1008_v6  ;;  %v1296_v6 = vld [vmem:[%s4892_s7 + $0x50] sm:$0xff] }
 0x3bb   : > { %1109 = vmatpush.msrb.mxu1 %v1007_v8  ;;  %v1292_v8 = vld [vmem:[%s4892_s7 + $0x30] sm:$0xff] }
 0x3bc   : > { %v1072_v44 = vpop.f32.mrf.mxu3 }
 0x3bd   : > { %1110 = vmatpush.msrb.mxu1 %v1006_v11  ;;  %v1073_v59 = vadd.f32 %v1072_v44, %v1049_v38  ;;  %v1288_v11 = vld [vmem:[%s4892_s7 + $0x10] sm:$0xff] }
 0x3be   : > { %v1360_v38 = vld [vmem:[%s4892_s7 + $0x250] sm:$0xff] }
 0x3bf   : > { %1111 = vmatpush.msrb.mxu1 %v1005_v13  ;;  %v1096_v61 = vadd.f32 %v1095_v0, %v1073_v59  ;;  %v755_v13 = vadd.f32 %v754_v32, %v3231_v62  ;;  %v1374_v32 = vld [vmem:[%s4892_s7 + $0x2c0] sm:$0xff]  ;;  %v1352_v44 = vld [vmem:[%s4892_s7 + $0x210] sm:$0xff]  ;;  %v1343_v0 = vld [vmem:[%s4892_s7 + $0x1c8] sm:$0xff] }
 0x3c1   : > { %1112 = vmatpush.msrb.mxu1 %v1004_v15  ;;  %v778_v14 = vadd.f32 %v3275_v19, %v755_v13  ;;  %v1334_v13 = vld [vmem:[%s4892_s7 + $0x180] sm:$0xff] }
 0x3c3   : > { %1113 = vmatpush.msrb.mxu1 %v1003_v17  ;;  %v801_v15 = vadd.f32 %v3192_v50, %v778_v14  ;;  %v1332_v14 = vld [vmem:[%s4892_s7 + $0x170] sm:$0xff] }
 0x3c4   : > { %v1075_v51 = vpop.f32.mrf.mxu3 }
 0x3c5   : > { %1114 = vmatpush.msrb.mxu1 %v1002_v20  ;;  %v1076_v43 = vadd.f32 %v1075_v51, %v1052_v45  ;;  %v824_v17 = vadd.f32 %v823_v39, %v801_v15  ;;  %v1358_v39 = vld [vmem:[%s4892_s7 + $0x240] sm:$0xff]  ;;  %v1347_v45 = vld [vmem:[%s4892_s7 + $0x1e8] sm:$0xff] }
 0x3c6   : > { %v1335_v51 = vld [vmem:[%s4892_s7 + $0x188] sm:$0xff]  ;;  %v1330_v15 = vld [vmem:[%s4892_s7 + $0x160] sm:$0xff] }
 0x3c7   : > { %1115 = vmatpush.msrb.mxu1 %v1001_v22 }
 0x3c9   : > { %1116 = vmatpush.msrb.mxu1 %v1000_v24 }
 0x3ca   : > { %1117 = vmatmul.f32.vlgmr.msrb.gmra.mxu1 %v911_v56  ;;  %v1098_v56 = vpop.f32.mrf.mxu0 }
 0x3cb   : > { %v1099_v58 = vadd.f32 %v1098_v56, %v1076_v43  ;;  %v1329_v43 = vld [vmem:[%s4892_s7 + $0x158] sm:$0xff] }
 0x3cc   : > { %v1325_v56 = vld [vmem:[%s4892_s7 + $0x138] sm:$0xff] }
 0x3d2   : > { %1120 = vmatmul.f32.gmra.mxu1 %v3374_v55  ;;  %v1300_v55 = vld [vmem:[%s4892_s7 + $0x70] sm:$0xff] }
 0x427   : > { %v932_v33 = vpop.f32.mrf.mxu1 }
 0x428   : > { %v938_v34 = vsub.f32 %v932_v33, %v3290_v25  ;;  %v1312_v25 = vld [vmem:[%s4892_s7 + $0xd0] sm:$0xff] }
 0x429   : > { %1448 = vmatpush.msra.mxu0 %v1312_v25  ;;  %v1372_v33 = vld [vmem:[%s4892_s7 + $0x2b0] sm:$0xff]  ;;  %v1350_v25 = vld [vmem:[%s4892_s7 + $0x200] sm:$0xff] }
 0x42a   : > { %1140 = vmatmul.f32.vlgmr.msra.gmra.mxu2 %v938_v34  ;;  %v1368_v34 = vld [vmem:[%s4892_s7 + $0x290] sm:$0xff] }
 0x42f   : > { %v935_v35 = vpop.f32.mrf.mxu1 }
 0x430   : > { %v939_v36 = vsub.f32 %v935_v35, %v3306_v31  ;;  %v1310_v31 = vld [vmem:[%s4892_s7 + $0xc0] sm:$0xff] }
 0x431   : > { %1449 = vmatpush.msra.mxu0 %v1310_v31  ;;  %v1366_v35 = vld [vmem:[%s4892_s7 + $0x280] sm:$0xff]  ;;  %v1349_v31 = vld [vmem:[%s4892_s7 + $0x1f8] sm:$0xff] }
 0x432   : > { %1143 = vmatmul.f32.gmra.mxu2 %v939_v36  ;;  %v1364_v36 = vld [vmem:[%s4892_s7 + $0x270] sm:$0xff] }
 0x433   : > { %1450 = vmatpush.msra.mxu0 %v1308_v46  ;;  %v1345_v46 = vld [vmem:[%s4892_s7 + $0x1d8] sm:$0xff] }
 0x435   : > { %1451 = vmatpush.msra.mxu0 %v1306_v48  ;;  %v1339_v48 = vld [vmem:[%s4892_s7 + $0x1a8] sm:$0xff] }
 0x437   : > { %1452 = vmatpush.msra.mxu0 %v1304_v49  ;;  %v1337_v49 = vld [vmem:[%s4892_s7 + $0x198] sm:$0xff] }
 0x439   : > { %1453 = vmatpush.msra.mxu0 %v1302_v52  ;;  %v1333_v52 = vld [vmem:[%s4892_s7 + $0x178] sm:$0xff] }
 0x43b   : > { %1454 = vmatpush.msra.mxu0 %v1300_v55  ;;  %v1327_v55 = vld [vmem:[%s4892_s7 + $0x148] sm:$0xff] }
 0x43d   : > { %1455 = vmatpush.msra.mxu0 %v1298_v5  ;;  %v1346_v5 = vld [vmem:[%s4892_s7 + $0x1e0] sm:$0xff] }
 0x43f   : > { %1456 = vmatpush.msra.mxu0 %v1296_v6  ;;  %v1344_v6 = vld [vmem:[%s4892_s7 + $0x1d0] sm:$0xff] }
 0x441   : > { %1457 = vmatpush.msra.mxu0 %v1294_v7  ;;  %v1342_v7 = vld [vmem:[%s4892_s7 + $0x1c0] sm:$0xff] }
 0x443   : > { %1458 = vmatpush.msra.mxu0 %v1292_v8  ;;  %v1340_v8 = vld [vmem:[%s4892_s7 + $0x1b0] sm:$0xff] }
 0x445   : > { %1459 = vmatpush.msra.mxu0 %v1290_v10  ;;  %v3688_v10 = vld [vmem:[%s2878_s16 + $0x8] sm:$0xff] }
 0x447   : > { %v1118_v47 = vpop.f32.mrf.mxu1  ;;  %1460 = vmatpush.msra.mxu0 %v1288_v11  ;;  %v1338_v11 = vld [vmem:[%s4892_s7 + $0x1a0] sm:$0xff] }
 0x448   : > { %v1119_v63 = vadd.f32 %v1118_v47, %v1096_v61  ;;  %v1341_v47 = vld [vmem:[%s4892_s7 + $0x1b8] sm:$0xff] }
 0x449   : > { %1461 = vmatpush.msra.mxu0 %v1286_v12  ;;  %v1336_v12 = vld [vmem:[%s4892_s7 + $0x190] sm:$0xff] }
 0x44f   : > { %v1121_v57 = vpop.f32.mrf.mxu1 }
 0x450   : > { %v1122_v53 = vadd.f32 %v1121_v57, %v1099_v58  ;;  %v1323_v57 = vld [vmem:[%s4892_s7 + $0x128] sm:$0xff]  ;;  %v1321_v58 = vld [vmem:[%s4892_s7 + $0x118] sm:$0xff] }
 0x4ad   : > { %v1141_v42 = vpop.f32.mrf.mxu2 }
 0x4ae   : > { %v1142_v4 = vadd.f32 %v1141_v42, %v1119_v63  ;;  %v1331_v42 = vld [vmem:[%s4892_s7 + $0x168] sm:$0xff]  ;;  %v1348_v63 = vld [vmem:[%s4892_s7 + $0x1f0] sm:$0xff] }
 0x4b5   : > { %v1144_v54 = vpop.f32.mrf.mxu2 }
 0x4b6   : > { %v1145_v60 = vadd.f32 %v1144_v54, %v1122_v53  ;;  %v1319_v53 = vld [vmem:[%s4892_s7 + $0x108] sm:$0xff] }
 0x4b8   : > { %1151 = vrot.lane.b32.xlu0 %v1145_v60, %s2746_s1 }
 0x4c0   : > { %1149 = vrot.lane.b32.xlu0 %v1142_v4, %s2746_s1  ;;  %v3670_v4 = vld [vmem:[%s2878_s16] sm:$0xff] }
 0x52a   : > { %v1152_v18 = vpop.permute.xlu0 %1151 }
 0x52b   : > { %v1157_v20 = vsel %vm1155_vm1, %v824_v17, %v1152_v18  ;;  %v1326_v17 = vld [vmem:[%s4892_s7 + $0x140] sm:$0xff]  ;;  %v1324_v18 = vld [vmem:[%s4892_s7 + $0x130] sm:$0xff] }
 0x52c   : > { %v1163_v21 = vadd.f32 %v2665_v16, %v1157_v20  ;;  %v1322_v20 = vld [vmem:[%s4892_s7 + $0x120] sm:$0xff] }
 0x52e   : > { %v3535_v22 = vmax.f32 %v1163_v21, 0.0  ;;  %v1320_v21 = vld [vmem:[%s4892_s7 + $0x110] sm:$0xff] }
 0x530   : > { %1182 = vmatpush.msrb.mxu3 %v3535_v22 }
 0x532   : > { %v1150_v23 = vpop.permute.xlu0 %1149 }
 0x533   : > { %v1156_v62 = vsel %vm1155_vm1, %v3246_v9, %v1150_v23  ;;  %v1318_v23 = vld [vmem:[%s4892_s7 + $0x100] sm:$0xff] }
 0x534   : > { %v1162_v24 = vadd.f32 %v2665_v16, %v1156_v62  ;;  %v1328_v16 = vld [vmem:[%s4892_s7 + $0x150] sm:$0xff]  ;;  %v1315_v62 = vld [vmem:[%s4892_s7 + $0xe8] sm:$0xff] }
 0x536   : > { %v3539_v19 = vmax.f32 %v1162_v24, 0.0  ;;  %v1313_v24 = vld [vmem:[%s4892_s7 + $0xd8] sm:$0xff] }
 0x538   : > { %1183 = vmatpush.msrb.mxu3 %v3539_v19  ;;  %1462 = vmatmul.f32.vlgmr.msra.gmra.mxu0 %v3539_v19 }
 0x539   : > { %2600 = vmatmul.msk.f32.vlgmr.msrb.gmra.mxu3 %vm506_vm0, %v2886_v2 }
 0x540   : > { %1465 = vmatmul.f32.gmra.mxu0 %v3535_v22 }
 0x541   : > { %2601 = vmatmul.msk.f32.gmra.mxu3 %vm506_vm0, %v2892_v3 }
 0x5bc   : > { %v1185_v50 = vpop.f32.mrf.mxu3 }
 0x5bd   : > { %v3550_v9 = vmul.f32 0.5, %v1185_v50  ;;  %v1309_v50 = vld [vmem:[%s4892_s7 + $0xb8] sm:$0xff] }
 0x5c4   : > { %v1188_v26 = vpop.f32.mrf.mxu3 }
 0x5c5   : > { %v3548_v27 = vmul.f32 0.5, %v1188_v26  ;;  %v1307_v26 = vld [vmem:[%s4892_s7 + $0xa8] sm:$0xff] }
 0x5c7   : > { %1209 = vmatpush.msrb.mxu2 %v3548_v27 }
 0x5c9   : > { %1210 = vmatpush.msrb.mxu2 %v3550_v9 }
 0x5ca   : > { %2602 = vmatmul.msk.f32.vlgmr.msrb.gmra.mxu2 %vm506_vm0, %v2886_v2  ;;  %v1370_v2 = vld [vmem:[%s4892_s7 + $0x2a0] sm:$0xff] }
 0x5cb   : > { %1492 = vmatpush.msra.mxu2 %v1380_v28  ;;  %v1305_v28 = vld [vmem:[%s4892_s7 + $0x98] sm:$0xff] }
 0x5cd   : > { %1493 = vmatpush.msra.mxu2 %v1378_v29  ;;  %v1303_v29 = vld [vmem:[%s4892_s7 + $0x88] sm:$0xff] }
 0x5cf   : > { %1494 = vmatpush.msra.mxu2 %v1376_v30  ;;  %v1301_v30 = vld [vmem:[%s4892_s7 + $0x78] sm:$0xff] }
 0x5d1   : > { %1495 = vmatpush.msra.mxu2 %v1374_v32  ;;  %v1299_v32 = vld [vmem:[%s4892_s7 + $0x68] sm:$0xff] }
 0x5d2   : > { %2603 = vmatmul.msk.f32.gmra.mxu2 %vm506_vm0, %v2892_v3  ;;  %v1362_v3 = vld [vmem:[%s4892_s7 + $0x260] sm:$0xff] }
 0x5d3   : > { %1496 = vmatpush.msra.mxu2 %v1372_v33  ;;  %v1297_v33 = vld [vmem:[%s4892_s7 + $0x58] sm:$0xff] }
 0x5d5   : > { %1497 = vmatpush.msra.mxu2 %v1370_v2  ;;  %v1295_v2 = vld [vmem:[%s4892_s7 + $0x48] sm:$0xff] }
 0x5d7   : > { %1498 = vmatpush.msra.mxu2 %v1368_v34  ;;  %v1293_v34 = vld [vmem:[%s4892_s7 + $0x38] sm:$0xff] }
 0x5d9   : > { %1499 = vmatpush.msra.mxu2 %v1366_v35  ;;  %v1291_v35 = vld [vmem:[%s4892_s7 + $0x28] sm:$0xff] }
 0x5db   : > { %1500 = vmatpush.msra.mxu2 %v1364_v36  ;;  %v1289_v36 = vld [vmem:[%s4892_s7 + $0x18] sm:$0xff] }
 0x5dd   : > { %1501 = vmatpush.msra.mxu2 %v1362_v3  ;;  %v1287_v3 = vld [vmem:[%s4892_s7 + $0x8] sm:$0xff] }
 0x5df   : > { %1502 = vmatpush.msra.mxu2 %v1360_v38 }
 0x5e1   : > { %1503 = vmatpush.msra.mxu2 %v1358_v39 }
 0x5e3   : > { %1504 = vmatpush.msra.mxu2 %v1356_v1 }
 0x5e5   : > { %1505 = vmatpush.msra.mxu2 %v1354_v41 }
 0x5e7   : > { %1506 = vmatpush.msra.mxu2 %v1352_v44  ;;  %v1412_v44 = vld [vmem:[%s4892_s7 + $0x3f0] sm:$0xff] }
 0x5e9   : > { %1507 = vmatpush.msra.mxu2 %v1350_v25  ;;  %v1410_v25 = vld [vmem:[%s4892_s7 + $0x3e0] sm:$0xff] }
 0x5eb   : > { %1584 = vmatpush.msrb.mxu2 %v1349_v31  ;;  %v1404_v31 = vld [vmem:[%s4892_s7 + $0x3b0] sm:$0xff] }
 0x5ed   : > { %1585 = vmatpush.msrb.mxu2 %v1347_v45  ;;  %v1402_v45 = vld [vmem:[%s4892_s7 + $0x3a0] sm:$0xff] }
 0x5ef   : > { %1586 = vmatpush.msrb.mxu2 %v1345_v46 }
 0x5f1   : > { %1587 = vmatpush.msrb.mxu2 %v1343_v0  ;;  %v1400_v0 = vld [vmem:[%s4892_s7 + $0x390] sm:$0xff] }
 0x5f3   : > { %1588 = vmatpush.msrb.mxu2 %v1341_v47  ;;  %v1398_v47 = vld [vmem:[%s4892_s7 + $0x380] sm:$0xff] }
 0x5f5   : > { %1589 = vmatpush.msrb.mxu2 %v1339_v48  ;;  %v1396_v48 = vld [vmem:[%s4892_s7 + $0x370] sm:$0xff] }
 0x5f7   : > { %1590 = vmatpush.msrb.mxu2 %v1337_v49  ;;  %v1394_v49 = vld [vmem:[%s4892_s7 + $0x360] sm:$0xff] }
 0x5f9   : > { %1591 = vmatpush.msrb.mxu2 %v1335_v51  ;;  %v1392_v51 = vld [vmem:[%s4892_s7 + $0x350] sm:$0xff] }
 0x5fb   : > { %1592 = vmatpush.msrb.mxu2 %v1333_v52 }
 0x5fd   : > { %1593 = vmatpush.msrb.mxu2 %v1331_v42  ;;  %v1390_v42 = vld [vmem:[%s4892_s7 + $0x340] sm:$0xff] }
 0x5ff   : > { %1594 = vmatpush.msrb.mxu2 %v1329_v43  ;;  %v1388_v43 = vld [vmem:[%s4892_s7 + $0x330] sm:$0xff] }
 0x601   : > { %1595 = vmatpush.msrb.mxu2 %v1327_v55  ;;  %v1386_v55 = vld [vmem:[%s4892_s7 + $0x320] sm:$0xff] }
 0x603   : > { %1596 = vmatpush.msrb.mxu2 %v1325_v56  ;;  %v1384_v56 = vld [vmem:[%s4892_s7 + $0x310] sm:$0xff] }
 0x605   : > { %1597 = vmatpush.msrb.mxu2 %v1323_v57  ;;  %v1382_v57 = vld [vmem:[%s4892_s7 + $0x300] sm:$0xff] }
 0x607   : > { %1598 = vmatpush.msrb.mxu2 %v1321_v58 }
 0x609   : > { %1599 = vmatpush.msrb.mxu2 %v1319_v53  ;;  %v1381_v53 = vld [vmem:[%s4892_s7 + $0x2f8] sm:$0xff] }
 0x64d   : > { %v1212_v54 = vpop.f32.mrf.mxu2 }
 0x64e   : > { %v3655_v59 = vsub.f32 %v1212_v54, %v3539_v19  ;;  %v1379_v54 = vld [vmem:[%s4892_s7 + $0x2e8] sm:$0xff] }
 0x650   : > { %1508 = vmatmul.f32.vlgmr.msra.gmra.mxu2 %v3655_v59 }
 0x651   : > { %1692 = vmatpush.msra.mxu2 %v3535_v22 }
 0x653   : > { %1693 = vmatpush.msra.mxu2 %v3539_v19 }
 0x655   : > { %v1215_v60 = vpop.f32.mrf.mxu2 }
 0x656   : > { %v3661_v61 = vsub.f32 %v1215_v60, %v3535_v22  ;;  %v1377_v60 = vld [vmem:[%s4892_s7 + $0x2d8] sm:$0xff] }
 0x658   : > { %1236 = vmatpush.msra.mxu1 %v3661_v61  ;;  %1511 = vmatmul.f32.gmra.mxu2 %v3661_v61 }
 0x65a   : > { %1237 = vmatpush.msra.mxu1 %v3655_v59 }
 0x65b   : > { %2604 = vmatmul.msk.f32.vlgmr.msra.gmra.mxu1 %vm506_vm0, %v3670_v4 }
 0x65c   : > { %1469 = vmatpush.msrb.mxu1 %v1348_v63  ;;  %v1375_v63 = vld [vmem:[%s4892_s7 + $0x2c8] sm:$0xff] }
 0x65e   : > { %1470 = vmatpush.msrb.mxu1 %v1346_v5  ;;  %v1371_v5 = vld [vmem:[%s4892_s7 + $0x2a8] sm:$0xff] }
 0x660   : > { %1471 = vmatpush.msrb.mxu1 %v1344_v6  ;;  %1600 = vmatmul.f32.vlgmr.msrb.gmra.mxu2 %v3550_v9 }
 0x662   : > { %1472 = vmatpush.msrb.mxu1 %v1342_v7  ;;  %v1444_v7 = vld [vmem:[%s4892_s7 + $0x4f0] sm:$0xff] }
 0x663   : > { %2605 = vmatmul.msk.f32.gmra.mxu1 %vm506_vm0, %v3688_v10  ;;  %1538 = vmatpush.msrb.mxu0 %v1444_v7  ;;  %v1405_v7 = vld [vmem:[%s4892_s7 + $0x3b8] sm:$0xff] }
 0x664   : > { %1473 = vmatpush.msrb.mxu1 %v1340_v8  ;;  %v1445_v8 = vld [vmem:[%s4892_s7 + $0x4f8] sm:$0xff] }
 0x666   : > { %1474 = vmatpush.msrb.mxu1 %v1338_v11  ;;  %v1443_v11 = vld [vmem:[%s4892_s7 + $0x4e8] sm:$0xff] }
 0x668   : > { %1475 = vmatpush.msrb.mxu1 %v1336_v12  ;;  %1603 = vmatmul.f32.gmra.mxu2 %v3548_v27  ;;  %v1369_v12 = vld [vmem:[%s4892_s7 + $0x298] sm:$0xff] }
 0x66a   : > { %1476 = vmatpush.msrb.mxu1 %v1334_v13  ;;  %v1440_v13 = vld [vmem:[%s4892_s7 + $0x4d0] sm:$0xff] }
 0x66c   : > { %1477 = vmatpush.msrb.mxu1 %v1332_v14  ;;  %v1441_v14 = vld [vmem:[%s4892_s7 + $0x4d8] sm:$0xff] }
 0x66e   : > { %1478 = vmatpush.msrb.mxu1 %v1330_v15  ;;  %v1367_v15 = vld [vmem:[%s4892_s7 + $0x288] sm:$0xff] }
 0x670   : > { %1479 = vmatpush.msrb.mxu1 %v1328_v16  ;;  %2608 = vmatmul.msk.f32.vlgmr.msra.gmra.mxu2 %vm506_vm0, %v3169_v37  ;;  %v1317_v37 = vld [vmem:[%s4892_s7 + $0xf8] sm:$0xff] }
 0x671   : > { %v1365_v16 = vld [vmem:[%s4892_s7 + $0x278] sm:$0xff] }
 0x672   : > { %1480 = vmatpush.msrb.mxu1 %v1326_v17  ;;  %v1363_v17 = vld [vmem:[%s4892_s7 + $0x268] sm:$0xff] }
 0x674   : > { %1481 = vmatpush.msrb.mxu1 %v1324_v18 }
 0x676   : > { %1482 = vmatpush.msrb.mxu1 %v1322_v20  ;;  %v1438_v20 = vld [vmem:[%s4892_s7 + $0x4c0] sm:$0xff] }
 0x678   : > { %1483 = vmatpush.msrb.mxu1 %v1320_v21  ;;  %2609 = vmatmul.msk.f32.gmra.mxu2 %vm506_vm0, %v3180_v40  ;;  %v1311_v40 = vld [vmem:[%s4892_s7 + $0xc8] sm:$0xff] }
 0x679   : > { %v1439_v21 = vld [vmem:[%s4892_s7 + $0x4c8] sm:$0xff] }
 0x67a   : > { %1484 = vmatpush.msrb.mxu1 %v1318_v23  ;;  %v1436_v23 = vld [vmem:[%s4892_s7 + $0x4b0] sm:$0xff] }
 0x67b   : > { %1485 = vmatmul.f32.vlgmr.msrb.gmra.mxu1 %v3550_v9 }
 0x67c   : > { %1561 = vmatpush.msra.mxu1 %v1317_v37  ;;  %v1437_v37 = vld [vmem:[%s4892_s7 + $0x4b8] sm:$0xff] }
 0x67e   : > { %1562 = vmatpush.msra.mxu1 %v1315_v62  ;;  %v1361_v62 = vld [vmem:[%s4892_s7 + $0x258] sm:$0xff] }
 0x680   : > { %1563 = vmatpush.msra.mxu1 %v1313_v24  ;;  %v1434_v24 = vld [vmem:[%s4892_s7 + $0x4a0] sm:$0xff] }
 0x682   : > { %1564 = vmatpush.msra.mxu1 %v1311_v40  ;;  %v1435_v40 = vld [vmem:[%s4892_s7 + $0x4a8] sm:$0xff] }
 0x683   : > { %1488 = vmatmul.f32.gmra.mxu1 %v3548_v27 }
 0x684   : > { %1565 = vmatpush.msra.mxu1 %v1309_v50  ;;  %v1359_v50 = vld [vmem:[%s4892_s7 + $0x248] sm:$0xff] }
 0x686   : > { %1566 = vmatpush.msra.mxu1 %v1307_v26  ;;  %v1432_v26 = vld [vmem:[%s4892_s7 + $0x490] sm:$0xff] }
 0x688   : > { %1567 = vmatpush.msra.mxu1 %v1305_v28  ;;  %v1433_v28 = vld [vmem:[%s4892_s7 + $0x498] sm:$0xff] }
 0x68a   : > { %1568 = vmatpush.msra.mxu1 %v1303_v29  ;;  %v1357_v29 = vld [vmem:[%s4892_s7 + $0x238] sm:$0xff] }
 0x68c   : > { %1569 = vmatpush.msra.mxu1 %v1301_v30  ;;  %v1355_v30 = vld [vmem:[%s4892_s7 + $0x228] sm:$0xff] }
 0x68e   : > { %1570 = vmatpush.msra.mxu1 %v1299_v32  ;;  %v1430_v32 = vld [vmem:[%s4892_s7 + $0x480] sm:$0xff] }
 0x690   : > { %1571 = vmatpush.msra.mxu1 %v1297_v33  ;;  %v1431_v33 = vld [vmem:[%s4892_s7 + $0x488] sm:$0xff] }
 0x692   : > { %1572 = vmatpush.msra.mxu1 %v1295_v2  ;;  %v1428_v2 = vld [vmem:[%s4892_s7 + $0x470] sm:$0xff] }
 0x694   : > { %1573 = vmatpush.msra.mxu1 %v1293_v34  ;;  %v1429_v34 = vld [vmem:[%s4892_s7 + $0x478] sm:$0xff] }
 0x696   : > { %1574 = vmatpush.msra.mxu1 %v1291_v35  ;;  %v1353_v35 = vld [vmem:[%s4892_s7 + $0x218] sm:$0xff] }
 0x698   : > { %1575 = vmatpush.msra.mxu1 %v1289_v36 }
 0x69a   : > { %1576 = vmatpush.msra.mxu1 %v1287_v3  ;;  %v1426_v3 = vld [vmem:[%s4892_s7 + $0x460] sm:$0xff] }
 0x69b   : > { %1577 = vmatmul.f32.vlgmr.msra.gmra.mxu1 %v3539_v19 }
 0x69c   : > { %1653 = vmatpush.msrb.mxu1 %v1445_v8  ;;  %v4032_v8 = vld [vmem:[%s3160_s20] sm:$0xff] }
 0x69e   : > { %1654 = vmatpush.msrb.mxu1 %v1443_v11  ;;  %v1403_v11 = vld [vmem:[%s4892_s7 + $0x3a8] sm:$0xff] }
 0x6a0   : > { %1655 = vmatpush.msrb.mxu1 %v1441_v14  ;;  %v1846_v14 = vld [vmem:[%s4893_s8 + $0x190] sm:$0xff] }
 0x6a2   : > { %1656 = vmatpush.msrb.mxu1 %v1439_v21  ;;  %v1395_v21 = vld [vmem:[%s4892_s7 + $0x368] sm:$0xff] }
 0x6a3   : > { %1580 = vmatmul.f32.gmra.mxu1 %v3535_v22 }
 0x6a4   : > { %1657 = vmatpush.msrb.mxu1 %v1437_v37  ;;  %v1393_v37 = vld [vmem:[%s4892_s7 + $0x358] sm:$0xff] }
 0x6a6   : > { %1658 = vmatpush.msrb.mxu1 %v1435_v40  ;;  %v1836_v40 = vld [vmem:[%s4893_s8 + $0x140] sm:$0xff] }
 0x6a8   : > { %1659 = vmatpush.msrb.mxu1 %v1433_v28  ;;  %v1387_v28 = vld [vmem:[%s4892_s7 + $0x328] sm:$0xff] }
 0x6aa   : > { %1660 = vmatpush.msrb.mxu1 %v1431_v33  ;;  %v1383_v33 = vld [vmem:[%s4892_s7 + $0x308] sm:$0xff] }
 0x6ac   : > { %1661 = vmatpush.msrb.mxu1 %v1429_v34  ;;  %v2747_v34 = vmov 0  }
 0x6ad   : > { %2663 = vset.pattern.permute.xlu1 %v2747_v34  ;;  %2664 = vset.pattern.permute.xlu0 %v2747_v34 }
 0x6d3   : > { %v3812_v46 = vpop.f32.mrf.mxu2 }
 0x6d8   : > { %v1239_v38 = vpop.f32.mrf.mxu1 }
 0x6d9   : > { %v3786_v41 = vsub.f32 %v1239_v38, %v3550_v9  ;;  %v1406_v9 = vld [vmem:[%s4892_s7 + $0x3c0] sm:$0xff]  ;;  %v1427_v38 = vld [vmem:[%s4892_s7 + $0x468] sm:$0xff] }
 0x6da   : > { %1662 = vmatpush.msrb.mxu1 %v1427_v38 }
 0x6db   : > { %v3829_v52 = vpop.f32.mrf.mxu2 }
 0x6e0   : > { %v1242_v39 = vpop.f32.mrf.mxu1 }
 0x6e1   : > { %v3783_v1 = vsub.f32 %v1242_v39, %v3548_v27  ;;  %v1408_v27 = vld [vmem:[%s4892_s7 + $0x3d0] sm:$0xff]  ;;  %v1351_v39 = vld [vmem:[%s4892_s7 + $0x208] sm:$0xff] }
 0x6e3   : > { %1263 = vmatpush.msra.mxu3 %v3783_v1  ;;  %v3846_v58 = vpop.f32.mrf.mxu2 }
 0x6e5   : > { %1264 = vmatpush.msra.mxu3 %v3786_v41 }
 0x6e6   : > { %2606 = vmatmul.msk.f32.vlgmr.msra.gmra.mxu3 %vm506_vm0, %v3670_v4  ;;  %v1373_v4 = vld [vmem:[%s4892_s7 + $0x2b8] sm:$0xff] }
 0x6e7   : > { %1515 = vmatpush.msrb.mxu3 %v1412_v44  ;;  %v1424_v44 = vld [vmem:[%s4892_s7 + $0x450] sm:$0xff] }
 0x6e9   : > { %1516 = vmatpush.msrb.mxu3 %v1410_v25 }
 0x6eb   : > { %1517 = vmatpush.msrb.mxu3 %v1408_v27  ;;  %v3867_v6 = vpop.f32.mrf.mxu2  ;;  %v1425_v27 = vld [vmem:[%s4892_s7 + $0x458] sm:$0xff] }
 0x6ec   : > { %1663 = vmatpush.msrb.mxu1 %v1425_v27  ;;  %v1824_v27 = vld [vmem:[%s4893_s8 + $0xe0] sm:$0xff] }
 0x6ed   : > { %1518 = vmatpush.msrb.mxu3 %v1406_v9  ;;  %v1422_v9 = vld [vmem:[%s4892_s7 + $0x440] sm:$0xff] }
 0x6ee   : > { %2607 = vmatmul.msk.f32.gmra.mxu3 %vm506_vm0, %v3688_v10  ;;  %v1442_v10 = vld [vmem:[%s4892_s7 + $0x4e0] sm:$0xff] }
 0x6ef   : > { %1519 = vmatpush.msrb.mxu3 %v1404_v31  ;;  %1539 = vmatpush.msrb.mxu0 %v1442_v10  ;;  %v1850_v10 = vld [vmem:[%s4893_s8 + $0x1b0] sm:$0xff] }
 0x6f1   : > { %1520 = vmatpush.msrb.mxu3 %v1402_v45  ;;  %1540 = vmatpush.msrb.mxu0 %v1440_v13  ;;  %v1423_v45 = vld [vmem:[%s4892_s7 + $0x448] sm:$0xff]  ;;  %v1401_v13 = vld [vmem:[%s4892_s7 + $0x398] sm:$0xff] }
 0x6f2   : > { %1664 = vmatpush.msrb.mxu1 %v1423_v45  ;;  %v1823_v45 = vld [vmem:[%s4893_s8 + $0xd8] sm:$0xff] }
 0x6f3   : > { %1521 = vmatpush.msrb.mxu3 %v1400_v0  ;;  %v1695_v18 = vpop.f32.mrf.mxu2  ;;  %1541 = vmatpush.msrb.mxu0 %v1438_v20  ;;  %v1420_v0 = vld [vmem:[%s4892_s7 + $0x430] sm:$0xff] }
 0x6f4   : > { %v3971_v31 = vmul.f32 0.5, %v1695_v18  ;;  %v4061_v18 = vld [vmem:[%s3160_s20 + $0x8] sm:$0xff]  ;;  %v1842_v20 = vld [vmem:[%s4893_s8 + $0x170] sm:$0xff]  ;;  %s477_s20 = scalar_lea.vmem [#allocation3], %s476_s23 }
 0x6f5   : > { %1522 = vmatpush.msrb.mxu3 %v1398_v47  ;;  %1542 = vmatpush.msrb.mxu0 %v1436_v23  ;;  %v1421_v47 = vld [vmem:[%s4892_s7 + $0x438] sm:$0xff]  ;;  %v1840_v23 = vld [vmem:[%s4893_s8 + $0x160] sm:$0xff]  ;;  %s2479_s15 = sshll.u32 %s477_s20, 4  ;;  %s2480_s15 = int_to_ptr.vmem [resolvable:$true] %s2479_s15 }
 0x6f6   : > { %1665 = vmatpush.msrb.mxu1 %v1421_v47  ;;  %v1821_v47 = vld [vmem:[%s4893_s8 + $0xc8] sm:$0xff] }
 0x6f7   : > { %1523 = vmatpush.msrb.mxu3 %v1396_v48  ;;  %1543 = vmatpush.msrb.mxu0 %v1434_v24  ;;  %v1418_v48 = vld [vmem:[%s4892_s7 + $0x420] sm:$0xff]  ;;  %v1391_v24 = vld [vmem:[%s4892_s7 + $0x348] sm:$0xff] }
 0x6f9   : > { %1524 = vmatpush.msrb.mxu3 %v1394_v49  ;;  %1544 = vmatpush.msrb.mxu0 %v1432_v26  ;;  %v1419_v49 = vld [vmem:[%s4892_s7 + $0x428] sm:$0xff]  ;;  %v1834_v26 = vld [vmem:[%s4893_s8 + $0x130] sm:$0xff] }
 0x6fa   : > { %1666 = vmatpush.msrb.mxu1 %v1419_v49 }
 0x6fb   : > { %1525 = vmatpush.msrb.mxu3 %v1392_v51  ;;  %1545 = vmatpush.msrb.mxu0 %v1430_v32  ;;  %v1698_v36 = vpop.f32.mrf.mxu2  ;;  %v1416_v51 = vld [vmem:[%s4892_s7 + $0x410] sm:$0xff] }
 0x6fc   : > { %v3963_v25 = vmul.f32 0.5, %v1698_v36  ;;  %v1830_v32 = vld [vmem:[%s4893_s8 + $0x110] sm:$0xff]  ;;  %v2213_v36 = vld [vmem:[%s497_s0 + $0x8] sm:$0xff] }
 0x6fd   : > { %1526 = vmatpush.msrb.mxu3 %v1390_v42  ;;  %1546 = vmatpush.msrb.mxu0 %v1428_v2  ;;  %v1417_v42 = vld [vmem:[%s4892_s7 + $0x418] sm:$0xff]  ;;  %v1828_v2 = vld [vmem:[%s4893_s8 + $0x100] sm:$0xff] }
 0x6fe   : > { %1667 = vmatpush.msrb.mxu1 %v1417_v42  ;;  %v1819_v42 = vld [vmem:[%s4893_s8 + $0xb8] sm:$0xff] }
 0x6ff   : > { %1527 = vmatpush.msrb.mxu3 %v1388_v43  ;;  %1547 = vmatpush.msrb.mxu0 %v1426_v3  ;;  %v1414_v43 = vld [vmem:[%s4892_s7 + $0x400] sm:$0xff] }
 0x701   : > { %1528 = vmatpush.msrb.mxu3 %v1386_v55  ;;  %1548 = vmatpush.msrb.mxu0 %v1424_v44  ;;  %v1415_v55 = vld [vmem:[%s4892_s7 + $0x408] sm:$0xff]  ;;  %v1827_v44 = vld [vmem:[%s4893_s8 + $0xf8] sm:$0xff] }
 0x702   : > { %1668 = vmatpush.msrb.mxu1 %v1415_v55  ;;  %v1814_v55 = vld [vmem:[%s4893_s8 + $0x90] sm:$0xff] }
 0x703   : > { %1529 = vmatpush.msrb.mxu3 %v1384_v56  ;;  %1549 = vmatpush.msrb.mxu0 %v1422_v9  ;;  %v1413_v56 = vld [vmem:[%s4892_s7 + $0x3f8] sm:$0xff]  ;;  %v1825_v9 = vld [vmem:[%s4893_s8 + $0xe8] sm:$0xff] }
 0x705   : > { %1530 = vmatpush.msrb.mxu3 %v1382_v57  ;;  %1550 = vmatpush.msrb.mxu0 %v1420_v0  ;;  %v1858_v57 = vld [vmem:[%s4893_s8 + $0x1f0] sm:$0xff]  ;;  %v1820_v0 = vld [vmem:[%s4893_s8 + $0xc0] sm:$0xff] }
 0x706   : > { %1531 = vmatmul.f32.vlgmr.msrb.gmra.mxu3 %v3786_v41  ;;  %1979 = vmatpush.msra.mxu1 %v1858_v57  ;;  %v1812_v57 = vld [vmem:[%s4893_s8 + $0x80] sm:$0xff] }
 0x707   : > { %1607 = vmatpush.msra.mxu3 %v1381_v53  ;;  %1551 = vmatpush.msrb.mxu0 %v1418_v48  ;;  %v1411_v53 = vld [vmem:[%s4892_s7 + $0x3e8] sm:$0xff] }
 0x709   : > { %1608 = vmatpush.msra.mxu3 %v1379_v54  ;;  %1552 = vmatpush.msrb.mxu0 %v1416_v51  ;;  %v1856_v54 = vld [vmem:[%s4893_s8 + $0x1e0] sm:$0xff]  ;;  %v1818_v51 = vld [vmem:[%s4893_s8 + $0xb0] sm:$0xff] }
 0x70a   : > { %1980 = vmatpush.msra.mxu1 %v1856_v54  ;;  %v1810_v54 = vld [vmem:[%s4893_s8 + $0x70] sm:$0xff] }
 0x70b   : > { %1609 = vmatpush.msra.mxu3 %v1377_v60  ;;  %1553 = vmatpush.msrb.mxu0 %v1414_v43  ;;  %v1409_v60 = vld [vmem:[%s4892_s7 + $0x3d8] sm:$0xff]  ;;  %v1816_v43 = vld [vmem:[%s4893_s8 + $0xa0] sm:$0xff] }
 0x70d   : > { %1610 = vmatpush.msra.mxu3 %v1375_v63  ;;  %1630 = vmatpush.msra.mxu0 %v1413_v56  ;;  %v1854_v63 = vld [vmem:[%s4893_s8 + $0x1d0] sm:$0xff]  ;;  %v1815_v56 = vld [vmem:[%s4893_s8 + $0x98] sm:$0xff] }
 0x70e   : > { %1534 = vmatmul.f32.gmra.mxu3 %v3783_v1  ;;  %1981 = vmatpush.msra.mxu1 %v1854_v63  ;;  %v1808_v63 = vld [vmem:[%s4893_s8 + $0x60] sm:$0xff] }
 0x70f   : > { %1611 = vmatpush.msra.mxu3 %v1373_v4  ;;  %1631 = vmatpush.msra.mxu0 %v1411_v53  ;;  %v1407_v4 = vld [vmem:[%s4892_s7 + $0x3c8] sm:$0xff] }
 0x710   : > { %v1813_v53 = vld [vmem:[%s4893_s8 + $0x88] sm:$0xff] }
 0x711   : > { %1612 = vmatpush.msra.mxu3 %v1371_v5  ;;  %1632 = vmatpush.msra.mxu0 %v1409_v60  ;;  %v1852_v5 = vld [vmem:[%s4893_s8 + $0x1c0] sm:$0xff]  ;;  %v1811_v60 = vld [vmem:[%s4893_s8 + $0x78] sm:$0xff] }
 0x712   : > { %1982 = vmatpush.msra.mxu1 %v1852_v5  ;;  %v1806_v5 = vld [vmem:[%s4893_s8 + $0x50] sm:$0xff] }
 0x713   : > { %1613 = vmatpush.msra.mxu3 %v1369_v12  ;;  %1633 = vmatpush.msra.mxu0 %v1407_v4  ;;  %v1848_v12 = vld [vmem:[%s4893_s8 + $0x1a0] sm:$0xff]  ;;  %v1809_v4 = vld [vmem:[%s4893_s8 + $0x68] sm:$0xff] }
 0x714   : > { %1983 = vmatpush.msra.mxu1 %v1850_v10  ;;  %v1804_v10 = vld [vmem:[%s4893_s8 + $0x40] sm:$0xff] }
 0x715   : > { %1614 = vmatpush.msra.mxu3 %v1367_v15  ;;  %1634 = vmatpush.msra.mxu0 %v1405_v7  ;;  %v1399_v15 = vld [vmem:[%s4892_s7 + $0x388] sm:$0xff]  ;;  %v1486_v7 = vpop.f32.mrf.mxu1 }
 0x716   : > { %1984 = vmatpush.msra.mxu1 %v1848_v12  ;;  %v1463_v12 = vpop.f32.mrf.mxu0 }
 0x717   : > { %1615 = vmatpush.msra.mxu3 %v1365_v16  ;;  %1635 = vmatpush.msra.mxu0 %v1403_v11  ;;  %v1844_v16 = vld [vmem:[%s4893_s8 + $0x180] sm:$0xff]  ;;  %v1805_v11 = vld [vmem:[%s4893_s8 + $0x48] sm:$0xff] }
 0x718   : > { %1985 = vmatpush.msra.mxu1 %v1846_v14  ;;  %v1803_v14 = vld [vmem:[%s4893_s8 + $0x38] sm:$0xff] }
 0x719   : > { %1616 = vmatpush.msra.mxu3 %v1363_v17  ;;  %1636 = vmatpush.msra.mxu0 %v1401_v13  ;;  %v1397_v17 = vld [vmem:[%s4892_s7 + $0x378] sm:$0xff]  ;;  %v1802_v13 = vld [vmem:[%s4893_s8 + $0x30] sm:$0xff] }
 0x71a   : > { %1986 = vmatpush.msra.mxu1 %v1844_v16  ;;  %v1800_v16 = vld [vmem:[%s4893_s8 + $0x20] sm:$0xff] }
 0x71b   : > { %1617 = vmatpush.msra.mxu3 %v1361_v62  ;;  %1637 = vmatpush.msra.mxu0 %v1399_v15  ;;  %v1838_v62 = vld [vmem:[%s4893_s8 + $0x150] sm:$0xff]  ;;  %v1487_v15 = vadd.f32 %v1486_v7, %v1463_v12  ;;  %v1849_v7 = vld [vmem:[%s4893_s8 + $0x1a8] sm:$0xff] }
 0x71c   : > { %1987 = vmatpush.msra.mxu1 %v1842_v20  ;;  %v1798_v20 = vld [vmem:[%s4893_s8 + $0x10] sm:$0xff] }
 0x71d   : > { %1618 = vmatpush.msra.mxu3 %v1359_v50  ;;  %1638 = vmatpush.msra.mxu0 %v1397_v17  ;;  %v1389_v50 = vld [vmem:[%s4892_s7 + $0x338] sm:$0xff]  ;;  %v1801_v17 = vld [vmem:[%s4893_s8 + $0x28] sm:$0xff] }
 0x71e   : > { %1988 = vmatpush.msra.mxu1 %v1840_v23  ;;  %v1796_v23 = vld [vmem:[%s4893_s8] sm:$0xff] }
 0x71f   : > { %1619 = vmatpush.msra.mxu3 %v1357_v29  ;;  %1639 = vmatpush.msra.mxu0 %v1395_v21  ;;  %v1832_v29 = vld [vmem:[%s4893_s8 + $0x120] sm:$0xff]  ;;  %v1510_v21 = vadd.f32 %v3812_v46, %v1487_v15 }
 0x720   : > { %1989 = vmatpush.msra.mxu1 %v1838_v62  ;;  %v1489_v62 = vpop.f32.mrf.mxu1 }
 0x721   : > { %1620 = vmatpush.msra.mxu3 %v1355_v30  ;;  %1640 = vmatpush.msra.mxu0 %v1393_v37  ;;  %v1385_v30 = vld [vmem:[%s4892_s7 + $0x318] sm:$0xff]  ;;  %v1797_v37 = vld [vmem:[%s4893_s8 + $0x8] sm:$0xff] }
 0x722   : > { %1990 = vmatpush.msra.mxu1 %v1836_v40 }
 0x723   : > { %1621 = vmatpush.msra.mxu3 %v1353_v35  ;;  %1641 = vmatpush.msra.mxu0 %v1391_v24  ;;  %v2212_v35 = vld [vmem:[%s497_s0] sm:$0xff]  ;;  %s2481_s0 = sshll.u32 %s2477_s30, 4  ;;  %s2482_s0 = int_to_ptr.hbm [resolvable:$true] %s2481_s0 }
 0x724   : > { %1991 = vmatpush.msra.mxu1 %v1834_v26  ;;  %2216 = vperm.xlu1 %2663, %v2212_v35   ;;  %s2696_s27 = sshra.s32 %s2482_s0, 4  ;;  %s2697_s27 = int_to_ptr.hbm [resolvable:$true] %s2696_s27 }
 0x725   : > { %1622 = vmatpush.msra.mxu3 %v1351_v39  ;;  %1642 = vmatpush.msra.mxu0 %v1389_v50  ;;  %v1826_v39 = vld [vmem:[%s4893_s8 + $0xf0] sm:$0xff]  ;;  %v1466_v50 = vpop.f32.mrf.mxu0  ;;  %s2698_s16 = scalar_lea.hbm %s2697_s27, 1  ;;  %p2703_p0 = scmp.lt.s32.totalorder %s2697_s27, %s4898_s13 }
 0x726   : > { %1623 = vmatmul.f32.vlgmr.msra.gmra.mxu3 %v3655_v59  ;;  %1992 = vmatpush.msra.mxu1 %v1832_v29  ;;  %v1490_v26 = vadd.f32 %v1489_v62, %v1466_v50  ;;  %p2699_p11 = scmp.ne.s32.totalorder %s2697_s27, %s2698_s16  ;;  %p2704_p1 = scmp.lt.s32.totalorder %s2702_s21, %s2698_s16 }
 0x727   : > { %1719 = vmatpush.msrb.mxu3 %v3963_v25  ;;  %1643 = vmatpush.msra.mxu0 %v1387_v28 }
 0x728   : > { %1993 = vmatpush.msra.mxu1 %v1830_v32  ;;  %v1513_v46 = vadd.f32 %v3829_v52, %v1490_v26  ;;  %p2700_p12 = pnand %p2699_p11, %p2856_p5  ;;  %p2705_p2 = por %p2704_p1, %p2703_p0 }
 0x729   : > { %1720 = vmatpush.msrb.mxu3 %v3971_v31  ;;  %1644 = vmatpush.msra.mxu0 %v1385_v30  ;;  %v1578_v30 = vpop.f32.mrf.mxu1 }
 0x72a   : > { %1994 = vmatpush.msra.mxu1 %v1828_v2  ;;  %v1602_v32 = vadd.f32 %v3846_v58, %v1578_v30  ;;  %v1890_v58 = vld [vmem:[%s4893_s8 + $0x2f0] sm:$0xff]  ;;  %p2701_p13 = pneg %p2700_p12 }
 0x72b   : > { %1645 = vmatpush.msra.mxu0 %v1383_v33 }
 0x72c   : > { %2221 = vperm.xlu1 %2663, %v2213_v36   ;;  %p2706_p3 = pnand %p2705_p2, %p2701_p13 }
 0x72e   : > { %1626 = vmatmul.f32.gmra.mxu3 %v3661_v61 }
 0x731   : > { %v1581_v34 = vpop.f32.mrf.mxu1 }
 0x732   : > { %v1605_v35 = vadd.f32 %v3867_v6, %v1581_v34  ;;  %v1888_v6 = vld [vmem:[%s4893_s8 + $0x2e0] sm:$0xff] }
 0x736   : > { %2610 = vmatmul.msk.f32.vlgmr.msrb.gmra.mxu3 %vm506_vm0, %v4032_v8 }
 0x73e   : > { %2611 = vmatmul.msk.f32.gmra.mxu3 %vm506_vm0, %v4061_v18 }
 0x769   : > { %v1266_v3 = vpop.f32.mrf.mxu3 }
 0x76a   : > { %v1272_v38 = vsub.f32 %v1266_v3, %v3655_v59  ;;  %v1822_v59 = vld [vmem:[%s4893_s8 + $0xd0] sm:$0xff] }
 0x76c   : > { %1554 = vmatmul.f32.vlgmr.msrb.gmra.mxu0 %v1272_v38  ;;  %1669 = vmatmul.f32.vlgmr.msrb.gmra.mxu1 %v1272_v38 }
 0x76d   : > { %1956 = vmatpush.msrb.mxu0 %v1826_v39  ;;  %2071 = vmatpush.msrb.mxu1 %v1827_v44 }
 0x76f   : > { %1957 = vmatpush.msrb.mxu0 %v1824_v27  ;;  %2072 = vmatpush.msrb.mxu1 %v1825_v9  ;;  %v1882_v27 = vld [vmem:[%s4893_s8 + $0x2b0] sm:$0xff]  ;;  %v1880_v9 = vld [vmem:[%s4893_s8 + $0x2a0] sm:$0xff] }
 0x771   : > { %v1269_v48 = vpop.f32.mrf.mxu3  ;;  %1958 = vmatpush.msrb.mxu0 %v1822_v59  ;;  %2073 = vmatpush.msrb.mxu1 %v1823_v45  ;;  %v1878_v59 = vld [vmem:[%s4893_s8 + $0x290] sm:$0xff]  ;;  %v1876_v45 = vld [vmem:[%s4893_s8 + $0x280] sm:$0xff] }
 0x772   : > { %v1273_v49 = vsub.f32 %v1269_v48, %v3661_v61  ;;  %v1817_v61 = vld [vmem:[%s4893_s8 + $0xa8] sm:$0xff]  ;;  %v1870_v48 = vld [vmem:[%s4893_s8 + $0x250] sm:$0xff] }
 0x773   : > { %1959 = vmatpush.msrb.mxu0 %v1820_v0  ;;  %2074 = vmatpush.msrb.mxu1 %v1821_v47  ;;  %v1874_v0 = vld [vmem:[%s4893_s8 + $0x270] sm:$0xff]  ;;  %v1872_v47 = vld [vmem:[%s4893_s8 + $0x260] sm:$0xff] }
 0x774   : > { %1557 = vmatmul.f32.gmra.mxu0 %v1273_v49  ;;  %1672 = vmatmul.f32.gmra.mxu1 %v1273_v49  ;;  %v1868_v49 = vld [vmem:[%s4893_s8 + $0x240] sm:$0xff] }
 0x775   : > { %1960 = vmatpush.msrb.mxu0 %v1818_v51  ;;  %2075 = vmatpush.msrb.mxu1 %v1819_v42  ;;  %v1866_v51 = vld [vmem:[%s4893_s8 + $0x230] sm:$0xff]  ;;  %v1864_v42 = vld [vmem:[%s4893_s8 + $0x220] sm:$0xff] }
 0x777   : > { %1961 = vmatpush.msrb.mxu0 %v1816_v43  ;;  %2076 = vmatpush.msrb.mxu1 %v1817_v61  ;;  %v1862_v43 = vld [vmem:[%s4893_s8 + $0x210] sm:$0xff]  ;;  %v1860_v61 = vld [vmem:[%s4893_s8 + $0x200] sm:$0xff] }
 0x779   : > { %1962 = vmatpush.msrb.mxu0 %v1814_v55  ;;  %2077 = vmatpush.msrb.mxu1 %v1815_v56  ;;  %v1859_v55 = vld [vmem:[%s4893_s8 + $0x1f8] sm:$0xff]  ;;  %v1857_v56 = vld [vmem:[%s4893_s8 + $0x1e8] sm:$0xff] }
 0x77b   : > { %1963 = vmatpush.msrb.mxu0 %v1812_v57  ;;  %2078 = vmatpush.msrb.mxu1 %v1813_v53  ;;  %v1855_v57 = vld [vmem:[%s4893_s8 + $0x1d8] sm:$0xff] }
 0x77c   : > { %1646 = vmatmul.f32.vlgmr.msra.gmra.mxu0 %v3786_v41  ;;  %1995 = vmatmul.f32.vlgmr.msra.gmra.mxu1 %v3971_v31  ;;  %v1807_v41 = vld [vmem:[%s4893_s8 + $0x58] sm:$0xff] }
 0x77d   : > { %1964 = vmatpush.msrb.mxu0 %v1810_v54  ;;  %2079 = vmatpush.msrb.mxu1 %v1811_v60  ;;  %v4305_v54 = vld [vmem:[%s4894_s9] sm:$0xf]  ;;  %v1853_v60 = vld [vmem:[%s4893_s8 + $0x1c8] sm:$0xff] }
 0x77e   : > { %v2189_v30 = vperm.slane %v4305_v54, 1 }
 0x77f   : > { %1965 = vmatpush.msrb.mxu0 %v1808_v63  ;;  %2080 = vmatpush.msrb.mxu1 %v1809_v4 }
 0x781   : > { %1966 = vmatpush.msrb.mxu0 %v1806_v5  ;;  %2081 = vmatpush.msrb.mxu1 %v1807_v41  ;;  %v2188_v5 = vperm.slane %v4305_v54, 0  ;;  %v1851_v41 = vld [vmem:[%s4893_s8 + $0x1b8] sm:$0xff] }
 0x783   : > { %1967 = vmatpush.msrb.mxu0 %v1804_v10  ;;  %2082 = vmatpush.msrb.mxu1 %v1805_v11  ;;  %v1847_v11 = vld [vmem:[%s4893_s8 + $0x198] sm:$0xff] }
 0x784   : > { %1649 = vmatmul.f32.gmra.mxu0 %v3783_v1  ;;  %1998 = vmatmul.f32.gmra.mxu1 %v3963_v25  ;;  %v1799_v1 = vld [vmem:[%s4893_s8 + $0x18] sm:$0xff] }
 0x785   : > { %1968 = vmatpush.msrb.mxu0 %v1802_v13  ;;  %2083 = vmatpush.msrb.mxu1 %v1803_v14  ;;  %v1845_v14 = vld [vmem:[%s4893_s8 + $0x188] sm:$0xff] }
 0x787   : > { %1969 = vmatpush.msrb.mxu0 %v1800_v16  ;;  %2084 = vmatpush.msrb.mxu1 %v1801_v17  ;;  %v1843_v17 = vld [vmem:[%s4893_s8 + $0x178] sm:$0xff] }
 0x789   : > { %v1532_v24 = vpop.f32.mrf.mxu3  ;;  %1970 = vmatpush.msrb.mxu0 %v1798_v20  ;;  %2085 = vmatpush.msrb.mxu1 %v1799_v1 }
 0x78a   : > { %v4217_v40 = vadd.f32 %v1532_v24, %v1510_v21  ;;  %v1841_v21 = vld [vmem:[%s4893_s8 + $0x168] sm:$0xff]  ;;  %v1839_v24 = vld [vmem:[%s4893_s8 + $0x158] sm:$0xff] }
 0x78b   : > { %1971 = vmatpush.msrb.mxu0 %v1796_v23  ;;  %2086 = vmatpush.msrb.mxu1 %v1797_v37 }
 0x78c   : > { %1972 = vmatmul.f32.vlgmr.msrb.gmra.mxu0 %v3539_v19  ;;  %2087 = vmatmul.f32.vlgmr.msrb.gmra.mxu1 %v3539_v19 }
 0x791   : > { %v1535_v28 = vpop.f32.mrf.mxu3 }
 0x792   : > { %v4222_v29 = vadd.f32 %v1535_v28, %v1513_v46  ;;  %v1837_v46 = vld [vmem:[%s4893_s8 + $0x148] sm:$0xff]  ;;  %v1835_v28 = vld [vmem:[%s4893_s8 + $0x138] sm:$0xff] }
 0x794   : > { %1975 = vmatmul.f32.gmra.mxu0 %v3535_v22  ;;  %2090 = vmatmul.f32.gmra.mxu1 %v3535_v22 }
 0x796   : > { %v4310_v63 = vpop.permute.xlu1 %2216 }
 0x79e   : > { %v4331_v20 = vpop.permute.xlu1 %2221 }
 0x7a9   : > { %v1624_v33 = vpop.f32.mrf.mxu3 }
 0x7aa   : > { %v4227_v2 = vadd.f32 %v1624_v33, %v1602_v32  ;;  %v1833_v32 = vld [vmem:[%s4893_s8 + $0x128] sm:$0xff]  ;;  %v1831_v33 = vld [vmem:[%s4893_s8 + $0x118] sm:$0xff] }
 0x7b1   : > { %v1627_v36 = vpop.f32.mrf.mxu3 }
 0x7b2   : > { %v4230_v3 = vadd.f32 %v1627_v36, %v1605_v35 }
 0x7b9   : > { %v1722_v52 = vpop.f32.mrf.mxu3 }
 0x7ba   : > { %v4236_v44 = vsub.f32 %v1722_v52, %v3539_v19  ;;  %v1884_v19 = vld [vmem:[%s4893_s8 + $0x2c0] sm:$0xff]  ;;  %v1829_v52 = vld [vmem:[%s4893_s8 + $0x108] sm:$0xff] }
 0x7c1   : > { %v1725_v38 = vpop.f32.mrf.mxu3 }
 0x7c2   : > { %v4233_v39 = vsub.f32 %v1725_v38, %v3535_v22  ;;  %v1886_v22 = vld [vmem:[%s4893_s8 + $0x2d0] sm:$0xff] }
 0x7c4   : > { %1746 = vmatpush.msrb.mxu2 %v4233_v39 }
 0x7c6   : > { %1747 = vmatpush.msrb.mxu2 %v4236_v44 }
 0x7c7   : > { %2612 = vmatmul.msk.f32.vlgmr.msrb.gmra.mxu2 %vm506_vm0, %v4032_v8 }
 0x7c8   : > { %2002 = vmatpush.msra.mxu2 %v1890_v58  ;;  %v2275_v58 = vld [vmem:[%s4895_s10 + $0x78] sm:$0xff] }
 0x7ca   : > { %2003 = vmatpush.msra.mxu2 %v1888_v6 }
 0x7cc   : > { %2004 = vmatpush.msra.mxu2 %v1886_v22 }
 0x7ce   : > { %2005 = vmatpush.msra.mxu2 %v1884_v19 }
 0x7cf   : > { %2613 = vmatmul.msk.f32.gmra.mxu2 %vm506_vm0, %v4061_v18 }
 0x7d0   : > { %2006 = vmatpush.msra.mxu2 %v1882_v27  ;;  %v2273_v27 = vld [vmem:[%s4895_s10 + $0x68] sm:$0xff] }
 0x7d2   : > { %2007 = vmatpush.msra.mxu2 %v1880_v9 }
 0x7d4   : > { %2008 = vmatpush.msra.mxu2 %v1878_v59 }
 0x7d6   : > { %2009 = vmatpush.msra.mxu2 %v1876_v45  ;;  %v2272_v45 = vld [vmem:[%s4895_s10 + $0x60] sm:$0xff] }
 0x7d8   : > { %2010 = vmatpush.msra.mxu2 %v1874_v0 }
 0x7da   : > { %2011 = vmatpush.msra.mxu2 %v1872_v47  ;;  %v2271_v47 = vld [vmem:[%s4895_s10 + $0x58] sm:$0xff] }
 0x7dc   : > { %2012 = vmatpush.msra.mxu2 %v1870_v48  ;;  %v2270_v48 = vld [vmem:[%s4895_s10 + $0x50] sm:$0xff] }
 0x7de   : > { %2013 = vmatpush.msra.mxu2 %v1868_v49 }
 0x7e0   : > { %2014 = vmatpush.msra.mxu2 %v1866_v51  ;;  %v2269_v51 = vld [vmem:[%s4895_s10 + $0x48] sm:$0xff] }
 0x7e2   : > { %2015 = vmatpush.msra.mxu2 %v1864_v42  ;;  %v2268_v42 = vld [vmem:[%s4895_s10 + $0x40] sm:$0xff] }
 0x7e4   : > { %2016 = vmatpush.msra.mxu2 %v1862_v43 }
 0x7e6   : > { %2017 = vmatpush.msra.mxu2 %v1860_v61  ;;  %v2267_v61 = vld [vmem:[%s4895_s10 + $0x38] sm:$0xff] }
 0x7e7   : > { %2018 = vmatmul.f32.vlgmr.msra.gmra.mxu2 %v4236_v44 }
 0x7e8   : > { %2094 = vmatpush.msrb.mxu2 %v1859_v55  ;;  %v2266_v55 = vld [vmem:[%s4895_s10 + $0x30] sm:$0xff] }
 0x7e9   : > { %v1555_v53 = vpop.f32.mrf.mxu0  ;;  %v1670_v62 = vpop.f32.mrf.mxu1 }
 0x7ea   : > { %2095 = vmatpush.msrb.mxu2 %v1857_v56  ;;  %v1556_v4 = vadd.f32 %v1555_v53, %v4217_v40  ;;  %v2264_v53 = vld [vmem:[%s4895_s10 + $0x20] sm:$0xff] }
 0x7ec   : > { %2096 = vmatpush.msrb.mxu2 %v1855_v57  ;;  %v2196_v10 = vadd.f32 %v2188_v5, %v1556_v4  ;;  %v2265_v57 = vld [vmem:[%s4895_s10 + $0x28] sm:$0xff]  ;;  %v2263_v4 = vld [vmem:[%s4895_s10 + $0x18] sm:$0xff] }
 0x7ee   : > { %2097 = vmatpush.msrb.mxu2 %v1853_v60  ;;  %v2204_v15 = vmax.f32 %v2196_v10, 0.0  ;;  %v2260_v10 = vld [vmem:[%s4895_s10] sm:$0xff] }
 0x7ef   : > { %2021 = vmatmul.f32.gmra.mxu2 %v4233_v39 }
 0x7f0   : > { %2098 = vmatpush.msrb.mxu2 %v1851_v41  ;;  %v2224_v23 = vmul.f32 %v4310_v63, %v2204_v15 }
 0x7f1   : > { %v1558_v12 = vpop.f32.mrf.mxu0  ;;  %v1673_v36 = vpop.f32.mrf.mxu1 }
 0x7f2   : > { %2099 = vmatpush.msrb.mxu2 %v1849_v7  ;;  %v1559_v13 = vadd.f32 %v1558_v12, %v4222_v29  ;;  %v2261_v7 = vld [vmem:[%s4895_s10 + $0x8] sm:$0xff] }
 0x7f4   : > { %2100 = vmatpush.msrb.mxu2 %v1847_v11  ;;  %v2200_v16 = vadd.f32 %v2188_v5, %v1559_v13  ;;  %v2262_v5 = vld [vmem:[%s4895_s10 + $0x10] sm:$0xff] }
 0x7f6   : > { %v2208_v1 = vmax.f32 %v2200_v16, 0.0  ;;  %2101 = vmatpush.msrb.mxu2 %v1845_v14  ;;  %v1922_v16 = vld [vmem:[%s4893_s8 + $0x3f0] sm:$0xff] }
 0x7f8   : > { %2102 = vmatpush.msrb.mxu2 %v1843_v17  ;;  %v2228_v37 = vmul.f32 %v4331_v20, %v2208_v1  ;;  %v1920_v17 = vld [vmem:[%s4893_s8 + $0x3e0] sm:$0xff]  ;;  %v1914_v1 = vld [vmem:[%s4893_s8 + $0x3b0] sm:$0xff] }
 0x7f9   : > { %v1647_v40 = vpop.f32.mrf.mxu0 }
 0x7fa   : > { %2103 = vmatpush.msrb.mxu2 %v1841_v21  ;;  %v2232_v50 = vadd.f32 %v2228_v37, %v2224_v23  ;;  %v1648_v26 = vadd.f32 %v1647_v40, %v4227_v2  ;;  %v1910_v21 = vld [vmem:[%s4893_s8 + $0x390] sm:$0xff]  ;;  %v1908_v23 = vld [vmem:[%s4893_s8 + $0x380] sm:$0xff] }
 0x7fb   : > { %v1906_v37 = vld [vmem:[%s4893_s8 + $0x370] sm:$0xff] }
 0x7fc   : > { %2104 = vmatpush.msrb.mxu2 %v1839_v24  ;;  %v1671_v29 = vadd.f32 %v1670_v62, %v1648_v26  ;;  %v2233_v49 = vrot.slane %v2232_v50, 4  ;;  %v1902_v62 = vld [vmem:[%s4893_s8 + $0x350] sm:$0xff]  ;;  %v1900_v24 = vld [vmem:[%s4893_s8 + $0x340] sm:$0xff] }
 0x7fd   : > { %v1898_v40 = vld [vmem:[%s4893_s8 + $0x330] sm:$0xff] }
 0x7fe   : > { %2105 = vmatpush.msrb.mxu2 %v1837_v46  ;;  %v2197_v34 = vadd.f32 %v2189_v30, %v1671_v29  ;;  %v2234_v43 = vadd.f32 %v2233_v49, %v2232_v50  ;;  %v1896_v50 = vld [vmem:[%s4893_s8 + $0x320] sm:$0xff]  ;;  %v1894_v26 = vld [vmem:[%s4893_s8 + $0x310] sm:$0xff]  ;;  %v1889_v29 = vld [vmem:[%s4893_s8 + $0x2e8] sm:$0xff] }
 0x7ff   : > { %v1892_v46 = vld [vmem:[%s4893_s8 + $0x300] sm:$0xff]  ;;  %v1946_v49 = vld [vmem:[%s4893_s8 + $0x4b0] sm:$0xff] }
 0x800   : > { %2106 = vmatpush.msrb.mxu2 %v1835_v28  ;;  %v2205_v6 = vmax.f32 %v2197_v34, 0.0  ;;  %v2235_v56 = vrot.slane %v2234_v43, 2  ;;  %v1891_v28 = vld [vmem:[%s4893_s8 + $0x2f8] sm:$0xff] }
 0x801   : > { %v1650_v2 = vpop.f32.mrf.mxu0  ;;  %v1879_v34 = vld [vmem:[%s4893_s8 + $0x298] sm:$0xff] }
 0x802   : > { %2107 = vmatpush.msrb.mxu2 %v1833_v32  ;;  %v1651_v35 = vadd.f32 %v1650_v2, %v4230_v3  ;;  %v2274_v3 = vld [vmem:[%s4895_s10 + $0x70] sm:$0xff]  ;;  %v2225_v9 = vmul.f32 %v4310_v63, %v2205_v6  ;;  %v2236_v60 = vadd.f32 %v2235_v56, %v2234_v43  ;;  %v1885_v32 = vld [vmem:[%s4893_s8 + $0x2c8] sm:$0xff]  ;;  %v1867_v6 = vld [vmem:[%s4893_s8 + $0x238] sm:$0xff] }
 0x803   : > { %v1881_v2 = vld [vmem:[%s4893_s8 + $0x2a8] sm:$0xff]  ;;  %v1944_v43 = vld [vmem:[%s4893_s8 + $0x4a0] sm:$0xff] }
 0x804   : > { %2108 = vmatpush.msrb.mxu2 %v1831_v33  ;;  %v1674_v38 = vadd.f32 %v1673_v36, %v1651_v35  ;;  %v2237_v41 = vrot.slane %v2236_v60, 1  ;;  %v1883_v33 = vld [vmem:[%s4893_s8 + $0x2b8] sm:$0xff]  ;;  %v1877_v35 = vld [vmem:[%s4893_s8 + $0x288] sm:$0xff]  ;;  %v2288_v56 = vld [vmem:[%s4895_s10 + $0xe0] sm:$0xff] }
 0x805   : > { %v1875_v36 = vld [vmem:[%s4893_s8 + $0x278] sm:$0xff] }
 0x806   : > { %v2201_v22 = vadd.f32 %v2189_v30, %v1674_v38  ;;  %2109 = vmatpush.msrb.mxu2 %v1829_v52  ;;  %v2238_v11 = vadd.f32 %v2237_v41, %v2236_v60  ;;  %v1887_v30 = vld [vmem:[%s4893_s8 + $0x2d8] sm:$0xff]  ;;  %v1873_v52 = vld [vmem:[%s4893_s8 + $0x268] sm:$0xff]  ;;  %v2286_v41 = vld [vmem:[%s4895_s10 + $0xd0] sm:$0xff] }
 0x807   : > { %2110 = vmatmul.f32.vlgmr.msrb.gmra.mxu2 %v3971_v31  ;;  %v1871_v38 = vld [vmem:[%s4893_s8 + $0x258] sm:$0xff] }
 0x808   : > { %v2209_v19 = vmax.f32 %v2201_v22, 0.0  ;;  %2325 = vmatpush.msra.mxu2 %v2275_v58  ;;  %v1869_v58 = vld [vmem:[%s4893_s8 + $0x248] sm:$0xff]  ;;  %v2287_v60 = vld [vmem:[%s4895_s10 + $0xd8] sm:$0xff] }
 0x809   : > { %v1865_v22 = vld [vmem:[%s4893_s8 + $0x228] sm:$0xff] }
 0x80a   : > { %v2229_v59 = vmul.f32 %v4331_v20, %v2209_v19  ;;  %2326 = vmatpush.msra.mxu2 %v2274_v3  ;;  %v1954_v3 = vld [vmem:[%s4893_s8 + $0x4f0] sm:$0xff]  ;;  %v1863_v19 = vld [vmem:[%s4893_s8 + $0x218] sm:$0xff] }
 0x80b   : > { %2048 = vmatpush.msra.mxu0 %v1954_v3 }
 0x80c   : > { %v4374_v0 = vadd.f32 %v2229_v59, %v2225_v9  ;;  %2327 = vmatpush.msra.mxu2 %v2273_v27  ;;  %v1952_v27 = vld [vmem:[%s4893_s8 + $0x4e0] sm:$0xff]  ;;  %v1861_v9 = vld [vmem:[%s4893_s8 + $0x208] sm:$0xff]  ;;  %v1950_v59 = vld [vmem:[%s4893_s8 + $0x4d0] sm:$0xff] }
 0x80d   : > { %2049 = vmatpush.msra.mxu0 %v1952_v27  ;;  %v1913_v27 = vld [vmem:[%s4893_s8 + $0x3a8] sm:$0xff] }
 0x80e   : > { %2328 = vmatpush.msra.mxu2 %v2272_v45  ;;  %v2291_v45 = vld [vmem:[%s4895_s10 + $0xf8] sm:$0xff] }
 0x80f   : > { %2113 = vmatmul.f32.gmra.mxu2 %v3963_v25  ;;  %2050 = vmatpush.msra.mxu0 %v1950_v59  ;;  %v1927_v59 = vld [vmem:[%s4893_s8 + $0x418] sm:$0xff] }
 0x810   : > { %2329 = vmatpush.msra.mxu2 %v2271_v47  ;;  %v2290_v47 = vld [vmem:[%s4895_s10 + $0xf0] sm:$0xff] }
 0x812   : > { %2330 = vmatpush.msra.mxu2 %v2270_v48  ;;  %v1948_v48 = vld [vmem:[%s4893_s8 + $0x4c0] sm:$0xff] }
 0x813   : > { %2051 = vmatpush.msra.mxu0 %v1948_v48  ;;  %v1907_v48 = vld [vmem:[%s4893_s8 + $0x378] sm:$0xff] }
 0x814   : > { %2331 = vmatpush.msra.mxu2 %v2269_v51  ;;  %v1955_v51 = vld [vmem:[%s4893_s8 + $0x4f8] sm:$0xff] }
 0x815   : > { %2163 = vmatpush.msra.mxu1 %v1955_v51  ;;  %2052 = vmatpush.msra.mxu0 %v1946_v49  ;;  %v1905_v49 = vld [vmem:[%s4893_s8 + $0x368] sm:$0xff]  ;;  %v1903_v51 = vld [vmem:[%s4893_s8 + $0x358] sm:$0xff] }
 0x816   : > { %2332 = vmatpush.msra.mxu2 %v2268_v42  ;;  %v2289_v42 = vld [vmem:[%s4895_s10 + $0xe8] sm:$0xff] }
 0x817   : > { %2053 = vmatpush.msra.mxu0 %v1944_v43  ;;  %v1899_v43 = vld [vmem:[%s4893_s8 + $0x338] sm:$0xff] }
 0x818   : > { %2333 = vmatpush.msra.mxu2 %v2267_v61  ;;  %v1953_v61 = vld [vmem:[%s4893_s8 + $0x4e8] sm:$0xff] }
 0x819   : > { %2164 = vmatpush.msra.mxu1 %v1953_v61  ;;  %v1897_v61 = vld [vmem:[%s4893_s8 + $0x328] sm:$0xff] }
 0x81a   : > { %2334 = vmatpush.msra.mxu2 %v2266_v55  ;;  %v1951_v55 = vld [vmem:[%s4893_s8 + $0x4d8] sm:$0xff] }
 0x81b   : > { %2165 = vmatpush.msra.mxu1 %v1951_v55  ;;  %v1895_v55 = vld [vmem:[%s4893_s8 + $0x318] sm:$0xff] }
 0x81c   : > { %2335 = vmatpush.msra.mxu2 %v2265_v57  ;;  %v1942_v57 = vld [vmem:[%s4893_s8 + $0x490] sm:$0xff] }
 0x81d   : > { %2054 = vmatpush.msra.mxu0 %v1942_v57 }
 0x81e   : > { %2336 = vmatpush.msra.mxu2 %v2264_v53  ;;  %v1949_v53 = vld [vmem:[%s4893_s8 + $0x4c8] sm:$0xff] }
 0x81f   : > { %2166 = vmatpush.msra.mxu1 %v1949_v53 }
 0x820   : > { %2337 = vmatpush.msra.mxu2 %v2263_v4  ;;  %v1940_v4 = vld [vmem:[%s4893_s8 + $0x480] sm:$0xff] }
 0x821   : > { %2055 = vmatpush.msra.mxu0 %v1940_v4 }
 0x822   : > { %2338 = vmatpush.msra.mxu2 %v2262_v5  ;;  %v1947_v5 = vld [vmem:[%s4893_s8 + $0x4b8] sm:$0xff] }
 0x823   : > { %2167 = vmatpush.msra.mxu1 %v1947_v5  ;;  %v2307_v5 = vld [vmem:[%s4895_s10 + $0x178] sm:$0xff] }
 0x824   : > { %2339 = vmatpush.msra.mxu2 %v2261_v7  ;;  %v1938_v7 = vld [vmem:[%s4893_s8 + $0x470] sm:$0xff] }
 0x825   : > { %2056 = vmatpush.msra.mxu0 %v1938_v7  ;;  %v2302_v7 = vld [vmem:[%s4895_s10 + $0x150] sm:$0xff] }
 0x826   : > { %2340 = vmatpush.msra.mxu2 %v2260_v10  ;;  %v1945_v10 = vld [vmem:[%s4893_s8 + $0x4a8] sm:$0xff] }
 0x827   : > { %2341 = vmatmul.f32.vlgmr.msra.gmra.mxu2 %v2238_v11  ;;  %v2240_v11 = vrot.slane %v4374_v0, 4  ;;  %2168 = vmatpush.msra.mxu1 %v1945_v10  ;;  %v1973_v10 = vpop.f32.mrf.mxu0 }
 0x84a   : > { %v1749_v12 = vpop.f32.mrf.mxu2 }
 0x84b   : > { %v4417_v15 = vsub.f32 %v1749_v12, %v3971_v31  ;;  %v1916_v31 = vld [vmem:[%s4893_s8 + $0x3c0] sm:$0xff]  ;;  %v2285_v12 = vld [vmem:[%s4895_s10 + $0xc8] sm:$0xff] }
 0x852   : > { %v1752_v13 = vpop.f32.mrf.mxu2 }
 0x853   : > { %v4414_v14 = vsub.f32 %v1752_v13, %v3963_v25  ;;  %v1918_v25 = vld [vmem:[%s4893_s8 + $0x3d0] sm:$0xff]  ;;  %v1936_v13 = vld [vmem:[%s4893_s8 + $0x460] sm:$0xff] }
 0x854   : > { %2057 = vmatpush.msra.mxu0 %v1936_v13  ;;  %v2299_v13 = vld [vmem:[%s4895_s10 + $0x138] sm:$0xff] }
 0x855   : > { %1773 = vmatpush.msra.mxu3 %v4414_v14 }
 0x857   : > { %1774 = vmatpush.msra.mxu3 %v4417_v15 }
 0x858   : > { %2614 = vmatmul.msk.f32.vlgmr.msra.gmra.mxu3 %vm506_vm0, %v4032_v8  ;;  %v1912_v8 = vld [vmem:[%s4893_s8 + $0x3a0] sm:$0xff] }
 0x859   : > { %2025 = vmatpush.msrb.mxu3 %v1922_v16  ;;  %v1943_v16 = vld [vmem:[%s4893_s8 + $0x498] sm:$0xff] }
 0x85a   : > { %2169 = vmatpush.msra.mxu1 %v1943_v16 }
 0x85b   : > { %2026 = vmatpush.msrb.mxu3 %v1920_v17  ;;  %v2284_v17 = vld [vmem:[%s4895_s10 + $0xc0] sm:$0xff] }
 0x85d   : > { %2027 = vmatpush.msrb.mxu3 %v1918_v25  ;;  %v1934_v25 = vld [vmem:[%s4893_s8 + $0x450] sm:$0xff] }
 0x85e   : > { %2058 = vmatpush.msra.mxu0 %v1934_v25  ;;  %v2323_v25 = vld [vmem:[%s4895_s10 + $0x1f8] sm:$0xff] }
 0x85f   : > { %2028 = vmatpush.msrb.mxu3 %v1916_v31  ;;  %v1941_v31 = vld [vmem:[%s4893_s8 + $0x488] sm:$0xff] }
 0x860   : > { %2615 = vmatmul.msk.f32.gmra.mxu3 %vm506_vm0, %v4061_v18  ;;  %v1904_v18 = vld [vmem:[%s4893_s8 + $0x360] sm:$0xff]  ;;  %2170 = vmatpush.msra.mxu1 %v1941_v31 }
 0x861   : > { %2029 = vmatpush.msrb.mxu3 %v1914_v1  ;;  %v2241_v1 = vadd.f32 %v2240_v11, %v4374_v0  ;;  %v1930_v0 = vld [vmem:[%s4893_s8 + $0x430] sm:$0xff]  ;;  %v2301_v11 = vld [vmem:[%s4895_s10 + $0x148] sm:$0xff] }
 0x863   : > { %2030 = vmatpush.msrb.mxu3 %v1912_v8  ;;  %v2283_v8 = vld [vmem:[%s4895_s10 + $0xb8] sm:$0xff] }
 0x865   : > { %2031 = vmatpush.msrb.mxu3 %v1910_v21  ;;  %v1932_v21 = vld [vmem:[%s4893_s8 + $0x440] sm:$0xff] }
 0x866   : > { %2059 = vmatpush.msra.mxu0 %v1932_v21  ;;  %v1976_v21 = vpop.f32.mrf.mxu0 }
 0x867   : > { %2032 = vmatpush.msrb.mxu3 %v1908_v23  ;;  %v1939_v23 = vld [vmem:[%s4893_s8 + $0x478] sm:$0xff] }
 0x868   : > { %2171 = vmatpush.msra.mxu1 %v1939_v23  ;;  %2060 = vmatpush.msra.mxu0 %v1930_v0  ;;  %v2321_v0 = vld [vmem:[%s4895_s10 + $0x1e8] sm:$0xff] }
 0x869   : > { %2033 = vmatpush.msrb.mxu3 %v1906_v37  ;;  %v2282_v37 = vld [vmem:[%s4895_s10 + $0xb0] sm:$0xff] }
 0x86a   : > { %v2019_v31 = vpop.f32.mrf.mxu2 }
 0x86b   : > { %2034 = vmatpush.msrb.mxu3 %v1904_v18  ;;  %v1937_v18 = vld [vmem:[%s4893_s8 + $0x468] sm:$0xff] }
 0x86c   : > { %2172 = vmatpush.msra.mxu1 %v1937_v18  ;;  %v2295_v18 = vld [vmem:[%s4895_s10 + $0x118] sm:$0xff] }
 0x86d   : > { %2035 = vmatpush.msrb.mxu3 %v1902_v62  ;;  %v2242_v62 = vrot.slane %v2241_v1, 2 }
 0x86f   : > { %2036 = vmatpush.msrb.mxu3 %v1900_v24  ;;  %v2281_v24 = vld [vmem:[%s4895_s10 + $0xa8] sm:$0xff] }
 0x871   : > { %2037 = vmatpush.msrb.mxu3 %v1898_v40  ;;  %v1928_v40 = vld [vmem:[%s4893_s8 + $0x420] sm:$0xff] }
 0x872   : > { %2061 = vmatpush.msra.mxu0 %v1928_v40  ;;  %v2319_v40 = vld [vmem:[%s4895_s10 + $0x1d8] sm:$0xff] }
 0x873   : > { %2038 = vmatpush.msrb.mxu3 %v1896_v50  ;;  %v1935_v50 = vld [vmem:[%s4893_s8 + $0x458] sm:$0xff] }
 0x874   : > { %2173 = vmatpush.msra.mxu1 %v1935_v50 }
 0x875   : > { %2039 = vmatpush.msrb.mxu3 %v1894_v26  ;;  %v2280_v26 = vld [vmem:[%s4895_s10 + $0xa0] sm:$0xff] }
 0x877   : > { %2040 = vmatpush.msrb.mxu3 %v1892_v46  ;;  %v1926_v46 = vld [vmem:[%s4893_s8 + $0x410] sm:$0xff] }
 0x878   : > { %2041 = vmatmul.f32.vlgmr.msrb.gmra.mxu3 %v4417_v15  ;;  %2062 = vmatpush.msra.mxu0 %v1926_v46  ;;  %v2293_v46 = vld [vmem:[%s4895_s10 + $0x108] sm:$0xff] }
 0x879   : > { %2117 = vmatpush.msra.mxu3 %v1891_v28  ;;  %v1933_v28 = vld [vmem:[%s4893_s8 + $0x448] sm:$0xff] }
 0x87a   : > { %2174 = vmatpush.msra.mxu1 %v1933_v28  ;;  %v2318_v28 = vld [vmem:[%s4895_s10 + $0x1d0] sm:$0xff] }
 0x87b   : > { %2118 = vmatpush.msra.mxu3 %v1889_v29  ;;  %v2243_v29 = vadd.f32 %v2242_v62, %v2241_v1  ;;  %v2297_v1 = vld [vmem:[%s4895_s10 + $0x128] sm:$0xff]  ;;  %v2320_v62 = vld [vmem:[%s4895_s10 + $0x1e0] sm:$0xff] }
 0x87d   : > { %2119 = vmatpush.msra.mxu3 %v1887_v30  ;;  %v2279_v30 = vld [vmem:[%s4895_s10 + $0x98] sm:$0xff] }
 0x87f   : > { %2120 = vmatpush.msra.mxu3 %v1885_v32  ;;  %v1924_v32 = vld [vmem:[%s4893_s8 + $0x400] sm:$0xff] }
 0x880   : > { %2044 = vmatmul.f32.gmra.mxu3 %v4414_v14  ;;  %2063 = vmatpush.msra.mxu0 %v1924_v32 }
 0x881   : > { %2121 = vmatpush.msra.mxu3 %v1883_v33  ;;  %v1923_v33 = vld [vmem:[%s4893_s8 + $0x3f8] sm:$0xff] }
 0x882   : > { %2140 = vmatpush.msrb.mxu0 %v1923_v33  ;;  %v2292_v33 = vld [vmem:[%s4895_s10 + $0x100] sm:$0xff] }
 0x883   : > { %2122 = vmatpush.msra.mxu3 %v1881_v2  ;;  %v1931_v2 = vld [vmem:[%s4893_s8 + $0x438] sm:$0xff] }
 0x884   : > { %2175 = vmatpush.msra.mxu1 %v1931_v2  ;;  %v2317_v2 = vld [vmem:[%s4895_s10 + $0x1c8] sm:$0xff] }
 0x885   : > { %2123 = vmatpush.msra.mxu3 %v1879_v34  ;;  %v2278_v34 = vld [vmem:[%s4895_s10 + $0x90] sm:$0xff] }
 0x887   : > { %2124 = vmatpush.msra.mxu3 %v1877_v35  ;;  %v1921_v35 = vld [vmem:[%s4893_s8 + $0x3e8] sm:$0xff] }
 0x888   : > { %2141 = vmatpush.msrb.mxu0 %v1921_v35 }
 0x889   : > { %2125 = vmatpush.msra.mxu3 %v1875_v36  ;;  %v1929_v36 = vld [vmem:[%s4893_s8 + $0x428] sm:$0xff] }
 0x88a   : > { %2176 = vmatpush.msra.mxu1 %v1929_v36  ;;  %v2316_v36 = vld [vmem:[%s4895_s10 + $0x1c0] sm:$0xff] }
 0x88b   : > { %2126 = vmatpush.msra.mxu3 %v1873_v52  ;;  %v2277_v52 = vld [vmem:[%s4895_s10 + $0x88] sm:$0xff] }
 0x88c   : > { %2177 = vmatpush.msra.mxu1 %v1927_v59  ;;  %v2313_v59 = vld [vmem:[%s4895_s10 + $0x1a8] sm:$0xff] }
 0x88d   : > { %2127 = vmatpush.msra.mxu3 %v1871_v38  ;;  %v2244_v38 = vrot.slane %v2243_v29, 1 }
 0x88f   : > { %2128 = vmatpush.msra.mxu3 %v1869_v58  ;;  %v1919_v58 = vld [vmem:[%s4893_s8 + $0x3d8] sm:$0xff]  ;;  %v2245_v3 = vadd.f32 %v2244_v38, %v2243_v29 }
 0x890   : > { %2142 = vmatpush.msrb.mxu0 %v1919_v58  ;;  %v2190_v58 = vperm.slane %v4305_v54, 2 }
 0x891   : > { %2129 = vmatpush.msra.mxu3 %v1867_v6  ;;  %v2276_v6 = vld [vmem:[%s4895_s10 + $0x80] sm:$0xff] }
 0x893   : > { %2130 = vmatpush.msra.mxu3 %v1865_v22  ;;  %v1917_v22 = vld [vmem:[%s4893_s8 + $0x3c8] sm:$0xff] }
 0x894   : > { %2143 = vmatpush.msrb.mxu0 %v1917_v22 }
 0x895   : > { %2131 = vmatpush.msra.mxu3 %v1863_v19  ;;  %v1915_v19 = vld [vmem:[%s4893_s8 + $0x3b8] sm:$0xff] }
 0x896   : > { %2144 = vmatpush.msrb.mxu0 %v1915_v19 }
 0x897   : > { %2132 = vmatpush.msra.mxu3 %v1861_v9  ;;  %v1911_v9 = vld [vmem:[%s4893_s8 + $0x398] sm:$0xff] }
 0x898   : > { %2133 = vmatmul.f32.vlgmr.msra.gmra.mxu3 %v4236_v44  ;;  %2145 = vmatpush.msrb.mxu0 %v1913_v27 }
 0x899   : > { %2345 = vmatpush.msrb.mxu3 %v2291_v45  ;;  %v1909_v45 = vld [vmem:[%s4893_s8 + $0x388] sm:$0xff] }
 0x89a   : > { %2146 = vmatpush.msrb.mxu0 %v1911_v9 }
 0x89b   : > { %2346 = vmatpush.msrb.mxu3 %v2290_v47  ;;  %v1925_v47 = vld [vmem:[%s4893_s8 + $0x408] sm:$0xff] }
 0x89c   : > { %2178 = vmatpush.msra.mxu1 %v1925_v47  ;;  %2147 = vmatpush.msrb.mxu0 %v1909_v45 }
 0x89d   : > { %2347 = vmatpush.msrb.mxu3 %v2289_v42  ;;  %v1901_v42 = vld [vmem:[%s4893_s8 + $0x348] sm:$0xff] }
 0x89e   : > { %2148 = vmatpush.msrb.mxu0 %v1907_v48  ;;  %2385 = vmatpush.msrb.mxu1 %v2323_v25  ;;  %v2312_v48 = vld [vmem:[%s4895_s10 + $0x1a0] sm:$0xff] }
 0x89f   : > { %2348 = vmatpush.msrb.mxu3 %v2288_v56  ;;  %v1893_v56 = vld [vmem:[%s4893_s8 + $0x308] sm:$0xff] }
 0x8a0   : > { %2136 = vmatmul.f32.gmra.mxu3 %v4233_v39  ;;  %2149 = vmatpush.msrb.mxu0 %v1905_v49 }
 0x8a1   : > { %2349 = vmatpush.msrb.mxu3 %v2287_v60 }
 0x8a2   : > { %2150 = vmatpush.msrb.mxu0 %v1903_v51 }
 0x8a3   : > { %2350 = vmatpush.msrb.mxu3 %v2286_v41  ;;  %v2303_v41 = vld [vmem:[%s4895_s10 + $0x158] sm:$0xff] }
 0x8a4   : > { %2151 = vmatpush.msrb.mxu0 %v1901_v42  ;;  %v2311_v42 = vld [vmem:[%s4895_s10 + $0x198] sm:$0xff] }
 0x8a5   : > { %2351 = vmatpush.msrb.mxu3 %v2285_v12  ;;  %v2300_v12 = vld [vmem:[%s4895_s10 + $0x140] sm:$0xff] }
 0x8a6   : > { %2152 = vmatpush.msrb.mxu0 %v1899_v43 }
 0x8a7   : > { %2352 = vmatpush.msrb.mxu3 %v2284_v17  ;;  %v2298_v17 = vld [vmem:[%s4895_s10 + $0x130] sm:$0xff] }
 0x8a8   : > { %2153 = vmatpush.msrb.mxu0 %v1897_v61 }
 0x8a9   : > { %2353 = vmatpush.msrb.mxu3 %v2283_v8  ;;  %v2322_v8 = vld [vmem:[%s4895_s10 + $0x1f0] sm:$0xff] }
 0x8aa   : > { %2154 = vmatpush.msrb.mxu0 %v1895_v55  ;;  %2386 = vmatpush.msrb.mxu1 %v2322_v8  ;;  %v2310_v55 = vld [vmem:[%s4895_s10 + $0x190] sm:$0xff] }
 0x8ab   : > { %2354 = vmatpush.msrb.mxu3 %v2282_v37  ;;  %v2296_v37 = vld [vmem:[%s4895_s10 + $0x120] sm:$0xff] }
 0x8ac   : > { %2155 = vmatpush.msrb.mxu0 %v1893_v56  ;;  %2387 = vmatpush.msrb.mxu1 %v2321_v0 }
 0x8ad   : > { %2355 = vmatpush.msrb.mxu3 %v2281_v24  ;;  %v2294_v24 = vld [vmem:[%s4895_s10 + $0x110] sm:$0xff] }
 0x8ae   : > { %2388 = vmatpush.msrb.mxu1 %v2320_v62 }
 0x8af   : > { %2356 = vmatpush.msrb.mxu3 %v2280_v26 }
 0x8b0   : > { %2389 = vmatpush.msrb.mxu1 %v2319_v40 }
 0x8b1   : > { %2357 = vmatpush.msrb.mxu3 %v2279_v30  ;;  %v2022_v30 = vpop.f32.mrf.mxu2 }
 0x8b2   : > { %2390 = vmatpush.msrb.mxu1 %v2318_v28 }
 0x8b3   : > { %2358 = vmatpush.msrb.mxu3 %v2278_v34 }
 0x8b4   : > { %2391 = vmatpush.msrb.mxu1 %v2317_v2 }
 0x8b5   : > { %2359 = vmatpush.msrb.mxu3 %v2277_v52 }
 0x8b6   : > { %2392 = vmatpush.msrb.mxu1 %v2316_v36 }
 0x8b7   : > { %2360 = vmatpush.msrb.mxu3 %v2276_v6  ;;  %v2315_v6 = vld [vmem:[%s4895_s10 + $0x1b8] sm:$0xff] }
 0x8b8   : > { %2361 = vmatmul.f32.vlgmr.msrb.gmra.mxu3 %v2245_v3  ;;  %2393 = vmatpush.msrb.mxu1 %v2315_v6  ;;  %v2314_v3 = vld [vmem:[%s4895_s10 + $0x1b0] sm:$0xff] }
 0x8b9   : > { %v2111_v45 = vpop.f32.mrf.mxu2 }
 0x8ba   : > { %2394 = vmatpush.msrb.mxu1 %v2314_v3 }
 0x8bc   : > { %2395 = vmatpush.msrb.mxu1 %v2313_v59 }
 0x8be   : > { %2396 = vmatpush.msrb.mxu1 %v2312_v48 }
 0x8c0   : > { %2397 = vmatpush.msrb.mxu1 %v2311_v42 }
 0x8c2   : > { %2398 = vmatpush.msrb.mxu1 %v2310_v55 }
 0x8db   : > { %v1776_v57 = vpop.f32.mrf.mxu3 }
 0x8dc   : > { %v1782_v53 = vsub.f32 %v1776_v57, %v4236_v44  ;;  %v2306_v44 = vld [vmem:[%s4895_s10 + $0x170] sm:$0xff] }
 0x8de   : > { %2064 = vmatmul.f32.vlgmr.msra.gmra.mxu0 %v1782_v53  ;;  %2179 = vmatmul.f32.vlgmr.msra.gmra.mxu1 %v1782_v53  ;;  %v2309_v53 = vld [vmem:[%s4895_s10 + $0x188] sm:$0xff] }
 0x8df   : > { %2365 = vmatpush.msra.mxu0 %v2307_v5  ;;  %2399 = vmatpush.msrb.mxu1 %v2309_v53 }
 0x8e1   : > { %2366 = vmatpush.msra.mxu0 %v2306_v44 }
 0x8e3   : > { %v1779_v60 = vpop.f32.mrf.mxu3 }
 0x8e4   : > { %v1783_v4 = vsub.f32 %v1779_v60, %v4233_v39  ;;  %v2305_v39 = vld [vmem:[%s4895_s10 + $0x168] sm:$0xff] }
 0x8e5   : > { %2367 = vmatpush.msra.mxu0 %v2305_v39 }
 0x8e6   : > { %2067 = vmatmul.f32.gmra.mxu0 %v1783_v4  ;;  %2182 = vmatmul.f32.gmra.mxu1 %v1783_v4 }
 0x8ee   : > { %2156 = vmatmul.f32.vlgmr.msrb.gmra.mxu0 %v4417_v15  ;;  %v2304_v15 = vld [vmem:[%s4895_s10 + $0x160] sm:$0xff] }
 0x8ef   : > { %2368 = vmatpush.msra.mxu0 %v2304_v15  ;;  %v2308_v15 = vld [vmem:[%s4895_s10 + $0x180] sm:$0xff] }
 0x8f0   : > { %2400 = vmatpush.msrb.mxu1 %v2308_v15 }
 0x8f1   : > { %2369 = vmatpush.msra.mxu0 %v2303_v41 }
 0x8f3   : > { %2370 = vmatpush.msra.mxu0 %v2302_v7  ;;  %v2114_v7 = vpop.f32.mrf.mxu2 }
 0x8f5   : > { %2371 = vmatpush.msra.mxu0 %v2301_v11 }
 0x8f6   : > { %2159 = vmatmul.f32.gmra.mxu0 %v4414_v14  ;;  %v1996_v14 = vpop.f32.mrf.mxu1 }
 0x8f7   : > { %2372 = vmatpush.msra.mxu0 %v2300_v12  ;;  %v1997_v50 = vadd.f32 %v1996_v14, %v1973_v10 }
 0x8f9   : > { %2373 = vmatpush.msra.mxu0 %v2299_v13  ;;  %v2020_v29 = vadd.f32 %v2019_v31, %v1997_v50 }
 0x8fb   : > { %2374 = vmatpush.msra.mxu0 %v2298_v17  ;;  %v2042_v23 = vpop.f32.mrf.mxu3  ;;  %v2191_v17 = vperm.slane %v4305_v54, 3 }
 0x8fc   : > { %v2043_v34 = vadd.f32 %v2042_v23, %v2020_v29 }
 0x8fd   : > { %2375 = vmatpush.msra.mxu0 %v2297_v1 }
 0x8fe   : > { %v1999_v16 = vpop.f32.mrf.mxu1 }
 0x8ff   : > { %2376 = vmatpush.msra.mxu0 %v2296_v37  ;;  %v2000_v52 = vadd.f32 %v1999_v16, %v1976_v21 }
 0x901   : > { %2377 = vmatpush.msra.mxu0 %v2295_v18  ;;  %v2023_v22 = vadd.f32 %v2022_v30, %v2000_v52 }
 0x903   : > { %2378 = vmatpush.msra.mxu0 %v2294_v24  ;;  %v2045_v35 = vpop.f32.mrf.mxu3 }
 0x904   : > { %v2046_v27 = vadd.f32 %v2045_v35, %v2023_v22  ;;  %v2342_v35 = vpop.f32.mrf.mxu2 }
 0x905   : > { %2379 = vmatpush.msra.mxu0 %v2293_v46 }
 0x906   : > { %v2088_v26 = vpop.f32.mrf.mxu1 }
 0x907   : > { %2380 = vmatpush.msra.mxu0 %v2292_v33  ;;  %v2112_v56 = vadd.f32 %v2111_v45, %v2088_v26 }
 0x90e   : > { %v2091_v19 = vpop.f32.mrf.mxu1 }
 0x90f   : > { %v2115_v12 = vadd.f32 %v2114_v7, %v2091_v19 }
 0x91b   : > { %v2134_v51 = vpop.f32.mrf.mxu3 }
 0x91c   : > { %v2135_v60 = vadd.f32 %v2134_v51, %v2112_v56 }
 0x923   : > { %v2137_v11 = vpop.f32.mrf.mxu3 }
 0x924   : > { %v2138_v25 = vadd.f32 %v2137_v11, %v2115_v12 }
 0x93b   : > { %v2362_v36 = vpop.f32.mrf.mxu3 }
 0x95b   : > { %v2065_v32 = vpop.f32.mrf.mxu0  ;;  %v2180_v44 = vpop.f32.mrf.mxu1 }
 0x95c   : > { %v2066_v38 = vadd.f32 %v2065_v32, %v2043_v34  ;;  %v2324_v34 = vld [vmem:[%s4896_s11] sm:$0x1] }
 0x95d   : > { %v2343_v52 = vadd.f32 %v2342_v35, %v2324_v34 }
 0x95e   : > { %v2198_v9 = vadd.f32 %v2190_v58, %v2066_v38 }
 0x960   : > { %v2206_v43 = vmax.f32 %v2198_v9, 0.0 }
 0x962   : > { %v2226_v4 = vmul.f32 %v4310_v63, %v2206_v43 }
 0x963   : > { %v2068_v47 = vpop.f32.mrf.mxu0  ;;  %v2183_v37 = vpop.f32.mrf.mxu1 }
 0x964   : > { %v2069_v49 = vadd.f32 %v2068_v47, %v2046_v27 }
 0x966   : > { %v2202_v61 = vadd.f32 %v2190_v58, %v2069_v49  ;;  %v2363_v58 = vadd.f32 %v2362_v36, %v2343_v52 }
 0x968   : > { %v2210_v57 = vmax.f32 %v2202_v61, 0.0 }
 0x96a   : > { %v2230_v5 = vmul.f32 %v4331_v20, %v2210_v57 }
 0x96b   : > { %v2157_v39 = vpop.f32.mrf.mxu0 }
 0x96c   : > { %v2246_v14 = vadd.f32 %v2230_v5, %v2226_v4  ;;  %v2158_v41 = vadd.f32 %v2157_v39, %v2135_v60 }
 0x96e   : > { %v2247_v10 = vrot.slane %v2246_v14, 4  ;;  %v2181_v16 = vadd.f32 %v2180_v44, %v2158_v41 }
 0x970   : > { %v2248_v13 = vadd.f32 %v2247_v10, %v2246_v14  ;;  %v2199_v8 = vadd.f32 %v2191_v17, %v2181_v16 }
 0x972   : > { %v2249_v31 = vrot.slane %v2248_v13, 2  ;;  %v2207_v62 = vmax.f32 %v2199_v8, 0.0 }
 0x973   : > { %v2160_v1 = vpop.f32.mrf.mxu0 }
 0x974   : > { %v2161_v21 = vadd.f32 %v2160_v1, %v2138_v25  ;;  %v2250_v23 = vadd.f32 %v2249_v31, %v2248_v13  ;;  %v2227_v26 = vmul.f32 %v4310_v63, %v2207_v62  ;;  %v4831_v63 = vld [vmem:[%s4897_s12] sm:$0x7] }
 0x975   : > { %vm2406_vm2 = vcmp.gt.f32.partialorder %v4831_v63, 0.5 }
 0x976   : > { %v2184_v0 = vadd.f32 %v2183_v37, %v2161_v21  ;;  %v2251_v18 = vrot.slane %v2250_v23, 1 }
 0x978   : > { %v2203_v24 = vadd.f32 %v2191_v17, %v2184_v0  ;;  %v2252_v40 = vadd.f32 %v2251_v18, %v2250_v23 }
 0x97a   : > { %v2211_v50 = vmax.f32 %v2203_v24, 0.0  ;;  %2381 = vmatmul.f32.vlgmr.msra.gmra.mxu0 %v2252_v40 }
 0x97c   : > { %v2231_v46 = vmul.f32 %v4331_v20, %v2211_v50 }
 0x97e   : > { %v2253_v28 = vadd.f32 %v2231_v46, %v2227_v26 }
 0x980   : > { %v2254_v54 = vrot.slane %v2253_v28, 4 }
 0x982   : > { %v2255_v29 = vadd.f32 %v2254_v54, %v2253_v28 }
 0x984   : > { %v2256_v30 = vrot.slane %v2255_v29, 2 }
 0x986   : > { %v2257_v32 = vadd.f32 %v2256_v30, %v2255_v29 }
 0x988   : > { %v2258_v33 = vrot.slane %v2257_v32, 1 }
 0x98a   : > { %v2259_v2 = vadd.f32 %v2258_v33, %v2257_v32 }
 0x98c   : > { %2401 = vmatmul.f32.vlgmr.msrb.gmra.mxu1 %v2259_v2 }
 0x9f7   : > { %v2382_v38 = vpop.f32.mrf.mxu0 }
 0x9f8   : > { %v2383_v20 = vadd.f32 %v2382_v38, %v2363_v58 }
 0xa09   : > { %v2402_v6 = vpop.f32.mrf.mxu1 }
 0xa0a   : > { %v2403_v22 = vadd.f32 %v2402_v6, %v2383_v20 }
 0xa0c   : > { %v2407_v3 = vsel %vm2406_vm2, %v2403_v22, -1e+30  ;;  %v2443_v19 = vrot.slane %v2403_v22, 6  ;;  %v2423_v59 = vrot.slane %v2403_v22, 7 }
 0xa0d   : > { %v2409_v27 = vsel %vm2408_vm3, %v2407_v3, -inf }
 0xa0e   : > { %2410 = vmax.xlane.f32.xlu2 %v2409_v27  ;;  %v2445_v9 = vsel %vm2406_vm2, %v2443_v19, -1e+30  ;;  %v2425_v47 = vsel %vm2406_vm2, %v2423_v59, -1e+30 }
 0xa0f   : > { %v2447_v45 = vsel %vm2446_vm4, %v2445_v9, -inf  ;;  %v2427_v48 = vsel %vm2426_vm5, %v2425_v47, -inf }
 0xa10   : > { %2448 = vmax.xlane.f32.xlu0 %v2447_v45 }
 0xa16   : > { %2428 = vmax.xlane.f32.xlu2 %v2427_v48 }
 0xa81   : > { %v2411_v49 = vpop.xlane.xlu2 %2410 }
 0xa82   : > { %v2412_v51 = vsub.f32 %v2407_v3, %v2411_v49 }
 0xa83   : > { %v2449_v43 = vpop.xlane.xlu0 %2448 }
 0xa84   : > { %v2413_v42 = vmul.f32 1.442695, %v2412_v51  ;;  %v2450_v57 = vsub.f32 %v2445_v9, %v2449_v43 }
 0xa86   : > { %2666 = vpow2.f32 %v2413_v42  ;;  %v2451_v4 = vmul.f32 1.442695, %v2450_v57 }
 0xa89   : > { %v2429_v61 = vpop.xlane.xlu2 %2428 }
 0xa8a   : > { %v2430_v55 = vsub.f32 %v2425_v47, %v2429_v61 }
 0xa8c   : > { %v2667_v56 = vpop.eup %2666  ;;  %v2431_v53 = vmul.f32 1.442695, %v2430_v55 }
 0xa8d   : > { %v2415_v60 = vsel %vm2408_vm3, %v2667_v56, 0.0 }
 0xa8e   : > { %2668 = vpow2.f32 %v2431_v53  ;;  %2416 = vadd.xlane.f32.xlu1 %v2415_v60 }
 0xa8f   : > { %2670 = vpow2.f32 %v2451_v4 }
 0xa94   : > { %v2669_v5 = vpop.eup %2668 }
 0xa95   : > { %v2433_v44 = vsel %vm2426_vm5, %v2669_v5, 0.0  ;;  %v2671_v39 = vpop.eup %2670 }
 0xa96   : > { %2434 = vadd.xlane.f32.xlu2 %v2433_v44  ;;  %v2453_v15 = vsel %vm2446_vm4, %v2671_v39, 0.0 }
 0xa9e   : > { %2454 = vadd.xlane.f32.xlu2 %v2453_v15 }
 0xb01   : > { %v2417_v14 = vpop.xlane.xlu1 %2416 }
 0xb02   : > { %2672 = vlog2.f32 %v2417_v14 }
 0xb08   : > { %v2673_v41 = vpop.eup %2672 }
 0xb09   : > { %v2435_v7 = vpop.xlane.xlu2 %2434  ;;  %v2419_v10 = vmul.f32 0.6931472, %v2673_v41 }
 0xb0a   : > { %2674 = vlog2.f32 %v2435_v7 }
 0xb0b   : > { %v2420_v11 = vadd.f32 %v2419_v10, %v2411_v49 }
 0xb0d   : > { %v2421_v17 = vsel %vm2406_vm2, %v2420_v11, 0.0 }
 0xb0e   : > { %v2440_v31 = vrot.slane %v2421_v17, 7 }
 0xb10   : > { %v2675_v12 = vpop.eup %2674 }
 0xb11   : > { %v2437_v13 = vmul.f32 0.6931472, %v2675_v12  ;;  %v2455_v16 = vpop.xlane.xlu2 %2454 }
 0xb12   : > { %2676 = vlog2.f32 %v2455_v16 }
 0xb13   : > { %v2438_v25 = vadd.f32 %v2437_v13, %v2429_v61 }
 0xb15   : > { %v2442_v8 = vsel %vm2406_vm2, %v2438_v25, %v2440_v31 }
 0xb16   : > { %v2460_v23 = vrot.slane %v2442_v8, 7 }
 0xb18   : > { %v2677_v1 = vpop.eup %2676 }
 0xb19   : > { %v2457_v21 = vmul.f32 0.6931472, %v2677_v1 }
 0xb1b   : > { %v2458_v37 = vadd.f32 %v2457_v21, %v2449_v43 }
 0xb1d   : > { %v2462_v0 = vsel %vm2406_vm2, %v2458_v37, %v2460_v23 }
 0xb1e   : > { %v2464_v18 = vrot.slane %v2462_v0, 2 }
 0xb20   : > { %v2466_v62 = vsub.f32 %v2403_v22, %v2464_v18 }
 0xb22   : > { %2467 = vst.msk [vmem:[%s477_s20] sm:$0x1] %vm2408_vm3, %v2466_v62 }
 0xb23   : > { %2709 = shalt.err (!%p2706_p3)
}
 0xb24   : > { %2622 = dma.vmem_to_hbm [thread:$0]  (%p2856_p5), %s2480_s15, 16, %s2482_s0, %s2469_s2  }
 0xb25 PF: > { %p2628_p4 = scmp.ge.s32.totalorder %s2744_s28, 2  ;;  %s2493_s23 = sand.u32 1, %s2732_s25  }
 0xb26   : > { %s2494_s24 = scalar_lea.sflag [#allocation4], %s2493_s23 }
 0xb27   : > { %p2625_p7 = pnand %p2628_p4, %p2860_p6 }
 0xb29   : > { %p2626_p8 = pneg %p2625_p7 }
 0xb2b   : > { %2727 = dma.done.wait (%p2626_p8), %s2494_s24, 16  }
 0xb2c   : > { %2729 = vsyncadd (%p2626_p8), %s2494_s24, 4294967280  ;;  %s4910_s30 = sld [smem:[#allocation6_spill]]  ;;  %p23_p9 = scmp.ge.s32.totalorder %s2843_s14, 4  }
 0xb2d   : > { %s4911_s27 = sld [smem:[#allocation7_spill]]  ;;  %s4912_s25 = smov %s2736_s26 }
 0xb2e   : > { %s4914_s28 = smov %s2843_s14  ;;  %25 = sbr.rel (!%p23_p9) target bundleno = 7 (0x7), region = 116 }
 0xb32   : > { %s4913_s26 = smov %s4910_s30 }
 0xb33   :  { %2499 = vsyncpa [#allocation4], 1 }
 0xb34   :  { %2501 = vsyncpa [#allocation4 + $0x1], 1 }

</bundles_post_ra>
